<compile_context>
chip_gen: v7x
topology: tpu7x:2x2x1
jax: 0.10.0
libtpu: 0.0.40
codegen_flags: <defaults>
</compile_context>

<pallas_src>
import jax
import jax.numpy as jnp
from jax import lax
from jax.experimental import pallas as pl
from jax.experimental.pallas import tpu as pltpu

BN_EPS = 1e-5
LANE = 128       # pad channel dims to lane width -> unmasked vector stores
TM_MAX = 512     # M-tile rows (see header comment)


def _round_up(x, m):
    return (x + m - 1) // m * m


# ---------------------------------------------------------------------------
# Pass 1: im2col matmul (bf16 in, f32 accumulate) + per-channel batch stats
#         (sum, sum of squares) accumulated over the M ("arbitrary") grid axis.
# ---------------------------------------------------------------------------
def _matmul_stats_kernel(p_ref, w_ref, y_ref, sum_ref, sq_ref):
    i = pl.program_id(1)  # M-tile index (stats reduction axis, last in grid)
    y = jnp.dot(p_ref[...], w_ref[...], preferred_element_type=jnp.float32)
    y_ref[...] = y

    @pl.when(i == 0)
    def _init():
        sum_ref[...] = jnp.zeros_like(sum_ref)
        sq_ref[...] = jnp.zeros_like(sq_ref)

    sum_ref[...] += jnp.sum(y, axis=0, keepdims=True)
    sq_ref[...] += jnp.sum(y * y, axis=0, keepdims=True)


# ---------------------------------------------------------------------------
# Pass 2: fused BatchNorm affine + ReLU:  out = max(y * s + t, 0)
# ---------------------------------------------------------------------------
def _scale_shift_relu_kernel(y_ref, s_ref, t_ref, o_ref):
    o_ref[...] = jnp.maximum(y_ref[...] * s_ref[...] + t_ref[...], 0.0)


def conv_bn_relu_nhwc(x, w, gamma, beta, *, stride):
    """3x3 conv (pad=1) + training-mode BatchNorm2d + ReLU. NHWC in / NHWC out.

    The nn.Conv2d bias is intentionally not an argument: training-mode BN
    subtracts the per-channel batch mean, which exactly cancels it.
    """
    N, H, W, Cin = x.shape
    Cout = w.shape[0]
    kh = kw = 3
    Ho = (H + 2 - kh) // stride + 1
    Wo = (W + 2 - kw) // stride + 1

    # -- im2col in NHWC-contiguous order (no full-array transpose pass) ------
    # TODO(synk): fully eliminate the 9x patches materialization by computing
    # the conv in-kernel as a sum of 9 shifted (TM,Cin)@(Cin,Cout) matmuls
    # reading the padded NHWC input directly.
    xp = jnp.pad(x, ((0, 0), (1, 1), (1, 1), (0, 0)))
    taps = [xp[:, dh:dh + stride * Ho:stride, dw:dw + stride * Wo:stride, :]
            for dh in range(kh) for dw in range(kw)]
    patches = jnp.concatenate(taps, axis=-1).reshape(N * Ho * Wo, kh * kw * Cin)
    # Matching weight layout: K index = (dh*3 + dw)*Cin + cin
    w_mat = jnp.transpose(w, (2, 3, 1, 0)).reshape(kh * kw * Cin, Cout)

    M, K = patches.shape
    TN = LANE
    Coutp = _round_up(Cout, TN)
    TM = min(TM_MAX, _round_up(M, 8))
    Mp = _round_up(M, TM)
    n_mt = Mp // TM
    n_ct = Coutp // TN

    # bf16 MXU inputs; zero-padded rows/lanes do not perturb the statistics
    # because mean/var below divide by the true M.
    patches_p = jnp.pad(patches, ((0, Mp - M), (0, 0))).astype(jnp.bfloat16)
    w_p = jnp.pad(w_mat, ((0, 0), (0, Coutp - Cout))).astype(jnp.bfloat16)

    y, ssum, ssq = pl.pallas_call(
        _matmul_stats_kernel,
        out_shape=(
            jax.ShapeDtypeStruct((Mp, Coutp), jnp.float32),
            jax.ShapeDtypeStruct((1, Coutp), jnp.float32),
            jax.ShapeDtypeStruct((1, Coutp), jnp.float32),
        ),
        grid=(n_ct, n_mt),  # Cout tiles (parallel, megacore) x M tiles (arbitrary)
        in_specs=[
            pl.BlockSpec((TM, K), lambda j, i: (i, 0)),
            pl.BlockSpec((K, TN), lambda j, i: (0, j)),
        ],
        out_specs=(
            pl.BlockSpec((TM, TN), lambda j, i: (i, j)),
            pl.BlockSpec((1, TN), lambda j, i: (0, j)),
            pl.BlockSpec((1, TN), lambda j, i: (0, j)),
        ),
        compiler_params=pltpu.CompilerParams(
            dimension_semantics=("parallel", "arbitrary")),
    )(patches_p, w_p)

    # -- tiny per-channel math: fused BN scale/shift (f32, computed once) ----
    m = jnp.float32(M)
    mean = ssum / m
    var = jnp.maximum(ssq / m - mean * mean, 0.0)
    gamma_p = jnp.pad(gamma, (0, Coutp - Cout)).reshape(1, Coutp).astype(jnp.float32)
    beta_p = jnp.pad(beta, (0, Coutp - Cout)).reshape(1, Coutp).astype(jnp.float32)
    s = gamma_p * lax.rsqrt(var + BN_EPS)
    t = beta_p - mean * s

    out = pl.pallas_call(
        _scale_shift_relu_kernel,
        out_shape=jax.ShapeDtypeStruct((Mp, Coutp), jnp.float32),
        grid=(n_ct, n_mt),
        in_specs=[
            pl.BlockSpec((TM, TN), lambda j, i: (i, j)),
            pl.BlockSpec((1, TN), lambda j, i: (0, j)),
            pl.BlockSpec((1, TN), lambda j, i: (0, j)),
        ],
        out_specs=pl.BlockSpec((TM, TN), lambda j, i: (i, j)),
        compiler_params=pltpu.CompilerParams(
            dimension_semantics=("parallel", "parallel")),
    )(y, s, t)

    return out[:M, :Cout].reshape(N, Ho, Wo, Cout)


# ---------------------------------------------------------------------------
# Fused head: h = feat @ w1 + b1 ; y = h @ w2 + b2   (lane-padded, one call)
# ---------------------------------------------------------------------------
def _head_kernel(x_ref, w1_ref, b1_ref, w2_ref, b2_ref, h_ref, y_ref):
    h = jnp.dot(x_ref[...], w1_ref[...], preferred_element_type=jnp.float32) + b1_ref[...]
    h_ref[...] = h
    y_ref[...] = jnp.dot(h, w2_ref[...], preferred_element_type=jnp.float32) + b2_ref[...]


def linear_head(feat, w1, b1, w2, b2):
    M, K = feat.shape
    D1 = w1.shape[1]   # 2
    D2 = w2.shape[1]   # 10
    Mp = _round_up(M, 8)
    Dp = LANE          # pad both tiny output dims to one lane tile

    x_p = jnp.pad(feat, ((0, Mp - M), (0, 0))).astype(jnp.float32)
    w1_p = jnp.pad(w1, ((0, 0), (0, Dp - D1))).astype(jnp.float32)
    b1_p = jnp.pad(b1, (0, Dp - D1)).reshape(1, Dp).astype(jnp.float32)
    # w2 occupies the top-left (D1, D2) corner; h's padded columns are zero so
    # the zero rows of w2_p contribute nothing.
    w2_p = jnp.zeros((Dp, Dp), jnp.float32).at[:D1, :D2].set(w2.astype(jnp.float32))
    b2_p = jnp.pad(b2, (0, Dp - D2)).reshape(1, Dp).astype(jnp.float32)

    h, y = pl.pallas_call(
        _head_kernel,
        out_shape=(
            jax.ShapeDtypeStruct((Mp, Dp), jnp.float32),
            jax.ShapeDtypeStruct((Mp, Dp), jnp.float32),
        ),
        grid=(1,),
        in_specs=[
            pl.BlockSpec((Mp, K), lambda i: (0, 0)),
            pl.BlockSpec((K, Dp), lambda i: (0, 0)),
            pl.BlockSpec((1, Dp), lambda i: (0, 0)),
            pl.BlockSpec((Dp, Dp), lambda i: (0, 0)),
            pl.BlockSpec((1, Dp), lambda i: (0, 0)),
        ],
        out_specs=(
            pl.BlockSpec((Mp, Dp), lambda i: (0, 0)),
            pl.BlockSpec((Mp, Dp), lambda i: (0, 0)),
        ),
    )(x_p, w1_p, b1_p, w2_p, b2_p)

    return h[:M, :D1], y[:M, :D2]


# ---------------------------------------------------------------------------
# Full ImageClassify.forward
# ---------------------------------------------------------------------------
@jax.jit
def image_classify(x_nchw, params):
    # NHWC internally: one transpose at the input; final feature map is
    # (N,1,1,256) so Flatten needs no transpose back to NCHW.
    x = jnp.transpose(x_nchw, (0, 2, 3, 1)).astype(jnp.float32)
    for layer in params["conv"]:
        x = conv_bn_relu_nhwc(x, layer["w"], layer["gamma"], layer["beta"], stride=2)
    feat = x.reshape(x.shape[0], -1)                 # (N, 256)
    h, y = linear_head(feat, params["w1"], params["b1"], params["w2"], params["b2"])
    return y, h


def _reference(x_nchw, params):
    """Pure-JAX reference of ImageClassify.forward (training-mode BN, NCHW).

    Conv activations/weights are rounded to bf16 to mirror what the Pallas
    kernels feed the MXU (accumulation stays f32), so the comparison isolates
    kernel correctness rather than bf16-vs-f32 rounding.  The conv bias IS
    applied here (as nn.Conv2d does); train-mode BN cancels it, which the
    matching outputs demonstrate.
    """
    x = x_nchw.astype(jnp.float32)
    for layer in params["conv"]:
        xq = x.astype(jnp.bfloat16).astype(jnp.float32)
        wq = layer["w"].astype(jnp.bfloat16).astype(jnp.float32)
        y = lax.conv_general_dilated(
            xq, wq, window_strides=(2, 2), padding=((1, 1), (1, 1)),
            dimension_numbers=("NCHW", "OIHW", "NCHW"))
        y = y + layer["b"][None, :, None, None]
        mean = jnp.mean(y, axis=(0, 2, 3), keepdims=True)
        var = jnp.mean((y - mean) ** 2, axis=(0, 2, 3), keepdims=True)
        y = (y - mean) * lax.rsqrt(var + BN_EPS)
        y = y * layer["gamma"][None, :, None, None] + layer["beta"][None, :, None, None]
        x = jnp.maximum(y, 0.0)
    feat = x.reshape(x.shape[0], -1)
    h = feat @ params["w1"] + params["b1"]
    y = h @ params["w2"] + params["b2"]
    return y, h


if __name__ == "__main__":
    key = jax.random.PRNGKey(0)
    key, kx = jax.random.split(key)
    N = 2
    x = jax.random.normal(kx, (N, 3, 32, 32), dtype=jnp.float32)  # CIFAR-sized input

    channels = [3, 16, 32, 64, 128, 256]
    conv_layers = []
    for li in range(5):
        key, kw_, kb_, kg_, kbt_ = jax.random.split(key, 5)
        cin, cout = channels[li], channels[li + 1]
        conv_layers.append(dict(
            w=0.1 * jax.random.normal(kw_, (cout, cin, 3, 3), dtype=jnp.float32),
            b=0.1 * jax.random.normal(kb_, (cout,), dtype=jnp.float32),
            gamma=1.0 + 0.1 * jax.random.normal(kg_, (cout,), dtype=jnp.float32),
            beta=0.1 * jax.random.normal(kbt_, (cout,), dtype=jnp.float32),
        ))
    key, k1, k2, k3, k4 = jax.random.split(key, 5)
    params = dict(
        conv=conv_layers,
        w1=0.1 * jax.random.normal(k1, (256, 2), dtype=jnp.float32),
        b1=0.1 * jax.random.normal(k2, (2,), dtype=jnp.float32),
        w2=0.3 * jax.random.normal(k3, (2, 10), dtype=jnp.float32),
        b2=0.1 * jax.random.normal(k4, (10,), dtype=jnp.float32),
    )

    out_y, out_h = image_classify(x, params)
    out_y, out_h = jax.block_until_ready((out_y, out_h))

    ref_y, ref_h = _reference(x, params)
    assert out_y.shape == (N, 10) and out_h.shape == (N, 2), (out_y.shape, out_h.shape)
    assert jnp.allclose(out_h, ref_h, atol=2e-2, rtol=2e-2), \
        float(jnp.max(jnp.abs(out_h - ref_h)))
    assert jnp.allclose(out_y, ref_y, atol=2e-2, rtol=2e-2), \
        float(jnp.max(jnp.abs(out_y - ref_y)))

    print("KERNEL_OK")
</pallas_src>

<mosaic_0001>
module attributes {stable_mosaic.version = 11 : i64} {
  func.func @_matmul_stats_kernel(%arg0: i32, %arg1: i32, %arg2: memref<512x27xbf16, #tpu.memory_space<vmem>>, %arg3: memref<27x128xbf16, #tpu.memory_space<vmem>>, %arg4: memref<512x128xf32, #tpu.memory_space<vmem>>, %arg5: memref<1x128xf32, #tpu.memory_space<vmem>>, %arg6: memref<1x128xf32, #tpu.memory_space<vmem>>) attributes {dimension_semantics = [#tpu.dimension_semantics<parallel>, #tpu.dimension_semantics<arbitrary>], iteration_bounds = array<i64: 1, 1>, scalar_prefetch = 0 : i64, scratch_operands = 0 : i64, tpu.core_type = #tpu.core_type<tc>, window_params = [{transform_indices = @transform_0, window_bounds = array<i64: 512, 27>}, {transform_indices = @transform_1, window_bounds = array<i64: 27, 128>}, {transform_indices = @transform_2, window_bounds = array<i64: 512, 128>}, {transform_indices = @transform_3, window_bounds = array<i64: 1, 128>}, {transform_indices = @transform_4, window_bounds = array<i64: 1, 128>}]} {
    %c0 = arith.constant 0 : index
    %c0_0 = arith.constant 0 : index
    %0 = vector.load %arg2[%c0, %c0_0] : memref<512x27xbf16, #tpu.memory_space<vmem>>, vector<512x27xbf16>
    %c0_1 = arith.constant 0 : index
    %c0_2 = arith.constant 0 : index
    %1 = vector.load %arg3[%c0_1, %c0_2] : memref<27x128xbf16, #tpu.memory_space<vmem>>, vector<27x128xbf16>
    %cst = arith.constant dense<0.000000e+00> : vector<512x128xf32>
    %2 = tpu.matmul %0, %1, %cst {dimension_numbers = #tpu.dot_dimension_numbers<[1], [0], [0], [1], [0, 0, 1, 1], [], []>} : vector<512x27xbf16>, vector<27x128xbf16>, vector<512x128xf32> -> vector<512x128xf32>
    %c0_3 = arith.constant 0 : index
    %c0_4 = arith.constant 0 : index
    %3 = vector.load %arg4[%c0_3, %c0_4] : memref<512x128xf32, #tpu.memory_space<vmem>>, vector<512x128xf32>
    tpu.vector_store %arg4[%c0_3, %c0_4], %2 {strides = array<i32>} : memref<512x128xf32, #tpu.memory_space<vmem>>, vector<512x128xf32>,
    %c0_i32 = arith.constant 0 : i32
    %4 = arith.cmpi eq, %arg1, %c0_i32 : i32
    %5 = arith.extui %4 : i1 to i32
    %c0_i32_5 = arith.constant 0 : i32
    %6 = arith.cmpi ne, %5, %c0_i32_5 : i32
    scf.if %6 {
      %cst_16 = arith.constant 0.000000e+00 : f32
      %18 = vector.broadcast %cst_16 : f32 to vector<1x128xf32>
      %c0_17 = arith.constant 0 : index
      %c0_18 = arith.constant 0 : index
      %19 = vector.load %arg5[%c0_17, %c0_18] : memref<1x128xf32, #tpu.memory_space<vmem>>, vector<1x128xf32>
      tpu.vector_store %arg5[%c0_17, %c0_18], %18 {strides = array<i32>} : memref<1x128xf32, #tpu.memory_space<vmem>>, vector<1x128xf32>,
      %cst_19 = arith.constant 0.000000e+00 : f32
      %20 = vector.broadcast %cst_19 : f32 to vector<1x128xf32>
      %c0_20 = arith.constant 0 : index
      %c0_21 = arith.constant 0 : index
      %21 = vector.load %arg6[%c0_20, %c0_21] : memref<1x128xf32, #tpu.memory_space<vmem>>, vector<1x128xf32>
      tpu.vector_store %arg6[%c0_20, %c0_21], %20 {strides = array<i32>} : memref<1x128xf32, #tpu.memory_space<vmem>>, vector<1x128xf32>,
    } else {
    }
    %c0_6 = arith.constant 0 : index
    %c0_7 = arith.constant 0 : index
    %7 = vector.load %arg5[%c0_6, %c0_7] : memref<1x128xf32, #tpu.memory_space<vmem>>, vector<1x128xf32>
    %cst_8 = arith.constant dense<0.000000e+00> : vector<128xf32>
    %8 = vector.multi_reduction <add>, %2, %cst_8 [0] : vector<512x128xf32> to vector<128xf32>
    %9 = vector.shape_cast %8 : vector<128xf32> to vector<1x128xf32>
    %10 = arith.addf %7, %9 : vector<1x128xf32>
    %c0_9 = arith.constant 0 : index
    %c0_10 = arith.constant 0 : index
    %11 = vector.load %arg5[%c0_9, %c0_10] : memref<1x128xf32, #tpu.memory_space<vmem>>, vector<1x128xf32>
    tpu.vector_store %arg5[%c0_9, %c0_10], %10 {strides = array<i32>} : memref<1x128xf32, #tpu.memory_space<vmem>>, vector<1x128xf32>,
    %c0_11 = arith.constant 0 : index
    %c0_12 = arith.constant 0 : index
    %12 = vector.load %arg6[%c0_11, %c0_12] : memref<1x128xf32, #tpu.memory_space<vmem>>, vector<1x128xf32>
    %13 = arith.mulf %2, %2 : vector<512x128xf32>
    %cst_13 = arith.constant dense<0.000000e+00> : vector<128xf32>
    %14 = vector.multi_reduction <add>, %13, %cst_13 [0] : vector<512x128xf32> to vector<128xf32>
    %15 = vector.shape_cast %14 : vector<128xf32> to vector<1x128xf32>
    %16 = arith.addf %12, %15 : vector<1x128xf32>
    %c0_14 = arith.constant 0 : index
    %c0_15 = arith.constant 0 : index
    %17 = vector.load %arg6[%c0_14, %c0_15] : memref<1x128xf32, #tpu.memory_space<vmem>>, vector<1x128xf32>
    tpu.vector_store %arg6[%c0_14, %c0_15], %16 {strides = array<i32>} : memref<1x128xf32, #tpu.memory_space<vmem>>, vector<1x128xf32>,
    return
  }
  func.func @transform_0(%arg0: i32, %arg1: i32) -> (i32, i32) {
    %c0_i32 = arith.constant 0 : i32
    %c0_i32_0 = arith.constant 0 : i32
    return %arg1, %c0_i32 : i32, i32
  }
  func.func @transform_1(%arg0: i32, %arg1: i32) -> (i32, i32) {
    %c0_i32 = arith.constant 0 : i32
    %c0_i32_0 = arith.constant 0 : i32
    return %c0_i32, %arg0 : i32, i32
  }
  func.func @transform_2(%arg0: i32, %arg1: i32) -> (i32, i32) {
    %c0_i32 = arith.constant 0 : i32
    return %arg1, %arg0 : i32, i32
  }
  func.func @transform_3(%arg0: i32, %arg1: i32) -> (i32, i32) {
    %c0_i32 = arith.constant 0 : i32
    %c0_i32_0 = arith.constant 0 : i32
    return %c0_i32, %arg0 : i32, i32
  }
  func.func @transform_4(%arg0: i32, %arg1: i32) -> (i32, i32) {
    %c0_i32 = arith.constant 0 : i32
    %c0_i32_0 = arith.constant 0 : i32
    return %c0_i32, %arg0 : i32, i32
  }
}

module attributes {stable_mosaic.version = 11 : i64} {
  func.func @_scale_shift_relu_kernel(%arg0: i32, %arg1: i32, %arg2: memref<512x128xf32, #tpu.memory_space<vmem>>, %arg3: memref<1x128xf32, #tpu.memory_space<vmem>>, %arg4: memref<1x128xf32, #tpu.memory_space<vmem>>, %arg5: memref<512x128xf32, #tpu.memory_space<vmem>>) attributes {dimension_semantics = [#tpu.dimension_semantics<parallel>, #tpu.dimension_semantics<parallel>], iteration_bounds = array<i64: 1, 1>, scalar_prefetch = 0 : i64, scratch_operands = 0 : i64, tpu.core_type = #tpu.core_type<tc>, window_params = [{transform_indices = @transform_0, window_bounds = array<i64: 512, 128>}, {transform_indices = @transform_1, window_bounds = array<i64: 1, 128>}, {transform_indices = @transform_2, window_bounds = array<i64: 1, 128>}, {transform_indices = @transform_3, window_bounds = array<i64: 512, 128>}]} {
    %c0 = arith.constant 0 : index
    %c0_0 = arith.constant 0 : index
    %0 = vector.load %arg2[%c0, %c0_0] : memref<512x128xf32, #tpu.memory_space<vmem>>, vector<512x128xf32>
    %c0_1 = arith.constant 0 : index
    %c0_2 = arith.constant 0 : index
    %1 = vector.load %arg3[%c0_1, %c0_2] : memref<1x128xf32, #tpu.memory_space<vmem>>, vector<1x128xf32>
    %2 = vector.broadcast %1 : vector<1x128xf32> to vector<512x128xf32>
    %3 = arith.mulf %0, %2 : vector<512x128xf32>
    %c0_3 = arith.constant 0 : index
    %c0_4 = arith.constant 0 : index
    %4 = vector.load %arg4[%c0_3, %c0_4] : memref<1x128xf32, #tpu.memory_space<vmem>>, vector<1x128xf32>
    %5 = vector.broadcast %4 : vector<1x128xf32> to vector<512x128xf32>
    %6 = arith.addf %3, %5 : vector<512x128xf32>
    %cst = arith.constant 0.000000e+00 : f32
    %7 = vector.broadcast %cst : f32 to vector<512x128xf32>
    %8 = arith.maximumf %6, %7 : vector<512x128xf32>
    %c0_5 = arith.constant 0 : index
    %c0_6 = arith.constant 0 : index
    %9 = vector.load %arg5[%c0_5, %c0_6] : memref<512x128xf32, #tpu.memory_space<vmem>>, vector<512x128xf32>
    tpu.vector_store %arg5[%c0_5, %c0_6], %8 {strides = array<i32>} : memref<512x128xf32, #tpu.memory_space<vmem>>, vector<512x128xf32>,
    return
  }
  func.func @transform_0(%arg0: i32, %arg1: i32) -> (i32, i32) {
    %c0_i32 = arith.constant 0 : i32
    return %arg1, %arg0 : i32, i32
  }
  func.func @transform_1(%arg0: i32, %arg1: i32) -> (i32, i32) {
    %c0_i32 = arith.constant 0 : i32
    %c0_i32_0 = arith.constant 0 : i32
    return %c0_i32, %arg0 : i32, i32
  }
  func.func @transform_2(%arg0: i32, %arg1: i32) -> (i32, i32) {
    %c0_i32 = arith.constant 0 : i32
    %c0_i32_0 = arith.constant 0 : i32
    return %c0_i32, %arg0 : i32, i32
  }
  func.func @transform_3(%arg0: i32, %arg1: i32) -> (i32, i32) {
    %c0_i32 = arith.constant 0 : i32
    return %arg1, %arg0 : i32, i32
  }
}

module attributes {stable_mosaic.version = 11 : i64} {
  func.func @_scale_shift_relu_kernel(%arg0: i32, %arg1: i32, %arg2: memref<128x128xf32, #tpu.memory_space<vmem>>, %arg3: memref<1x128xf32, #tpu.memory_space<vmem>>, %arg4: memref<1x128xf32, #tpu.memory_space<vmem>>, %arg5: memref<128x128xf32, #tpu.memory_space<vmem>>) attributes {dimension_semantics = [#tpu.dimension_semantics<parallel>, #tpu.dimension_semantics<parallel>], iteration_bounds = array<i64: 1, 1>, scalar_prefetch = 0 : i64, scratch_operands = 0 : i64, tpu.core_type = #tpu.core_type<tc>, window_params = [{transform_indices = @transform_0, window_bounds = array<i64: 128, 128>}, {transform_indices = @transform_1, window_bounds = array<i64: 1, 128>}, {transform_indices = @transform_2, window_bounds = array<i64: 1, 128>}, {transform_indices = @transform_3, window_bounds = array<i64: 128, 128>}]} {
    %c0 = arith.constant 0 : index
    %c0_0 = arith.constant 0 : index
    %0 = vector.load %arg2[%c0, %c0_0] : memref<128x128xf32, #tpu.memory_space<vmem>>, vector<128x128xf32>
    %c0_1 = arith.constant 0 : index
    %c0_2 = arith.constant 0 : index
    %1 = vector.load %arg3[%c0_1, %c0_2] : memref<1x128xf32, #tpu.memory_space<vmem>>, vector<1x128xf32>
    %2 = vector.broadcast %1 : vector<1x128xf32> to vector<128x128xf32>
    %3 = arith.mulf %0, %2 : vector<128x128xf32>
    %c0_3 = arith.constant 0 : index
    %c0_4 = arith.constant 0 : index
    %4 = vector.load %arg4[%c0_3, %c0_4] : memref<1x128xf32, #tpu.memory_space<vmem>>, vector<1x128xf32>
    %5 = vector.broadcast %4 : vector<1x128xf32> to vector<128x128xf32>
    %6 = arith.addf %3, %5 : vector<128x128xf32>
    %cst = arith.constant 0.000000e+00 : f32
    %7 = vector.broadcast %cst : f32 to vector<128x128xf32>
    %8 = arith.maximumf %6, %7 : vector<128x128xf32>
    %c0_5 = arith.constant 0 : index
    %c0_6 = arith.constant 0 : index
    %9 = vector.load %arg5[%c0_5, %c0_6] : memref<128x128xf32, #tpu.memory_space<vmem>>, vector<128x128xf32>
    tpu.vector_store %arg5[%c0_5, %c0_6], %8 {strides = array<i32>} : memref<128x128xf32, #tpu.memory_space<vmem>>, vector<128x128xf32>,
    return
  }
  func.func @transform_0(%arg0: i32, %arg1: i32) -> (i32, i32) {
    %c0_i32 = arith.constant 0 : i32
    return %arg1, %arg0 : i32, i32
  }
  func.func @transform_1(%arg0: i32, %arg1: i32) -> (i32, i32) {
    %c0_i32 = arith.constant 0 : i32
    %c0_i32_0 = arith.constant 0 : i32
    return %c0_i32, %arg0 : i32, i32
  }
  func.func @transform_2(%arg0: i32, %arg1: i32) -> (i32, i32) {
    %c0_i32 = arith.constant 0 : i32
    %c0_i32_0 = arith.constant 0 : i32
    return %c0_i32, %arg0 : i32, i32
  }
  func.func @transform_3(%arg0: i32, %arg1: i32) -> (i32, i32) {
    %c0_i32 = arith.constant 0 : i32
    return %arg1, %arg0 : i32, i32
  }
}

module attributes {stable_mosaic.version = 11 : i64} {
  func.func @_matmul_stats_kernel(%arg0: i32, %arg1: i32, %arg2: memref<128x144xbf16, #tpu.memory_space<vmem>>, %arg3: memref<144x128xbf16, #tpu.memory_space<vmem>>, %arg4: memref<128x128xf32, #tpu.memory_space<vmem>>, %arg5: memref<1x128xf32, #tpu.memory_space<vmem>>, %arg6: memref<1x128xf32, #tpu.memory_space<vmem>>) attributes {dimension_semantics = [#tpu.dimension_semantics<parallel>, #tpu.dimension_semantics<arbitrary>], iteration_bounds = array<i64: 1, 1>, scalar_prefetch = 0 : i64, scratch_operands = 0 : i64, tpu.core_type = #tpu.core_type<tc>, window_params = [{transform_indices = @transform_0, window_bounds = array<i64: 128, 144>}, {transform_indices = @transform_1, window_bounds = array<i64: 144, 128>}, {transform_indices = @transform_2, window_bounds = array<i64: 128, 128>}, {transform_indices = @transform_3, window_bounds = array<i64: 1, 128>}, {transform_indices = @transform_4, window_bounds = array<i64: 1, 128>}]} {
    %c0 = arith.constant 0 : index
    %c0_0 = arith.constant 0 : index
    %0 = vector.load %arg2[%c0, %c0_0] : memref<128x144xbf16, #tpu.memory_space<vmem>>, vector<128x144xbf16>
    %c0_1 = arith.constant 0 : index
    %c0_2 = arith.constant 0 : index
    %1 = vector.load %arg3[%c0_1, %c0_2] : memref<144x128xbf16, #tpu.memory_space<vmem>>, vector<144x128xbf16>
    %cst = arith.constant dense<0.000000e+00> : vector<128x128xf32>
    %2 = tpu.matmul %0, %1, %cst {dimension_numbers = #tpu.dot_dimension_numbers<[1], [0], [0], [1], [0, 0, 1, 1], [], []>} : vector<128x144xbf16>, vector<144x128xbf16>, vector<128x128xf32> -> vector<128x128xf32>
    %c0_3 = arith.constant 0 : index
    %c0_4 = arith.constant 0 : index
    %3 = vector.load %arg4[%c0_3, %c0_4] : memref<128x128xf32, #tpu.memory_space<vmem>>, vector<128x128xf32>
    tpu.vector_store %arg4[%c0_3, %c0_4], %2 {strides = array<i32>} : memref<128x128xf32, #tpu.memory_space<vmem>>, vector<128x128xf32>,
    %c0_i32 = arith.constant 0 : i32
    %4 = arith.cmpi eq, %arg1, %c0_i32 : i32
    %5 = arith.extui %4 : i1 to i32
    %c0_i32_5 = arith.constant 0 : i32
    %6 = arith.cmpi ne, %5, %c0_i32_5 : i32
    scf.if %6 {
      %cst_16 = arith.constant 0.000000e+00 : f32
      %18 = vector.broadcast %cst_16 : f32 to vector<1x128xf32>
      %c0_17 = arith.constant 0 : index
      %c0_18 = arith.constant 0 : index
      %19 = vector.load %arg5[%c0_17, %c0_18] : memref<1x128xf32, #tpu.memory_space<vmem>>, vector<1x128xf32>
      tpu.vector_store %arg5[%c0_17, %c0_18], %18 {strides = array<i32>} : memref<1x128xf32, #tpu.memory_space<vmem>>, vector<1x128xf32>,
      %cst_19 = arith.constant 0.000000e+00 : f32
      %20 = vector.broadcast %cst_19 : f32 to vector<1x128xf32>
      %c0_20 = arith.constant 0 : index
      %c0_21 = arith.constant 0 : index
      %21 = vector.load %arg6[%c0_20, %c0_21] : memref<1x128xf32, #tpu.memory_space<vmem>>, vector<1x128xf32>
      tpu.vector_store %arg6[%c0_20, %c0_21], %20 {strides = array<i32>} : memref<1x128xf32, #tpu.memory_space<vmem>>, vector<1x128xf32>,
    } else {
    }
    %c0_6 = arith.constant 0 : index
    %c0_7 = arith.constant 0 : index
    %7 = vector.load %arg5[%c0_6, %c0_7] : memref<1x128xf32, #tpu.memory_space<vmem>>, vector<1x128xf32>
    %cst_8 = arith.constant dense<0.000000e+00> : vector<128xf32>
    %8 = vector.multi_reduction <add>, %2, %cst_8 [0] : vector<128x128xf32> to vector<128xf32>
    %9 = vector.shape_cast %8 : vector<128xf32> to vector<1x128xf32>
    %10 = arith.addf %7, %9 : vector<1x128xf32>
    %c0_9 = arith.constant 0 : index
    %c0_10 = arith.constant 0 : index
    %11 = vector.load %arg5[%c0_9, %c0_10] : memref<1x128xf32, #tpu.memory_space<vmem>>, vector<1x128xf32>
    tpu.vector_store %arg5[%c0_9, %c0_10], %10 {strides = array<i32>} : memref<1x128xf32, #tpu.memory_space<vmem>>, vector<1x128xf32>,
    %c0_11 = arith.constant 0 : index
    %c0_12 = arith.constant 0 : index
    %12 = vector.load %arg6[%c0_11, %c0_12] : memref<1x128xf32, #tpu.memory_space<vmem>>, vector<1x128xf32>
    %13 = arith.mulf %2, %2 : vector<128x128xf32>
    %cst_13 = arith.constant dense<0.000000e+00> : vector<128xf32>
    %14 = vector.multi_reduction <add>, %13, %cst_13 [0] : vector<128x128xf32> to vector<128xf32>
    %15 = vector.shape_cast %14 : vector<128xf32> to vector<1x128xf32>
    %16 = arith.addf %12, %15 : vector<1x128xf32>
    %c0_14 = arith.constant 0 : index
    %c0_15 = arith.constant 0 : index
    %17 = vector.load %arg6[%c0_14, %c0_15] : memref<1x128xf32, #tpu.memory_space<vmem>>, vector<1x128xf32>
    tpu.vector_store %arg6[%c0_14, %c0_15], %16 {strides = array<i32>} : memref<1x128xf32, #tpu.memory_space<vmem>>, vector<1x128xf32>,
    return
  }
  func.func @transform_0(%arg0: i32, %arg1: i32) -> (i32, i32) {
    %c0_i32 = arith.constant 0 : i32
    %c0_i32_0 = arith.constant 0 : i32
    return %arg1, %c0_i32 : i32, i32
  }
  func.func @transform_1(%arg0: i32, %arg1: i32) -> (i32, i32) {
    %c0_i32 = arith.constant 0 : i32
    %c0_i32_0 = arith.constant 0 : i32
    return %c0_i32, %arg0 : i32, i32
  }
  func.func @transform_2(%arg0: i32, %arg1: i32) -> (i32, i32) {
    %c0_i32 = arith.constant 0 : i32
    return %arg1, %arg0 : i32, i32
  }
  func.func @transform_3(%arg0: i32, %arg1: i32) -> (i32, i32) {
    %c0_i32 = arith.constant 0 : i32
    %c0_i32_0 = arith.constant 0 : i32
    return %c0_i32, %arg0 : i32, i32
  }
  func.func @transform_4(%arg0: i32, %arg1: i32) -> (i32, i32) {
    %c0_i32 = arith.constant 0 : i32
    %c0_i32_0 = arith.constant 0 : i32
    return %c0_i32, %arg0 : i32, i32
  }
}

module attributes {stable_mosaic.version = 11 : i64} {
  func.func @_matmul_stats_kernel(%arg0: i32, %arg1: i32, %arg2: memref<32x288xbf16, #tpu.memory_space<vmem>>, %arg3: memref<288x128xbf16, #tpu.memory_space<vmem>>, %arg4: memref<32x128xf32, #tpu.memory_space<vmem>>, %arg5: memref<1x128xf32, #tpu.memory_space<vmem>>, %arg6: memref<1x128xf32, #tpu.memory_space<vmem>>) attributes {dimension_semantics = [#tpu.dimension_semantics<parallel>, #tpu.dimension_semantics<arbitrary>], iteration_bounds = array<i64: 1, 1>, scalar_prefetch = 0 : i64, scratch_operands = 0 : i64, tpu.core_type = #tpu.core_type<tc>, window_params = [{transform_indices = @transform_0, window_bounds = array<i64: 32, 288>}, {transform_indices = @transform_1, window_bounds = array<i64: 288, 128>}, {transform_indices = @transform_2, window_bounds = array<i64: 32, 128>}, {transform_indices = @transform_3, window_bounds = array<i64: 1, 128>}, {transform_indices = @transform_4, window_bounds = array<i64: 1, 128>}]} {
    %c0 = arith.constant 0 : index
    %c0_0 = arith.constant 0 : index
    %0 = vector.load %arg2[%c0, %c0_0] : memref<32x288xbf16, #tpu.memory_space<vmem>>, vector<32x288xbf16>
    %c0_1 = arith.constant 0 : index
    %c0_2 = arith.constant 0 : index
    %1 = vector.load %arg3[%c0_1, %c0_2] : memref<288x128xbf16, #tpu.memory_space<vmem>>, vector<288x128xbf16>
    %cst = arith.constant dense<0.000000e+00> : vector<32x128xf32>
    %2 = tpu.matmul %0, %1, %cst {dimension_numbers = #tpu.dot_dimension_numbers<[1], [0], [0], [1], [0, 0, 1, 1], [], []>} : vector<32x288xbf16>, vector<288x128xbf16>, vector<32x128xf32> -> vector<32x128xf32>
    %c0_3 = arith.constant 0 : index
    %c0_4 = arith.constant 0 : index
    %3 = vector.load %arg4[%c0_3, %c0_4] : memref<32x128xf32, #tpu.memory_space<vmem>>, vector<32x128xf32>
    tpu.vector_store %arg4[%c0_3, %c0_4], %2 {strides = array<i32>} : memref<32x128xf32, #tpu.memory_space<vmem>>, vector<32x128xf32>,
    %c0_i32 = arith.constant 0 : i32
    %4 = arith.cmpi eq, %arg1, %c0_i32 : i32
    %5 = arith.extui %4 : i1 to i32
    %c0_i32_5 = arith.constant 0 : i32
    %6 = arith.cmpi ne, %5, %c0_i32_5 : i32
    scf.if %6 {
      %cst_16 = arith.constant 0.000000e+00 : f32
      %18 = vector.broadcast %cst_16 : f32 to vector<1x128xf32>
      %c0_17 = arith.constant 0 : index
      %c0_18 = arith.constant 0 : index
      %19 = vector.load %arg5[%c0_17, %c0_18] : memref<1x128xf32, #tpu.memory_space<vmem>>, vector<1x128xf32>
      tpu.vector_store %arg5[%c0_17, %c0_18], %18 {strides = array<i32>} : memref<1x128xf32, #tpu.memory_space<vmem>>, vector<1x128xf32>,
      %cst_19 = arith.constant 0.000000e+00 : f32
      %20 = vector.broadcast %cst_19 : f32 to vector<1x128xf32>
      %c0_20 = arith.constant 0 : index
      %c0_21 = arith.constant 0 : index
      %21 = vector.load %arg6[%c0_20, %c0_21] : memref<1x128xf32, #tpu.memory_space<vmem>>, vector<1x128xf32>
      tpu.vector_store %arg6[%c0_20, %c0_21], %20 {strides = array<i32>} : memref<1x128xf32, #tpu.memory_space<vmem>>, vector<1x128xf32>,
    } else {
    }
    %c0_6 = arith.constant 0 : index
    %c0_7 = arith.constant 0 : index
    %7 = vector.load %arg5[%c0_6, %c0_7] : memref<1x128xf32, #tpu.memory_space<vmem>>, vector<1x128xf32>
    %cst_8 = arith.constant dense<0.000000e+00> : vector<128xf32>
    %8 = vector.multi_reduction <add>, %2, %cst_8 [0] : vector<32x128xf32> to vector<128xf32>
    %9 = vector.shape_cast %8 : vector<128xf32> to vector<1x128xf32>
    %10 = arith.addf %7, %9 : vector<1x128xf32>
    %c0_9 = arith.constant 0 : index
    %c0_10 = arith.constant 0 : index
    %11 = vector.load %arg5[%c0_9, %c0_10] : memref<1x128xf32, #tpu.memory_space<vmem>>, vector<1x128xf32>
    tpu.vector_store %arg5[%c0_9, %c0_10], %10 {strides = array<i32>} : memref<1x128xf32, #tpu.memory_space<vmem>>, vector<1x128xf32>,
    %c0_11 = arith.constant 0 : index
    %c0_12 = arith.constant 0 : index
    %12 = vector.load %arg6[%c0_11, %c0_12] : memref<1x128xf32, #tpu.memory_space<vmem>>, vector<1x128xf32>
    %13 = arith.mulf %2, %2 : vector<32x128xf32>
    %cst_13 = arith.constant dense<0.000000e+00> : vector<128xf32>
    %14 = vector.multi_reduction <add>, %13, %cst_13 [0] : vector<32x128xf32> to vector<128xf32>
    %15 = vector.shape_cast %14 : vector<128xf32> to vector<1x128xf32>
    %16 = arith.addf %12, %15 : vector<1x128xf32>
    %c0_14 = arith.constant 0 : index
    %c0_15 = arith.constant 0 : index
    %17 = vector.load %arg6[%c0_14, %c0_15] : memref<1x128xf32, #tpu.memory_space<vmem>>, vector<1x128xf32>
    tpu.vector_store %arg6[%c0_14, %c0_15], %16 {strides = array<i32>} : memref<1x128xf32, #tpu.memory_space<vmem>>, vector<1x128xf32>,
    return
  }
  func.func @transform_0(%arg0: i32, %arg1: i32) -> (i32, i32) {
    %c0_i32 = arith.constant 0 : i32
    %c0_i32_0 = arith.constant 0 : i32
    return %arg1, %c0_i32 : i32, i32
  }
  func.func @transform_1(%arg0: i32, %arg1: i32) -> (i32, i32) {
    %c0_i32 = arith.constant 0 : i32
    %c0_i32_0 = arith.constant 0 : i32
    return %c0_i32, %arg0 : i32, i32
  }
  func.func @transform_2(%arg0: i32, %arg1: i32) -> (i32, i32) {
    %c0_i32 = arith.constant 0 : i32
    return %arg1, %arg0 : i32, i32
  }
  func.func @transform_3(%arg0: i32, %arg1: i32) -> (i32, i32) {
    %c0_i32 = arith.constant 0 : i32
    %c0_i32_0 = arith.constant 0 : i32
    return %c0_i32, %arg0 : i32, i32
  }
  func.func @transform_4(%arg0: i32, %arg1: i32) -> (i32, i32) {
    %c0_i32 = arith.constant 0 : i32
    %c0_i32_0 = arith.constant 0 : i32
    return %c0_i32, %arg0 : i32, i32
  }
}

module attributes {stable_mosaic.version = 11 : i64} {
  func.func @_scale_shift_relu_kernel(%arg0: i32, %arg1: i32, %arg2: memref<32x128xf32, #tpu.memory_space<vmem>>, %arg3: memref<1x128xf32, #tpu.memory_space<vmem>>, %arg4: memref<1x128xf32, #tpu.memory_space<vmem>>, %arg5: memref<32x128xf32, #tpu.memory_space<vmem>>) attributes {dimension_semantics = [#tpu.dimension_semantics<parallel>, #tpu.dimension_semantics<parallel>], iteration_bounds = array<i64: 1, 1>, scalar_prefetch = 0 : i64, scratch_operands = 0 : i64, tpu.core_type = #tpu.core_type<tc>, window_params = [{transform_indices = @transform_0, window_bounds = array<i64: 32, 128>}, {transform_indices = @transform_1, window_bounds = array<i64: 1, 128>}, {transform_indices = @transform_2, window_bounds = array<i64: 1, 128>}, {transform_indices = @transform_3, window_bounds = array<i64: 32, 128>}]} {
    %c0 = arith.constant 0 : index
    %c0_0 = arith.constant 0 : index
    %0 = vector.load %arg2[%c0, %c0_0] : memref<32x128xf32, #tpu.memory_space<vmem>>, vector<32x128xf32>
    %c0_1 = arith.constant 0 : index
    %c0_2 = arith.constant 0 : index
    %1 = vector.load %arg3[%c0_1, %c0_2] : memref<1x128xf32, #tpu.memory_space<vmem>>, vector<1x128xf32>
    %2 = vector.broadcast %1 : vector<1x128xf32> to vector<32x128xf32>
    %3 = arith.mulf %0, %2 : vector<32x128xf32>
    %c0_3 = arith.constant 0 : index
    %c0_4 = arith.constant 0 : index
    %4 = vector.load %arg4[%c0_3, %c0_4] : memref<1x128xf32, #tpu.memory_space<vmem>>, vector<1x128xf32>
    %5 = vector.broadcast %4 : vector<1x128xf32> to vector<32x128xf32>
    %6 = arith.addf %3, %5 : vector<32x128xf32>
    %cst = arith.constant 0.000000e+00 : f32
    %7 = vector.broadcast %cst : f32 to vector<32x128xf32>
    %8 = arith.maximumf %6, %7 : vector<32x128xf32>
    %c0_5 = arith.constant 0 : index
    %c0_6 = arith.constant 0 : index
    %9 = vector.load %arg5[%c0_5, %c0_6] : memref<32x128xf32, #tpu.memory_space<vmem>>, vector<32x128xf32>
    tpu.vector_store %arg5[%c0_5, %c0_6], %8 {strides = array<i32>} : memref<32x128xf32, #tpu.memory_space<vmem>>, vector<32x128xf32>,
    return
  }
  func.func @transform_0(%arg0: i32, %arg1: i32) -> (i32, i32) {
    %c0_i32 = arith.constant 0 : i32
    return %arg1, %arg0 : i32, i32
  }
  func.func @transform_1(%arg0: i32, %arg1: i32) -> (i32, i32) {
    %c0_i32 = arith.constant 0 : i32
    %c0_i32_0 = arith.constant 0 : i32
    return %c0_i32, %arg0 : i32, i32
  }
  func.func @transform_2(%arg0: i32, %arg1: i32) -> (i32, i32) {
    %c0_i32 = arith.constant 0 : i32
    %c0_i32_0 = arith.constant 0 : i32
    return %c0_i32, %arg0 : i32, i32
  }
  func.func @transform_3(%arg0: i32, %arg1: i32) -> (i32, i32) {
    %c0_i32 = arith.constant 0 : i32
    return %arg1, %arg0 : i32, i32
  }
}

module attributes {stable_mosaic.version = 11 : i64} {
  func.func @_matmul_stats_kernel(%arg0: i32, %arg1: i32, %arg2: memref<8x576xbf16, #tpu.memory_space<vmem>>, %arg3: memref<576x128xbf16, #tpu.memory_space<vmem>>, %arg4: memref<8x128xf32, #tpu.memory_space<vmem>>, %arg5: memref<1x128xf32, #tpu.memory_space<vmem>>, %arg6: memref<1x128xf32, #tpu.memory_space<vmem>>) attributes {dimension_semantics = [#tpu.dimension_semantics<parallel>, #tpu.dimension_semantics<arbitrary>], iteration_bounds = array<i64: 1, 1>, scalar_prefetch = 0 : i64, scratch_operands = 0 : i64, tpu.core_type = #tpu.core_type<tc>, window_params = [{transform_indices = @transform_0, window_bounds = array<i64: 8, 576>}, {transform_indices = @transform_1, window_bounds = array<i64: 576, 128>}, {transform_indices = @transform_2, window_bounds = array<i64: 8, 128>}, {transform_indices = @transform_3, window_bounds = array<i64: 1, 128>}, {transform_indices = @transform_4, window_bounds = array<i64: 1, 128>}]} {
    %c0 = arith.constant 0 : index
    %c0_0 = arith.constant 0 : index
    %0 = vector.load %arg2[%c0, %c0_0] : memref<8x576xbf16, #tpu.memory_space<vmem>>, vector<8x576xbf16>
    %c0_1 = arith.constant 0 : index
    %c0_2 = arith.constant 0 : index
    %1 = vector.load %arg3[%c0_1, %c0_2] : memref<576x128xbf16, #tpu.memory_space<vmem>>, vector<576x128xbf16>
    %cst = arith.constant dense<0.000000e+00> : vector<8x128xf32>
    %2 = tpu.matmul %0, %1, %cst {dimension_numbers = #tpu.dot_dimension_numbers<[1], [0], [0], [1], [0, 0, 1, 1], [], []>} : vector<8x576xbf16>, vector<576x128xbf16>, vector<8x128xf32> -> vector<8x128xf32>
    %c0_3 = arith.constant 0 : index
    %c0_4 = arith.constant 0 : index
    %3 = vector.load %arg4[%c0_3, %c0_4] : memref<8x128xf32, #tpu.memory_space<vmem>>, vector<8x128xf32>
    tpu.vector_store %arg4[%c0_3, %c0_4], %2 {strides = array<i32>} : memref<8x128xf32, #tpu.memory_space<vmem>>, vector<8x128xf32>,
    %c0_i32 = arith.constant 0 : i32
    %4 = arith.cmpi eq, %arg1, %c0_i32 : i32
    %5 = arith.extui %4 : i1 to i32
    %c0_i32_5 = arith.constant 0 : i32
    %6 = arith.cmpi ne, %5, %c0_i32_5 : i32
    scf.if %6 {
      %cst_16 = arith.constant 0.000000e+00 : f32
      %18 = vector.broadcast %cst_16 : f32 to vector<1x128xf32>
      %c0_17 = arith.constant 0 : index
      %c0_18 = arith.constant 0 : index
      %19 = vector.load %arg5[%c0_17, %c0_18] : memref<1x128xf32, #tpu.memory_space<vmem>>, vector<1x128xf32>
      tpu.vector_store %arg5[%c0_17, %c0_18], %18 {strides = array<i32>} : memref<1x128xf32, #tpu.memory_space<vmem>>, vector<1x128xf32>,
      %cst_19 = arith.constant 0.000000e+00 : f32
      %20 = vector.broadcast %cst_19 : f32 to vector<1x128xf32>
      %c0_20 = arith.constant 0 : index
      %c0_21 = arith.constant 0 : index
      %21 = vector.load %arg6[%c0_20, %c0_21] : memref<1x128xf32, #tpu.memory_space<vmem>>, vector<1x128xf32>
      tpu.vector_store %arg6[%c0_20, %c0_21], %20 {strides = array<i32>} : memref<1x128xf32, #tpu.memory_space<vmem>>, vector<1x128xf32>,
    } else {
    }
    %c0_6 = arith.constant 0 : index
    %c0_7 = arith.constant 0 : index
    %7 = vector.load %arg5[%c0_6, %c0_7] : memref<1x128xf32, #tpu.memory_space<vmem>>, vector<1x128xf32>
    %cst_8 = arith.constant dense<0.000000e+00> : vector<128xf32>
    %8 = vector.multi_reduction <add>, %2, %cst_8 [0] : vector<8x128xf32> to vector<128xf32>
    %9 = vector.shape_cast %8 : vector<128xf32> to vector<1x128xf32>
    %10 = arith.addf %7, %9 : vector<1x128xf32>
    %c0_9 = arith.constant 0 : index
    %c0_10 = arith.constant 0 : index
    %11 = vector.load %arg5[%c0_9, %c0_10] : memref<1x128xf32, #tpu.memory_space<vmem>>, vector<1x128xf32>
    tpu.vector_store %arg5[%c0_9, %c0_10], %10 {strides = array<i32>} : memref<1x128xf32, #tpu.memory_space<vmem>>, vector<1x128xf32>,
    %c0_11 = arith.constant 0 : index
    %c0_12 = arith.constant 0 : index
    %12 = vector.load %arg6[%c0_11, %c0_12] : memref<1x128xf32, #tpu.memory_space<vmem>>, vector<1x128xf32>
    %13 = arith.mulf %2, %2 : vector<8x128xf32>
    %cst_13 = arith.constant dense<0.000000e+00> : vector<128xf32>
    %14 = vector.multi_reduction <add>, %13, %cst_13 [0] : vector<8x128xf32> to vector<128xf32>
    %15 = vector.shape_cast %14 : vector<128xf32> to vector<1x128xf32>
    %16 = arith.addf %12, %15 : vector<1x128xf32>
    %c0_14 = arith.constant 0 : index
    %c0_15 = arith.constant 0 : index
    %17 = vector.load %arg6[%c0_14, %c0_15] : memref<1x128xf32, #tpu.memory_space<vmem>>, vector<1x128xf32>
    tpu.vector_store %arg6[%c0_14, %c0_15], %16 {strides = array<i32>} : memref<1x128xf32, #tpu.memory_space<vmem>>, vector<1x128xf32>,
    return
  }
  func.func @transform_0(%arg0: i32, %arg1: i32) -> (i32, i32) {
    %c0_i32 = arith.constant 0 : i32
    %c0_i32_0 = arith.constant 0 : i32
    return %arg1, %c0_i32 : i32, i32
  }
  func.func @transform_1(%arg0: i32, %arg1: i32) -> (i32, i32) {
    %c0_i32 = arith.constant 0 : i32
    %c0_i32_0 = arith.constant 0 : i32
    return %c0_i32, %arg0 : i32, i32
  }
  func.func @transform_2(%arg0: i32, %arg1: i32) -> (i32, i32) {
    %c0_i32 = arith.constant 0 : i32
    return %arg1, %arg0 : i32, i32
  }
  func.func @transform_3(%arg0: i32, %arg1: i32) -> (i32, i32) {
    %c0_i32 = arith.constant 0 : i32
    %c0_i32_0 = arith.constant 0 : i32
    return %c0_i32, %arg0 : i32, i32
  }
  func.func @transform_4(%arg0: i32, %arg1: i32) -> (i32, i32) {
    %c0_i32 = arith.constant 0 : i32
    %c0_i32_0 = arith.constant 0 : i32
    return %c0_i32, %arg0 : i32, i32
  }
}

module attributes {stable_mosaic.version = 11 : i64} {
  func.func @_scale_shift_relu_kernel(%arg0: i32, %arg1: i32, %arg2: memref<8x128xf32, #tpu.memory_space<vmem>>, %arg3: memref<1x128xf32, #tpu.memory_space<vmem>>, %arg4: memref<1x128xf32, #tpu.memory_space<vmem>>, %arg5: memref<8x128xf32, #tpu.memory_space<vmem>>) attributes {dimension_semantics = [#tpu.dimension_semantics<parallel>, #tpu.dimension_semantics<parallel>], iteration_bounds = array<i64: 1, 1>, scalar_prefetch = 0 : i64, scratch_operands = 0 : i64, tpu.core_type = #tpu.core_type<tc>, window_params = [{transform_indices = @transform_0, window_bounds = array<i64: 8, 128>}, {transform_indices = @transform_1, window_bounds = array<i64: 1, 128>}, {transform_indices = @transform_2, window_bounds = array<i64: 1, 128>}, {transform_indices = @transform_3, window_bounds = array<i64: 8, 128>}]} {
    %c0 = arith.constant 0 : index
    %c0_0 = arith.constant 0 : index
    %0 = vector.load %arg2[%c0, %c0_0] : memref<8x128xf32, #tpu.memory_space<vmem>>, vector<8x128xf32>
    %c0_1 = arith.constant 0 : index
    %c0_2 = arith.constant 0 : index
    %1 = vector.load %arg3[%c0_1, %c0_2] : memref<1x128xf32, #tpu.memory_space<vmem>>, vector<1x128xf32>
    %2 = vector.broadcast %1 : vector<1x128xf32> to vector<8x128xf32>
    %3 = arith.mulf %0, %2 : vector<8x128xf32>
    %c0_3 = arith.constant 0 : index
    %c0_4 = arith.constant 0 : index
    %4 = vector.load %arg4[%c0_3, %c0_4] : memref<1x128xf32, #tpu.memory_space<vmem>>, vector<1x128xf32>
    %5 = vector.broadcast %4 : vector<1x128xf32> to vector<8x128xf32>
    %6 = arith.addf %3, %5 : vector<8x128xf32>
    %cst = arith.constant 0.000000e+00 : f32
    %7 = vector.broadcast %cst : f32 to vector<8x128xf32>
    %8 = arith.maximumf %6, %7 : vector<8x128xf32>
    %c0_5 = arith.constant 0 : index
    %c0_6 = arith.constant 0 : index
    %9 = vector.load %arg5[%c0_5, %c0_6] : memref<8x128xf32, #tpu.memory_space<vmem>>, vector<8x128xf32>
    tpu.vector_store %arg5[%c0_5, %c0_6], %8 {strides = array<i32>} : memref<8x128xf32, #tpu.memory_space<vmem>>, vector<8x128xf32>,
    return
  }
  func.func @transform_0(%arg0: i32, %arg1: i32) -> (i32, i32) {
    %c0_i32 = arith.constant 0 : i32
    return %arg1, %arg0 : i32, i32
  }
  func.func @transform_1(%arg0: i32, %arg1: i32) -> (i32, i32) {
    %c0_i32 = arith.constant 0 : i32
    %c0_i32_0 = arith.constant 0 : i32
    return %c0_i32, %arg0 : i32, i32
  }
  func.func @transform_2(%arg0: i32, %arg1: i32) -> (i32, i32) {
    %c0_i32 = arith.constant 0 : i32
    %c0_i32_0 = arith.constant 0 : i32
    return %c0_i32, %arg0 : i32, i32
  }
  func.func @transform_3(%arg0: i32, %arg1: i32) -> (i32, i32) {
    %c0_i32 = arith.constant 0 : i32
    return %arg1, %arg0 : i32, i32
  }
}

module attributes {stable_mosaic.version = 11 : i64} {
  func.func @_matmul_stats_kernel(%arg0: i32, %arg1: i32, %arg2: memref<8x1152xbf16, #tpu.memory_space<vmem>>, %arg3: memref<1152x128xbf16, #tpu.memory_space<vmem>>, %arg4: memref<8x128xf32, #tpu.memory_space<vmem>>, %arg5: memref<1x128xf32, #tpu.memory_space<vmem>>, %arg6: memref<1x128xf32, #tpu.memory_space<vmem>>) attributes {dimension_semantics = [#tpu.dimension_semantics<parallel>, #tpu.dimension_semantics<arbitrary>], iteration_bounds = array<i64: 2, 1>, scalar_prefetch = 0 : i64, scratch_operands = 0 : i64, tpu.core_type = #tpu.core_type<tc>, window_params = [{transform_indices = @transform_0, window_bounds = array<i64: 8, 1152>}, {transform_indices = @transform_1, window_bounds = array<i64: 1152, 128>}, {transform_indices = @transform_2, window_bounds = array<i64: 8, 128>}, {transform_indices = @transform_3, window_bounds = array<i64: 1, 128>}, {transform_indices = @transform_4, window_bounds = array<i64: 1, 128>}]} {
    %c0 = arith.constant 0 : index
    %c0_0 = arith.constant 0 : index
    %0 = vector.load %arg2[%c0, %c0_0] : memref<8x1152xbf16, #tpu.memory_space<vmem>>, vector<8x1152xbf16>
    %c0_1 = arith.constant 0 : index
    %c0_2 = arith.constant 0 : index
    %1 = vector.load %arg3[%c0_1, %c0_2] : memref<1152x128xbf16, #tpu.memory_space<vmem>>, vector<1152x128xbf16>
    %cst = arith.constant dense<0.000000e+00> : vector<8x128xf32>
    %2 = tpu.matmul %0, %1, %cst {dimension_numbers = #tpu.dot_dimension_numbers<[1], [0], [0], [1], [0, 0, 1, 1], [], []>} : vector<8x1152xbf16>, vector<1152x128xbf16>, vector<8x128xf32> -> vector<8x128xf32>
    %c0_3 = arith.constant 0 : index
    %c0_4 = arith.constant 0 : index
    %3 = vector.load %arg4[%c0_3, %c0_4] : memref<8x128xf32, #tpu.memory_space<vmem>>, vector<8x128xf32>
    tpu.vector_store %arg4[%c0_3, %c0_4], %2 {strides = array<i32>} : memref<8x128xf32, #tpu.memory_space<vmem>>, vector<8x128xf32>,
    %c0_i32 = arith.constant 0 : i32
    %4 = arith.cmpi eq, %arg1, %c0_i32 : i32
    %5 = arith.extui %4 : i1 to i32
    %c0_i32_5 = arith.constant 0 : i32
    %6 = arith.cmpi ne, %5, %c0_i32_5 : i32
    scf.if %6 {
      %cst_16 = arith.constant 0.000000e+00 : f32
      %18 = vector.broadcast %cst_16 : f32 to vector<1x128xf32>
      %c0_17 = arith.constant 0 : index
      %c0_18 = arith.constant 0 : index
      %19 = vector.load %arg5[%c0_17, %c0_18] : memref<1x128xf32, #tpu.memory_space<vmem>>, vector<1x128xf32>
      tpu.vector_store %arg5[%c0_17, %c0_18], %18 {strides = array<i32>} : memref<1x128xf32, #tpu.memory_space<vmem>>, vector<1x128xf32>,
      %cst_19 = arith.constant 0.000000e+00 : f32
      %20 = vector.broadcast %cst_19 : f32 to vector<1x128xf32>
      %c0_20 = arith.constant 0 : index
      %c0_21 = arith.constant 0 : index
      %21 = vector.load %arg6[%c0_20, %c0_21] : memref<1x128xf32, #tpu.memory_space<vmem>>, vector<1x128xf32>
      tpu.vector_store %arg6[%c0_20, %c0_21], %20 {strides = array<i32>} : memref<1x128xf32, #tpu.memory_space<vmem>>, vector<1x128xf32>,
    } else {
    }
    %c0_6 = arith.constant 0 : index
    %c0_7 = arith.constant 0 : index
    %7 = vector.load %arg5[%c0_6, %c0_7] : memref<1x128xf32, #tpu.memory_space<vmem>>, vector<1x128xf32>
    %cst_8 = arith.constant dense<0.000000e+00> : vector<128xf32>
    %8 = vector.multi_reduction <add>, %2, %cst_8 [0] : vector<8x128xf32> to vector<128xf32>
    %9 = vector.shape_cast %8 : vector<128xf32> to vector<1x128xf32>
    %10 = arith.addf %7, %9 : vector<1x128xf32>
    %c0_9 = arith.constant 0 : index
    %c0_10 = arith.constant 0 : index
    %11 = vector.load %arg5[%c0_9, %c0_10] : memref<1x128xf32, #tpu.memory_space<vmem>>, vector<1x128xf32>
    tpu.vector_store %arg5[%c0_9, %c0_10], %10 {strides = array<i32>} : memref<1x128xf32, #tpu.memory_space<vmem>>, vector<1x128xf32>,
    %c0_11 = arith.constant 0 : index
    %c0_12 = arith.constant 0 : index
    %12 = vector.load %arg6[%c0_11, %c0_12] : memref<1x128xf32, #tpu.memory_space<vmem>>, vector<1x128xf32>
    %13 = arith.mulf %2, %2 : vector<8x128xf32>
    %cst_13 = arith.constant dense<0.000000e+00> : vector<128xf32>
    %14 = vector.multi_reduction <add>, %13, %cst_13 [0] : vector<8x128xf32> to vector<128xf32>
    %15 = vector.shape_cast %14 : vector<128xf32> to vector<1x128xf32>
    %16 = arith.addf %12, %15 : vector<1x128xf32>
    %c0_14 = arith.constant 0 : index
    %c0_15 = arith.constant 0 : index
    %17 = vector.load %arg6[%c0_14, %c0_15] : memref<1x128xf32, #tpu.memory_space<vmem>>, vector<1x128xf32>
    tpu.vector_store %arg6[%c0_14, %c0_15], %16 {strides = array<i32>} : memref<1x128xf32, #tpu.memory_space<vmem>>, vector<1x128xf32>,
    return
  }
  func.func @transform_0(%arg0: i32, %arg1: i32) -> (i32, i32) {
    %c0_i32 = arith.constant 0 : i32
    %c0_i32_0 = arith.constant 0 : i32
    return %arg1, %c0_i32 : i32, i32
  }
  func.func @transform_1(%arg0: i32, %arg1: i32) -> (i32, i32) {
    %c0_i32 = arith.constant 0 : i32
    %c0_i32_0 = arith.constant 0 : i32
    return %c0_i32, %arg0 : i32, i32
  }
  func.func @transform_2(%arg0: i32, %arg1: i32) -> (i32, i32) {
    %c0_i32 = arith.constant 0 : i32
    return %arg1, %arg0 : i32, i32
  }
  func.func @transform_3(%arg0: i32, %arg1: i32) -> (i32, i32) {
    %c0_i32 = arith.constant 0 : i32
    %c0_i32_0 = arith.constant 0 : i32
    return %c0_i32, %arg0 : i32, i32
  }
  func.func @transform_4(%arg0: i32, %arg1: i32) -> (i32, i32) {
    %c0_i32 = arith.constant 0 : i32
    %c0_i32_0 = arith.constant 0 : i32
    return %c0_i32, %arg0 : i32, i32
  }
}

module attributes {stable_mosaic.version = 11 : i64} {
  func.func @_scale_shift_relu_kernel(%arg0: i32, %arg1: i32, %arg2: memref<8x128xf32, #tpu.memory_space<vmem>>, %arg3: memref<1x128xf32, #tpu.memory_space<vmem>>, %arg4: memref<1x128xf32, #tpu.memory_space<vmem>>, %arg5: memref<8x128xf32, #tpu.memory_space<vmem>>) attributes {dimension_semantics = [#tpu.dimension_semantics<parallel>, #tpu.dimension_semantics<parallel>], iteration_bounds = array<i64: 2, 1>, scalar_prefetch = 0 : i64, scratch_operands = 0 : i64, tpu.core_type = #tpu.core_type<tc>, window_params = [{transform_indices = @transform_0, window_bounds = array<i64: 8, 128>}, {transform_indices = @transform_1, window_bounds = array<i64: 1, 128>}, {transform_indices = @transform_2, window_bounds = array<i64: 1, 128>}, {transform_indices = @transform_3, window_bounds = array<i64: 8, 128>}]} {
    %c0 = arith.constant 0 : index
    %c0_0 = arith.constant 0 : index
    %0 = vector.load %arg2[%c0, %c0_0] : memref<8x128xf32, #tpu.memory_space<vmem>>, vector<8x128xf32>
    %c0_1 = arith.constant 0 : index
    %c0_2 = arith.constant 0 : index
    %1 = vector.load %arg3[%c0_1, %c0_2] : memref<1x128xf32, #tpu.memory_space<vmem>>, vector<1x128xf32>
    %2 = vector.broadcast %1 : vector<1x128xf32> to vector<8x128xf32>
    %3 = arith.mulf %0, %2 : vector<8x128xf32>
    %c0_3 = arith.constant 0 : index
    %c0_4 = arith.constant 0 : index
    %4 = vector.load %arg4[%c0_3, %c0_4] : memref<1x128xf32, #tpu.memory_space<vmem>>, vector<1x128xf32>
    %5 = vector.broadcast %4 : vector<1x128xf32> to vector<8x128xf32>
    %6 = arith.addf %3, %5 : vector<8x128xf32>
    %cst = arith.constant 0.000000e+00 : f32
    %7 = vector.broadcast %cst : f32 to vector<8x128xf32>
    %8 = arith.maximumf %6, %7 : vector<8x128xf32>
    %c0_5 = arith.constant 0 : index
    %c0_6 = arith.constant 0 : index
    %9 = vector.load %arg5[%c0_5, %c0_6] : memref<8x128xf32, #tpu.memory_space<vmem>>, vector<8x128xf32>
    tpu.vector_store %arg5[%c0_5, %c0_6], %8 {strides = array<i32>} : memref<8x128xf32, #tpu.memory_space<vmem>>, vector<8x128xf32>,
    return
  }
  func.func @transform_0(%arg0: i32, %arg1: i32) -> (i32, i32) {
    %c0_i32 = arith.constant 0 : i32
    return %arg1, %arg0 : i32, i32
  }
  func.func @transform_1(%arg0: i32, %arg1: i32) -> (i32, i32) {
    %c0_i32 = arith.constant 0 : i32
    %c0_i32_0 = arith.constant 0 : i32
    return %c0_i32, %arg0 : i32, i32
  }
  func.func @transform_2(%arg0: i32, %arg1: i32) -> (i32, i32) {
    %c0_i32 = arith.constant 0 : i32
    %c0_i32_0 = arith.constant 0 : i32
    return %c0_i32, %arg0 : i32, i32
  }
  func.func @transform_3(%arg0: i32, %arg1: i32) -> (i32, i32) {
    %c0_i32 = arith.constant 0 : i32
    return %arg1, %arg0 : i32, i32
  }
}

module attributes {stable_mosaic.version = 11 : i64} {
  func.func @_head_kernel(%arg0: i32, %arg1: memref<8x256xf32, #tpu.memory_space<vmem>>, %arg2: memref<256x128xf32, #tpu.memory_space<vmem>>, %arg3: memref<1x128xf32, #tpu.memory_space<vmem>>, %arg4: memref<128x128xf32, #tpu.memory_space<vmem>>, %arg5: memref<1x128xf32, #tpu.memory_space<vmem>>, %arg6: memref<8x128xf32, #tpu.memory_space<vmem>>, %arg7: memref<8x128xf32, #tpu.memory_space<vmem>>) attributes {dimension_semantics = [#tpu.dimension_semantics<arbitrary>], iteration_bounds = array<i64: 1>, scalar_prefetch = 0 : i64, scratch_operands = 0 : i64, tpu.core_type = #tpu.core_type<tc>, window_params = [{pipeline_mode = #tpu.pipeline_mode<synchronous>, transform_indices = @transform_0, window_bounds = array<i64: 8, 256>}, {pipeline_mode = #tpu.pipeline_mode<synchronous>, transform_indices = @transform_1, window_bounds = array<i64: 256, 128>}, {pipeline_mode = #tpu.pipeline_mode<synchronous>, transform_indices = @transform_2, window_bounds = array<i64: 1, 128>}, {pipeline_mode = #tpu.pipeline_mode<synchronous>, transform_indices = @transform_3, window_bounds = array<i64: 128, 128>}, {pipeline_mode = #tpu.pipeline_mode<synchronous>, transform_indices = @transform_4, window_bounds = array<i64: 1, 128>}, {pipeline_mode = #tpu.pipeline_mode<synchronous>, transform_indices = @transform_5, window_bounds = array<i64: 8, 128>}, {pipeline_mode = #tpu.pipeline_mode<synchronous>, transform_indices = @transform_6, window_bounds = array<i64: 8, 128>}]} {
    %c0 = arith.constant 0 : index
    %c0_0 = arith.constant 0 : index
    %0 = vector.load %arg1[%c0, %c0_0] : memref<8x256xf32, #tpu.memory_space<vmem>>, vector<8x256xf32>
    %c0_1 = arith.constant 0 : index
    %c0_2 = arith.constant 0 : index
    %1 = vector.load %arg2[%c0_1, %c0_2] : memref<256x128xf32, #tpu.memory_space<vmem>>, vector<256x128xf32>
    %cst = arith.constant dense<0.000000e+00> : vector<8x128xf32>
    %2 = tpu.matmul %0, %1, %cst {dimension_numbers = #tpu.dot_dimension_numbers<[1], [0], [0], [1], [0, 0, 1, 1], [], []>} : vector<8x256xf32>, vector<256x128xf32>, vector<8x128xf32> -> vector<8x128xf32>
    %c0_3 = arith.constant 0 : index
    %c0_4 = arith.constant 0 : index
    %3 = vector.load %arg3[%c0_3, %c0_4] : memref<1x128xf32, #tpu.memory_space<vmem>>, vector<1x128xf32>
    %4 = vector.broadcast %3 : vector<1x128xf32> to vector<8x128xf32>
    %5 = arith.addf %2, %4 : vector<8x128xf32>
    %c0_5 = arith.constant 0 : index
    %c0_6 = arith.constant 0 : index
    %6 = vector.load %arg6[%c0_5, %c0_6] : memref<8x128xf32, #tpu.memory_space<vmem>>, vector<8x128xf32>
    tpu.vector_store %arg6[%c0_5, %c0_6], %5 {strides = array<i32>} : memref<8x128xf32, #tpu.memory_space<vmem>>, vector<8x128xf32>,
    %c0_7 = arith.constant 0 : index
    %c0_8 = arith.constant 0 : index
    %7 = vector.load %arg4[%c0_7, %c0_8] : memref<128x128xf32, #tpu.memory_space<vmem>>, vector<128x128xf32>
    %cst_9 = arith.constant dense<0.000000e+00> : vector<8x128xf32>
    %8 = tpu.matmul %5, %7, %cst_9 {dimension_numbers = #tpu.dot_dimension_numbers<[1], [0], [0], [1], [0, 0, 1, 1], [], []>} : vector<8x128xf32>, vector<128x128xf32>, vector<8x128xf32> -> vector<8x128xf32>
    %c0_10 = arith.constant 0 : index
    %c0_11 = arith.constant 0 : index
    %9 = vector.load %arg5[%c0_10, %c0_11] : memref<1x128xf32, #tpu.memory_space<vmem>>, vector<1x128xf32>
    %10 = vector.broadcast %9 : vector<1x128xf32> to vector<8x128xf32>
    %11 = arith.addf %8, %10 : vector<8x128xf32>
    %c0_12 = arith.constant 0 : index
    %c0_13 = arith.constant 0 : index
    %12 = vector.load %arg7[%c0_12, %c0_13] : memref<8x128xf32, #tpu.memory_space<vmem>>, vector<8x128xf32>
    tpu.vector_store %arg7[%c0_12, %c0_13], %11 {strides = array<i32>} : memref<8x128xf32, #tpu.memory_space<vmem>>, vector<8x128xf32>,
    return
  }
  func.func @transform_0(%arg0: i32) -> (i32, i32) {
    %c0_i32 = arith.constant 0 : i32
    %c0_i32_0 = arith.constant 0 : i32
    %c0_i32_1 = arith.constant 0 : i32
    return %c0_i32, %c0_i32_0 : i32, i32
  }
  func.func @transform_1(%arg0: i32) -> (i32, i32) {
    %c0_i32 = arith.constant 0 : i32
    %c0_i32_0 = arith.constant 0 : i32
    %c0_i32_1 = arith.constant 0 : i32
    return %c0_i32, %c0_i32_0 : i32, i32
  }
  func.func @transform_2(%arg0: i32) -> (i32, i32) {
    %c0_i32 = arith.constant 0 : i32
    %c0_i32_0 = arith.constant 0 : i32
    %c0_i32_1 = arith.constant 0 : i32
    return %c0_i32, %c0_i32_0 : i32, i32
  }
  func.func @transform_3(%arg0: i32) -> (i32, i32) {
    %c0_i32 = arith.constant 0 : i32
    %c0_i32_0 = arith.constant 0 : i32
    %c0_i32_1 = arith.constant 0 : i32
    return %c0_i32, %c0_i32_0 : i32, i32
  }
  func.func @transform_4(%arg0: i32) -> (i32, i32) {
    %c0_i32 = arith.constant 0 : i32
    %c0_i32_0 = arith.constant 0 : i32
    %c0_i32_1 = arith.constant 0 : i32
    return %c0_i32, %c0_i32_0 : i32, i32
  }
  func.func @transform_5(%arg0: i32) -> (i32, i32) {
    %c0_i32 = arith.constant 0 : i32
    %c0_i32_0 = arith.constant 0 : i32
    %c0_i32_1 = arith.constant 0 : i32
    return %c0_i32, %c0_i32_0 : i32, i32
  }
  func.func @transform_6(%arg0: i32) -> (i32, i32) {
    %c0_i32 = arith.constant 0 : i32
    %c0_i32_0 = arith.constant 0 : i32
    %c0_i32_1 = arith.constant 0 : i32
    return %c0_i32, %c0_i32_0 : i32, i32
  }
}

</mosaic_0001>

<bundles_post_ra>
// kernel: image_classify.12
= control target key start
LH: loop header
LB: loop body
LE: loop exit
PB: predicated region body
PF: predicated region fallthrough
CT: control target
= control target key end

     0   :  { %s896_s0 = inlined_call_operand.vmem [shape: f32[512,128], index: 0, kind: input, shape index: {}]   ;;  %s897_s1 = inlined_call_operand.vmem [shape: f32[1,128], index: 1, kind: input, shape index: {}]   ;;  %s898_s2 = inlined_call_operand.vmem [shape: f32[1,128], index: 2, kind: input, shape index: {}]   ;;  %s899_s3 = inlined_call_operand.vmem [shape: f32[512,128], index: 3, kind: output, shape index: {}]  }
   0x1   :  { %v14_v0 = vld [vmem:[%s896_s0] sm:$0xff]  ;;  %v15_v4 = vld [vmem:[%s896_s0 + $0x8] sm:$0xff]  ;;  %v16_v5 = vld [vmem:[%s896_s0 + $0x10] sm:$0xff] }
   0x2   :  { %v380_v1 = vld [vmem:[%s897_s1] ss:$0 sm:$0xff]  ;;  %v17_v6 = vld [vmem:[%s896_s0 + $0x18] sm:$0xff]  ;;  %v19_v11 = vld [vmem:[%s896_s0 + $0x28] sm:$0xff] }
   0x3   :  { %v385_v2 = vld [vmem:[%s898_s2] ss:$0 sm:$0xff]  ;;  %v85_v3 = vmul.f32 %v380_v1, %v14_v0  ;;  %v86_v7 = vmul.f32 %v380_v1, %v15_v4  ;;  %v87_v8 = vmul.f32 %v380_v1, %v16_v5  ;;  %v88_v9 = vmul.f32 %v380_v1, %v17_v6  ;;  %v20_v12 = vld [vmem:[%s896_s0 + $0x30] sm:$0xff]  ;;  %v21_v17 = vld [vmem:[%s896_s0 + $0x38] sm:$0xff] }
   0x4   :  { %v18_v10 = vld [vmem:[%s896_s0 + $0x20] sm:$0xff]  ;;  %v90_v15 = vmul.f32 %v380_v1, %v19_v11  ;;  %v91_v16 = vmul.f32 %v380_v1, %v20_v12  ;;  %v92_v21 = vmul.f32 %v380_v1, %v21_v17  ;;  %v23_v27 = vld [vmem:[%s896_s0 + $0x48] sm:$0xff]  ;;  %v24_v28 = vld [vmem:[%s896_s0 + $0x50] sm:$0xff] }
   0x5   :  { %v156_v13 = vadd.f32 %v385_v2, %v85_v3  ;;  %v89_v14 = vmul.f32 %v380_v1, %v18_v10  ;;  %v157_v18 = vadd.f32 %v385_v2, %v86_v7  ;;  %v158_v19 = vadd.f32 %v385_v2, %v87_v8  ;;  %v22_v22 = vld [vmem:[%s896_s0 + $0x40] sm:$0xff]  ;;  %v25_v29 = vld [vmem:[%s896_s0 + $0x58] sm:$0xff]  ;;  %v27_v35 = vld [vmem:[%s896_s0 + $0x68] sm:$0xff] }
   0x6   :  { %v159_v20 = vadd.f32 %v385_v2, %v88_v9  ;;  %v161_v25 = vadd.f32 %v385_v2, %v90_v15  ;;  %v162_v26 = vadd.f32 %v385_v2, %v91_v16  ;;  %v163_v33 = vadd.f32 %v385_v2, %v92_v21  ;;  %v26_v34 = vld [vmem:[%s896_s0 + $0x60] sm:$0xff]  ;;  %v28_v36 = vld [vmem:[%s896_s0 + $0x70] sm:$0xff]  ;;  %v29_v41 = vld [vmem:[%s896_s0 + $0x78] sm:$0xff] }
   0x7   :  { %v220_v23 = vmax.f32 %v156_v13, 0.0  ;;  %v160_v24 = vadd.f32 %v385_v2, %v89_v14  ;;  %v221_v30 = vmax.f32 %v157_v18, 0.0  ;;  %v222_v31 = vmax.f32 %v158_v19, 0.0  ;;  %v30_v54 = vld [vmem:[%s896_s0 + $0x80] sm:$0xff]  ;;  %v31_v59 = vld [vmem:[%s896_s0 + $0x88] sm:$0xff]  ;;  %v32_v60 = vld [vmem:[%s896_s0 + $0x90] sm:$0xff] }
   0x8   :  { %v223_v32 = vmax.f32 %v159_v20, 0.0  ;;  %v225_v38 = vmax.f32 %v161_v25, 0.0  ;;  %v226_v39 = vmax.f32 %v162_v26, 0.0  ;;  %v93_v40 = vmul.f32 %v380_v1, %v22_v22  ;;  %v33_v61 = vld [vmem:[%s896_s0 + $0x98] sm:$0xff]  ;;  %v34_v4 = vld [vmem:[%s896_s0 + $0xa0] sm:$0xff]  ;;  %v35_v5 = vld [vmem:[%s896_s0 + $0xa8] sm:$0xff] }
   0x9   :  { %284 = vst [vmem:[%s899_s3] sm:$0xff] %v220_v23  ;;  %v224_v37 = vmax.f32 %v160_v24, 0.0  ;;  %285 = vst [vmem:[%s899_s3 + $0x8] sm:$0xff] %v221_v30  ;;  %v227_v42 = vmax.f32 %v163_v33, 0.0  ;;  %v94_v43 = vmul.f32 %v380_v1, %v23_v27  ;;  %v95_v44 = vmul.f32 %v380_v1, %v24_v28  ;;  %v36_v6 = vld [vmem:[%s896_s0 + $0xb0] sm:$0xff]  ;;  %v37_v11 = vld [vmem:[%s896_s0 + $0xb8] sm:$0xff] }
   0xa   :  { %286 = vst [vmem:[%s899_s3 + $0x10] sm:$0xff] %v222_v31  ;;  %287 = vst [vmem:[%s899_s3 + $0x18] sm:$0xff] %v223_v32  ;;  %v96_v45 = vmul.f32 %v380_v1, %v25_v29  ;;  %v164_v46 = vadd.f32 %v385_v2, %v93_v40  ;;  %v97_v47 = vmul.f32 %v380_v1, %v26_v34  ;;  %v38_v24 = vld [vmem:[%s896_s0 + $0xc0] sm:$0xff]  ;;  %v39_v29 = vld [vmem:[%s896_s0 + $0xc8] sm:$0xff] }
   0xb   :  { %288 = vst [vmem:[%s899_s3 + $0x20] sm:$0xff] %v224_v37  ;;  %289 = vst [vmem:[%s899_s3 + $0x28] sm:$0xff] %v225_v38  ;;  %v98_v48 = vmul.f32 %v380_v1, %v27_v35  ;;  %v99_v49 = vmul.f32 %v380_v1, %v28_v36  ;;  %v165_v50 = vadd.f32 %v385_v2, %v94_v43  ;;  %v40_v30 = vld [vmem:[%s896_s0 + $0xd0] sm:$0xff]  ;;  %v41_v31 = vld [vmem:[%s896_s0 + $0xd8] sm:$0xff] }
   0xc   :  { %290 = vst [vmem:[%s899_s3 + $0x30] sm:$0xff] %v226_v39  ;;  %291 = vst [vmem:[%s899_s3 + $0x38] sm:$0xff] %v227_v42  ;;  %v166_v51 = vadd.f32 %v385_v2, %v95_v44  ;;  %v167_v52 = vadd.f32 %v385_v2, %v96_v45  ;;  %v100_v53 = vmul.f32 %v380_v1, %v29_v41  ;;  %v228_v55 = vmax.f32 %v164_v46, 0.0  ;;  %v42_v36 = vld [vmem:[%s896_s0 + $0xe0] sm:$0xff]  ;;  %v43_v37 = vld [vmem:[%s896_s0 + $0xe8] sm:$0xff] }
   0xd   :  { %v168_v56 = vadd.f32 %v385_v2, %v97_v47  ;;  %v169_v57 = vadd.f32 %v385_v2, %v98_v48  ;;  %v170_v58 = vadd.f32 %v385_v2, %v99_v49  ;;  %v229_v62 = vmax.f32 %v165_v50, 0.0  ;;  %v44_v38 = vld [vmem:[%s896_s0 + $0xf0] sm:$0xff]  ;;  %v45_v43 = vld [vmem:[%s896_s0 + $0xf8] sm:$0xff] }
   0xe   :  { %v230_v63 = vmax.f32 %v166_v51, 0.0  ;;  %v231_v0 = vmax.f32 %v167_v52, 0.0  ;;  %v171_v3 = vadd.f32 %v385_v2, %v100_v53  ;;  %292 = vst [vmem:[%s899_s3 + $0x40] sm:$0xff] %v228_v55  ;;  %v101_v10 = vmul.f32 %v380_v1, %v30_v54 }
   0xf   :  { %v232_v7 = vmax.f32 %v168_v56, 0.0  ;;  %v233_v8 = vmax.f32 %v169_v57, 0.0  ;;  %v234_v9 = vmax.f32 %v170_v58, 0.0  ;;  %293 = vst [vmem:[%s899_s3 + $0x48] sm:$0xff] %v229_v62  ;;  %v102_v13 = vmul.f32 %v380_v1, %v31_v59  ;;  %v46_v56 = vld [vmem:[%s896_s0 + $0x100] sm:$0xff]  ;;  %v48_v62 = vld [vmem:[%s896_s0 + $0x110] sm:$0xff] }
  0x10   :  { %294 = vst [vmem:[%s899_s3 + $0x50] sm:$0xff] %v230_v63  ;;  %295 = vst [vmem:[%s899_s3 + $0x58] sm:$0xff] %v231_v0  ;;  %v235_v12 = vmax.f32 %v171_v3, 0.0  ;;  %v103_v14 = vmul.f32 %v380_v1, %v32_v60  ;;  %v104_v15 = vmul.f32 %v380_v1, %v33_v61  ;;  %v172_v16 = vadd.f32 %v385_v2, %v101_v10  ;;  %v47_v61 = vld [vmem:[%s896_s0 + $0x108] sm:$0xff]  ;;  %v49_v63 = vld [vmem:[%s896_s0 + $0x118] sm:$0xff] }
  0x11   :  { %296 = vst [vmem:[%s899_s3 + $0x60] sm:$0xff] %v232_v7  ;;  %297 = vst [vmem:[%s899_s3 + $0x68] sm:$0xff] %v233_v8  ;;  %v105_v17 = vmul.f32 %v380_v1, %v34_v4  ;;  %v106_v18 = vmul.f32 %v380_v1, %v35_v5  ;;  %v107_v19 = vmul.f32 %v380_v1, %v36_v6  ;;  %v50_v6 = vld [vmem:[%s896_s0 + $0x120] sm:$0xff]  ;;  %v51_v7 = vld [vmem:[%s896_s0 + $0x128] sm:$0xff] }
  0x12   :  { %298 = vst [vmem:[%s899_s3 + $0x70] sm:$0xff] %v234_v9  ;;  %299 = vst [vmem:[%s899_s3 + $0x78] sm:$0xff] %v235_v12  ;;  %v173_v20 = vadd.f32 %v385_v2, %v102_v13  ;;  %v174_v21 = vadd.f32 %v385_v2, %v103_v14  ;;  %v175_v22 = vadd.f32 %v385_v2, %v104_v15  ;;  %v236_v25 = vmax.f32 %v172_v16, 0.0  ;;  %v52_v8 = vld [vmem:[%s896_s0 + $0x130] sm:$0xff]  ;;  %v53_v13 = vld [vmem:[%s896_s0 + $0x138] sm:$0xff] }
  0x13   :  { %v108_v23 = vmul.f32 %v380_v1, %v37_v11  ;;  %v176_v26 = vadd.f32 %v385_v2, %v105_v17  ;;  %v177_v27 = vadd.f32 %v385_v2, %v106_v18  ;;  %v178_v28 = vadd.f32 %v385_v2, %v107_v19 }
  0x14   :  { %v237_v32 = vmax.f32 %v173_v20, 0.0  ;;  %v238_v33 = vmax.f32 %v174_v21, 0.0  ;;  %v239_v34 = vmax.f32 %v175_v22, 0.0  ;;  %300 = vst [vmem:[%s899_s3 + $0x80] sm:$0xff] %v236_v25  ;;  %v109_v42 = vmul.f32 %v380_v1, %v38_v24 }
  0x15   :  { %v179_v35 = vadd.f32 %v385_v2, %v108_v23  ;;  %v240_v39 = vmax.f32 %v176_v26, 0.0  ;;  %v241_v40 = vmax.f32 %v177_v27, 0.0  ;;  %v242_v41 = vmax.f32 %v178_v28, 0.0  ;;  %v54_v26 = vld [vmem:[%s896_s0 + $0x140] sm:$0xff] }
  0x16   :  { %301 = vst [vmem:[%s899_s3 + $0x88] sm:$0xff] %v237_v32  ;;  %302 = vst [vmem:[%s899_s3 + $0x90] sm:$0xff] %v238_v33  ;;  %v110_v45 = vmul.f32 %v380_v1, %v39_v29  ;;  %v111_v46 = vmul.f32 %v380_v1, %v40_v30  ;;  %v112_v47 = vmul.f32 %v380_v1, %v41_v31  ;;  %v55_v31 = vld [vmem:[%s896_s0 + $0x148] sm:$0xff]  ;;  %v56_v32 = vld [vmem:[%s896_s0 + $0x150] sm:$0xff] }
  0x17   :  { %303 = vst [vmem:[%s899_s3 + $0x98] sm:$0xff] %v239_v34  ;;  %v243_v44 = vmax.f32 %v179_v35, 0.0  ;;  %304 = vst [vmem:[%s899_s3 + $0xa0] sm:$0xff] %v240_v39  ;;  %v180_v48 = vadd.f32 %v385_v2, %v109_v42  ;;  %v113_v49 = vmul.f32 %v380_v1, %v42_v36  ;;  %v114_v50 = vmul.f32 %v380_v1, %v43_v37  ;;  %v57_v33 = vld [vmem:[%s896_s0 + $0x158] sm:$0xff]  ;;  %v59_v39 = vld [vmem:[%s896_s0 + $0x168] sm:$0xff] }
  0x18   :  { %305 = vst [vmem:[%s899_s3 + $0xa8] sm:$0xff] %v241_v40  ;;  %306 = vst [vmem:[%s899_s3 + $0xb0] sm:$0xff] %v242_v41  ;;  %v115_v51 = vmul.f32 %v380_v1, %v44_v38  ;;  %v181_v52 = vadd.f32 %v385_v2, %v110_v45  ;;  %v182_v53 = vadd.f32 %v385_v2, %v111_v46  ;;  %v58_v38 = vld [vmem:[%s896_s0 + $0x160] sm:$0xff]  ;;  %v60_v40 = vld [vmem:[%s896_s0 + $0x170] sm:$0xff] }
  0x19   :  { %307 = vst [vmem:[%s899_s3 + $0xb8] sm:$0xff] %v243_v44  ;;  %v183_v54 = vadd.f32 %v385_v2, %v112_v47  ;;  %v116_v55 = vmul.f32 %v380_v1, %v45_v43  ;;  %v244_v57 = vmax.f32 %v180_v48, 0.0  ;;  %v184_v58 = vadd.f32 %v385_v2, %v113_v49  ;;  %v61_v45 = vld [vmem:[%s896_s0 + $0x178] sm:$0xff] }
  0x1a   :  { %v185_v59 = vadd.f32 %v385_v2, %v114_v50  ;;  %v186_v60 = vadd.f32 %v385_v2, %v115_v51  ;;  %v245_v0 = vmax.f32 %v181_v52, 0.0  ;;  %v246_v3 = vmax.f32 %v182_v53, 0.0 }
  0x1b   :  { %v247_v4 = vmax.f32 %v183_v54, 0.0  ;;  %v187_v5 = vadd.f32 %v385_v2, %v116_v55  ;;  %308 = vst [vmem:[%s899_s3 + $0xc0] sm:$0xff] %v244_v57  ;;  %v248_v9 = vmax.f32 %v184_v58, 0.0  ;;  %v117_v12 = vmul.f32 %v380_v1, %v46_v56  ;;  %v62_v58 = vld [vmem:[%s896_s0 + $0x180] sm:$0xff] }
  0x1c   :  { %v249_v10 = vmax.f32 %v185_v59, 0.0  ;;  %v250_v11 = vmax.f32 %v186_v60, 0.0  ;;  %309 = vst [vmem:[%s899_s3 + $0xc8] sm:$0xff] %v245_v0  ;;  %310 = vst [vmem:[%s899_s3 + $0xd0] sm:$0xff] %v246_v3  ;;  %v118_v15 = vmul.f32 %v380_v1, %v47_v61  ;;  %v119_v16 = vmul.f32 %v380_v1, %v48_v62  ;;  %v64_v0 = vld [vmem:[%s896_s0 + $0x190] sm:$0xff]  ;;  %v65_v3 = vld [vmem:[%s896_s0 + $0x198] sm:$0xff] }
  0x1d   :  { %311 = vst [vmem:[%s899_s3 + $0xd8] sm:$0xff] %v247_v4  ;;  %v251_v14 = vmax.f32 %v187_v5, 0.0  ;;  %v120_v17 = vmul.f32 %v380_v1, %v49_v63  ;;  %312 = vst [vmem:[%s899_s3 + $0xe0] sm:$0xff] %v248_v9  ;;  %v188_v18 = vadd.f32 %v385_v2, %v117_v12  ;;  %v121_v19 = vmul.f32 %v380_v1, %v50_v6  ;;  %v63_v63 = vld [vmem:[%s896_s0 + $0x188] sm:$0xff] }
  0x1e   :  { %313 = vst [vmem:[%s899_s3 + $0xe8] sm:$0xff] %v249_v10  ;;  %314 = vst [vmem:[%s899_s3 + $0xf0] sm:$0xff] %v250_v11  ;;  %v122_v20 = vmul.f32 %v380_v1, %v51_v7  ;;  %v123_v21 = vmul.f32 %v380_v1, %v52_v8  ;;  %v189_v22 = vadd.f32 %v385_v2, %v118_v15  ;;  %v66_v8 = vld [vmem:[%s896_s0 + $0x1a0] sm:$0xff]  ;;  %v67_v9 = vld [vmem:[%s896_s0 + $0x1a8] sm:$0xff] }
  0x1f   :  { %315 = vst [vmem:[%s899_s3 + $0xf8] sm:$0xff] %v251_v14  ;;  %v190_v23 = vadd.f32 %v385_v2, %v119_v16  ;;  %v191_v24 = vadd.f32 %v385_v2, %v120_v17  ;;  %v124_v25 = vmul.f32 %v380_v1, %v53_v13  ;;  %v252_v27 = vmax.f32 %v188_v18, 0.0  ;;  %v68_v10 = vld [vmem:[%s896_s0 + $0x1b0] sm:$0xff]  ;;  %v69_v15 = vld [vmem:[%s896_s0 + $0x1b8] sm:$0xff] }
  0x20   :  { %v192_v28 = vadd.f32 %v385_v2, %v121_v19  ;;  %v193_v29 = vadd.f32 %v385_v2, %v122_v20  ;;  %v194_v30 = vadd.f32 %v385_v2, %v123_v21  ;;  %v253_v34 = vmax.f32 %v189_v22, 0.0 }
  0x21   :  { %v254_v35 = vmax.f32 %v190_v23, 0.0  ;;  %v255_v36 = vmax.f32 %v191_v24, 0.0  ;;  %v195_v37 = vadd.f32 %v385_v2, %v124_v25  ;;  %316 = vst [vmem:[%s899_s3 + $0x100] sm:$0xff] %v252_v27  ;;  %v125_v44 = vmul.f32 %v380_v1, %v54_v26 }
  0x22   :  { %v256_v41 = vmax.f32 %v192_v28, 0.0  ;;  %v257_v42 = vmax.f32 %v193_v29, 0.0  ;;  %v258_v43 = vmax.f32 %v194_v30, 0.0  ;;  %317 = vst [vmem:[%s899_s3 + $0x108] sm:$0xff] %v253_v34  ;;  %v126_v47 = vmul.f32 %v380_v1, %v55_v31  ;;  %v70_v28 = vld [vmem:[%s896_s0 + $0x1c0] sm:$0xff]  ;;  %v72_v34 = vld [vmem:[%s896_s0 + $0x1d0] sm:$0xff] }
  0x23   :  { %318 = vst [vmem:[%s899_s3 + $0x110] sm:$0xff] %v254_v35  ;;  %319 = vst [vmem:[%s899_s3 + $0x118] sm:$0xff] %v255_v36  ;;  %v259_v46 = vmax.f32 %v195_v37, 0.0  ;;  %v127_v48 = vmul.f32 %v380_v1, %v56_v32  ;;  %v128_v49 = vmul.f32 %v380_v1, %v57_v33  ;;  %v196_v50 = vadd.f32 %v385_v2, %v125_v44  ;;  %v71_v33 = vld [vmem:[%s896_s0 + $0x1c8] sm:$0xff]  ;;  %v73_v35 = vld [vmem:[%s896_s0 + $0x1d8] sm:$0xff] }
  0x24   :  { %320 = vst [vmem:[%s899_s3 + $0x120] sm:$0xff] %v256_v41  ;;  %321 = vst [vmem:[%s899_s3 + $0x128] sm:$0xff] %v257_v42  ;;  %v129_v51 = vmul.f32 %v380_v1, %v58_v38  ;;  %v130_v52 = vmul.f32 %v380_v1, %v59_v39  ;;  %v131_v53 = vmul.f32 %v380_v1, %v60_v40  ;;  %v74_v40 = vld [vmem:[%s896_s0 + $0x1e0] sm:$0xff]  ;;  %v75_v41 = vld [vmem:[%s896_s0 + $0x1e8] sm:$0xff] }
  0x25   :  { %322 = vst [vmem:[%s899_s3 + $0x130] sm:$0xff] %v258_v43  ;;  %323 = vst [vmem:[%s899_s3 + $0x138] sm:$0xff] %v259_v46  ;;  %v197_v54 = vadd.f32 %v385_v2, %v126_v47  ;;  %v198_v55 = vadd.f32 %v385_v2, %v127_v48  ;;  %v199_v56 = vadd.f32 %v385_v2, %v128_v49  ;;  %v260_v59 = vmax.f32 %v196_v50, 0.0  ;;  %v76_v42 = vld [vmem:[%s896_s0 + $0x1f0] sm:$0xff]  ;;  %v77_v47 = vld [vmem:[%s896_s0 + $0x1f8] sm:$0xff] }
  0x26   :  { %v132_v57 = vmul.f32 %v380_v1, %v61_v45  ;;  %v200_v60 = vadd.f32 %v385_v2, %v129_v51  ;;  %v201_v61 = vadd.f32 %v385_v2, %v130_v52  ;;  %v202_v62 = vadd.f32 %v385_v2, %v131_v53 }
  0x27   :  { %v261_v4 = vmax.f32 %v197_v54, 0.0  ;;  %v262_v5 = vmax.f32 %v198_v55, 0.0  ;;  %v263_v6 = vmax.f32 %v199_v56, 0.0  ;;  %324 = vst [vmem:[%s899_s3 + $0x140] sm:$0xff] %v260_v59  ;;  %v133_v14 = vmul.f32 %v380_v1, %v62_v58 }
  0x28   :  { %v203_v7 = vadd.f32 %v385_v2, %v132_v57  ;;  %v264_v11 = vmax.f32 %v200_v60, 0.0  ;;  %v265_v12 = vmax.f32 %v201_v61, 0.0  ;;  %v266_v13 = vmax.f32 %v202_v62, 0.0 }
  0x29   :  { %325 = vst [vmem:[%s899_s3 + $0x148] sm:$0xff] %v261_v4  ;;  %326 = vst [vmem:[%s899_s3 + $0x150] sm:$0xff] %v262_v5  ;;  %v134_v17 = vmul.f32 %v380_v1, %v63_v63  ;;  %v135_v18 = vmul.f32 %v380_v1, %v64_v0  ;;  %v136_v19 = vmul.f32 %v380_v1, %v65_v3 }
  0x2a   :  { %327 = vst [vmem:[%s899_s3 + $0x158] sm:$0xff] %v263_v6  ;;  %v267_v16 = vmax.f32 %v203_v7, 0.0  ;;  %328 = vst [vmem:[%s899_s3 + $0x160] sm:$0xff] %v264_v11  ;;  %v204_v20 = vadd.f32 %v385_v2, %v133_v14  ;;  %v137_v21 = vmul.f32 %v380_v1, %v66_v8  ;;  %v138_v22 = vmul.f32 %v380_v1, %v67_v9 }
  0x2b   :  { %329 = vst [vmem:[%s899_s3 + $0x168] sm:$0xff] %v265_v12  ;;  %330 = vst [vmem:[%s899_s3 + $0x170] sm:$0xff] %v266_v13  ;;  %v139_v23 = vmul.f32 %v380_v1, %v68_v10  ;;  %v205_v24 = vadd.f32 %v385_v2, %v134_v17  ;;  %v206_v25 = vadd.f32 %v385_v2, %v135_v18 }
  0x2c   :  { %331 = vst [vmem:[%s899_s3 + $0x178] sm:$0xff] %v267_v16  ;;  %v207_v26 = vadd.f32 %v385_v2, %v136_v19  ;;  %v140_v27 = vmul.f32 %v380_v1, %v69_v15  ;;  %v268_v29 = vmax.f32 %v204_v20, 0.0  ;;  %v208_v30 = vadd.f32 %v385_v2, %v137_v21 }
  0x2d   :  { %v209_v31 = vadd.f32 %v385_v2, %v138_v22  ;;  %v210_v32 = vadd.f32 %v385_v2, %v139_v23  ;;  %v269_v36 = vmax.f32 %v205_v24, 0.0  ;;  %v270_v37 = vmax.f32 %v206_v25, 0.0 }
  0x2e   :  { %v271_v38 = vmax.f32 %v207_v26, 0.0  ;;  %v211_v39 = vadd.f32 %v385_v2, %v140_v27  ;;  %332 = vst [vmem:[%s899_s3 + $0x180] sm:$0xff] %v268_v29  ;;  %v272_v43 = vmax.f32 %v208_v30, 0.0  ;;  %v141_v46 = vmul.f32 %v380_v1, %v70_v28 }
  0x2f   :  { %v273_v44 = vmax.f32 %v209_v31, 0.0  ;;  %v274_v45 = vmax.f32 %v210_v32, 0.0  ;;  %333 = vst [vmem:[%s899_s3 + $0x188] sm:$0xff] %v269_v36  ;;  %334 = vst [vmem:[%s899_s3 + $0x190] sm:$0xff] %v270_v37  ;;  %v142_v49 = vmul.f32 %v380_v1, %v71_v33  ;;  %v143_v50 = vmul.f32 %v380_v1, %v72_v34 }
  0x30   :  { %335 = vst [vmem:[%s899_s3 + $0x198] sm:$0xff] %v271_v38  ;;  %v275_v48 = vmax.f32 %v211_v39, 0.0  ;;  %v144_v51 = vmul.f32 %v380_v1, %v73_v35  ;;  %336 = vst [vmem:[%s899_s3 + $0x1a0] sm:$0xff] %v272_v43  ;;  %v212_v52 = vadd.f32 %v385_v2, %v141_v46  ;;  %v145_v53 = vmul.f32 %v380_v1, %v74_v40 }
  0x31   :  { %337 = vst [vmem:[%s899_s3 + $0x1a8] sm:$0xff] %v273_v44  ;;  %338 = vst [vmem:[%s899_s3 + $0x1b0] sm:$0xff] %v274_v45  ;;  %v146_v54 = vmul.f32 %v380_v1, %v75_v41  ;;  %v147_v55 = vmul.f32 %v380_v1, %v76_v42  ;;  %v213_v56 = vadd.f32 %v385_v2, %v142_v49 }
  0x32   :  { %339 = vst [vmem:[%s899_s3 + $0x1b8] sm:$0xff] %v275_v48  ;;  %v214_v57 = vadd.f32 %v385_v2, %v143_v50  ;;  %v215_v58 = vadd.f32 %v385_v2, %v144_v51  ;;  %v148_v59 = vmul.f32 %v380_v1, %v77_v47  ;;  %v276_v60 = vmax.f32 %v212_v52, 0.0 }
  0x33   :  { %v216_v61 = vadd.f32 %v385_v2, %v145_v53  ;;  %v217_v62 = vadd.f32 %v385_v2, %v146_v54  ;;  %v218_v63 = vadd.f32 %v385_v2, %v147_v55  ;;  %v277_v0 = vmax.f32 %v213_v56, 0.0 }
  0x34   :  { %v278_v3 = vmax.f32 %v214_v57, 0.0  ;;  %v279_v4 = vmax.f32 %v215_v58, 0.0  ;;  %v219_v5 = vadd.f32 %v385_v2, %v148_v59  ;;  %340 = vst [vmem:[%s899_s3 + $0x1c0] sm:$0xff] %v276_v60 }
  0x35   :  { %v280_v6 = vmax.f32 %v216_v61, 0.0  ;;  %v281_v7 = vmax.f32 %v217_v62, 0.0  ;;  %v282_v8 = vmax.f32 %v218_v63, 0.0  ;;  %341 = vst [vmem:[%s899_s3 + $0x1c8] sm:$0xff] %v277_v0 }
  0x36   :  { %342 = vst [vmem:[%s899_s3 + $0x1d0] sm:$0xff] %v278_v3  ;;  %343 = vst [vmem:[%s899_s3 + $0x1d8] sm:$0xff] %v279_v4  ;;  %v283_v1 = vmax.f32 %v219_v5, 0.0 }
  0x37   :  { %344 = vst [vmem:[%s899_s3 + $0x1e0] sm:$0xff] %v280_v6  ;;  %345 = vst [vmem:[%s899_s3 + $0x1e8] sm:$0xff] %v281_v7 }
  0x38   :  { %346 = vst [vmem:[%s899_s3 + $0x1f0] sm:$0xff] %v282_v8  ;;  %347 = vst [vmem:[%s899_s3 + $0x1f8] sm:$0xff] %v283_v1 }

// kernel: image_classify.11
= control target key start
LH: loop header
LB: loop body
LE: loop exit
PB: predicated region body
PF: predicated region fallthrough
CT: control target
= control target key end

     0   :  { %vm351_vm0 = vcmask 1044480   ;;  %vm352_vm1 = vcmask 1045504   ;;  %vm254_vm2 = vcmask 220160   ;;  %v1145_v1 = vmov 65535   ;;  %s1708_s1 = inlined_call_operand.vmem [shape: bf16[27,128], index: 1, kind: input, shape index: {}]   ;;  %s1709_s0 = inlined_call_operand.vmem [shape: bf16[512,27], index: 0, kind: input, shape index: {}]   ;;  %s1710_s3 = inlined_call_operand.vmem [shape: f32[1,128], index: 3, kind: output, shape index: {1}]   ;;  %s1711_s4 = inlined_call_operand.vmem [shape: f32[1,128], index: 4, kind: output, shape index: {2}]   ;;  %s1712_s2 = inlined_call_operand.vmem [shape: f32[512,128], index: 2, kind: output, shape index: {0}]  }
   0x1   :  { %v1111_v0 = vld [vmem:[%s1708_s1] sm:$0xff]   ;;  %v353_v2 = vsel %vm351_vm0, 4294967295, %v1145_v1  ;;  %v1112_v3 = vld [vmem:[%s1708_s1 + $0x8] sm:$0x3f]   ;;  %v1115_v8 = vld [vmem:[%s1709_s0 + $0x10] sm:$0xff]   ;;  %v1146_v38 = vmov 0.0  }
   0x2   :  { %1037 = vmatprep.subr.bf16.mxu0 %v1111_v0  ;;  %v354_v4 = vsel %vm352_vm1, %v353_v2, 0  ;;  %v1113_v5 = vld [vmem:[%s1709_s0] sm:$0xff]   ;;  %1105 = vmatprep.subr.bf16.mxu1 %v1111_v0  ;;  %v1114_v7 = vld [vmem:[%s1709_s0 + $0x8] sm:$0xff]   ;;  %v1116_v9 = vld [vmem:[%s1709_s0 + $0x18] sm:$0xff]   ;;  %715 = vst [vmem:[%s1710_s3] sm:$0x1] %v1146_v38 }
   0x3   :  { %1038 = vmatpush3.bf16.msra.mxu0 %v1111_v0  ;;  %v356_v6 = vand.u32 %v1112_v3, %v354_v4  ;;  %1107 = vmatpush3.bf16.msra.mxu1 %v1111_v0  ;;  %v1117_v10 = vld [vmem:[%s1709_s0 + $0x20] sm:$0xff]   ;;  %v1130_v12 = vld [vmem:[%s1709_s0 + $0x88] sm:$0xff]   ;;  %v1131_v13 = vld [vmem:[%s1709_s0 + $0x90] sm:$0xff]   ;;  %716 = vst [vmem:[%s1711_s4] sm:$0x1] %v1146_v38 }
   0x4   :  { %1041 = vmatprep.mubr.msk.bf16.mxu0 %vm254_vm2, %v1113_v5  ;;  %v1129_v11 = vld [vmem:[%s1709_s0 + $0x80] sm:$0xff]   ;;  %v1118_v14 = vld [vmem:[%s1709_s0 + $0x28] sm:$0xff]   ;;  %v1119_v15 = vld [vmem:[%s1709_s0 + $0x30] sm:$0xff]  }
   0x5   :  { %1039 = vmatprep.subr.bf16.mxu0 %v356_v6  ;;  %1106 = vmatprep.subr.bf16.mxu1 %v356_v6  ;;  %v1132_v16 = vld [vmem:[%s1709_s0 + $0x98] sm:$0xff]   ;;  %v1133_v17 = vld [vmem:[%s1709_s0 + $0xa0] sm:$0xff]   ;;  %v1134_v20 = vld [vmem:[%s1709_s0 + $0xa8] sm:$0xff]  }
   0x6   :  { %1073 = vmatprep.mubr.msk.bf16.mxu1 %vm254_vm2, %v1129_v11  ;;  %v1120_v18 = vld [vmem:[%s1709_s0 + $0x38] sm:$0xff]   ;;  %v1121_v19 = vld [vmem:[%s1709_s0 + $0x40] sm:$0xff]   ;;  %v1135_v21 = vld [vmem:[%s1709_s0 + $0xb0] sm:$0xff]  }
   0x7   :  { %1040 = vmatpush3.bf16.msra.mxu0 %v356_v6  ;;  %1108 = vmatpush3.bf16.msra.mxu1 %v356_v6  ;;  %v1122_v22 = vld [vmem:[%s1709_s0 + $0x48] sm:$0xff]   ;;  %v1123_v23 = vld [vmem:[%s1709_s0 + $0x50] sm:$0xff]   ;;  %v1136_v24 = vld [vmem:[%s1709_s0 + $0xb8] sm:$0xff]  }
   0x8   :  { %v1137_v25 = vld [vmem:[%s1709_s0 + $0xc0] sm:$0xff]   ;;  %v1124_v26 = vld [vmem:[%s1709_s0 + $0x58] sm:$0xff]   ;;  %v1138_v28 = vld [vmem:[%s1709_s0 + $0xc8] sm:$0xff]  }
   0x9   :  { %v1125_v27 = vld [vmem:[%s1709_s0 + $0x60] sm:$0xff]   ;;  %v1139_v29 = vld [vmem:[%s1709_s0 + $0xd0] sm:$0xff]   ;;  %v1126_v30 = vld [vmem:[%s1709_s0 + $0x68] sm:$0xff]  }
   0xa   :  { %1042 = vmatmul.mubr.msk.bf16.vlgmr.msra.gmra.mrb[0].mxu0 %vm254_vm2, %v1114_v7  ;;  %1074 = vmatmul.mubr.msk.bf16.vlgmr.msra.gmra.mrb[0].mxu1 %vm254_vm2, %v1130_v12  ;;  %v1127_v31 = vld [vmem:[%s1709_s0 + $0x70] sm:$0xff]   ;;  %v1140_v32 = vld [vmem:[%s1709_s0 + $0xd8] sm:$0xff]   ;;  %v1141_v33 = vld [vmem:[%s1709_s0 + $0xe0] sm:$0xff]  }
   0xb   :  { %1045 = vmatprep.mubr.msk.bf16.mxu0 %vm254_vm2, %v1115_v8  ;;  %1077 = vmatprep.mubr.msk.bf16.mxu1 %vm254_vm2, %v1131_v13  ;;  %v1128_v34 = vld [vmem:[%s1709_s0 + $0x78] sm:$0xff]   ;;  %v1142_v35 = vld [vmem:[%s1709_s0 + $0xe8] sm:$0xff]   ;;  %v1143_v36 = vld [vmem:[%s1709_s0 + $0xf0] sm:$0xff]  }
   0xc   :  { %v1144_v37 = vld [vmem:[%s1709_s0 + $0xf8] sm:$0xff]  }
  0x12   :  { %1046 = vmatmul.mubr.msk.bf16.gmra.mrb[4].mxu0 %vm254_vm2, %v1116_v9  ;;  %1078 = vmatmul.mubr.msk.bf16.gmra.mrb[4].mxu1 %vm254_vm2, %v1132_v16 }
  0x13   :  { %1049 = vmatprep.mubr.msk.bf16.mxu0 %vm254_vm2, %v1117_v10  ;;  %1081 = vmatprep.mubr.msk.bf16.mxu1 %vm254_vm2, %v1133_v17 }
  0x1a   :  { %1050 = vmatmul.mubr.msk.bf16.gmra.mrb[8].mxu0 %vm254_vm2, %v1118_v14  ;;  %1082 = vmatmul.mubr.msk.bf16.gmra.mrb[8].mxu1 %vm254_vm2, %v1134_v20 }
  0x1b   :  { %1053 = vmatprep.mubr.msk.bf16.mxu0 %vm254_vm2, %v1119_v15  ;;  %1085 = vmatprep.mubr.msk.bf16.mxu1 %vm254_vm2, %v1135_v21 }
  0x22   :  { %1054 = vmatmul.mubr.msk.bf16.gmra.mrb[12].mxu0 %vm254_vm2, %v1120_v18  ;;  %1086 = vmatmul.mubr.msk.bf16.gmra.mrb[12].mxu1 %vm254_vm2, %v1136_v24 }
  0x23   :  { %1057 = vmatprep.mubr.msk.bf16.mxu0 %vm254_vm2, %v1121_v19  ;;  %1089 = vmatprep.mubr.msk.bf16.mxu1 %vm254_vm2, %v1137_v25 }
  0x2a   :  { %1058 = vmatmul.mubr.msk.bf16.gmra.mrb[16].mxu0 %vm254_vm2, %v1122_v22  ;;  %1090 = vmatmul.mubr.msk.bf16.gmra.mrb[16].mxu1 %vm254_vm2, %v1138_v28 }
  0x2b   :  { %1061 = vmatprep.mubr.msk.bf16.mxu0 %vm254_vm2, %v1123_v23  ;;  %1093 = vmatprep.mubr.msk.bf16.mxu1 %vm254_vm2, %v1139_v29 }
  0x32   :  { %1062 = vmatmul.mubr.msk.bf16.gmra.mrb[20].mxu0 %vm254_vm2, %v1124_v26  ;;  %1094 = vmatmul.mubr.msk.bf16.gmra.mrb[20].mxu1 %vm254_vm2, %v1140_v32 }
  0x33   :  { %1065 = vmatprep.mubr.msk.bf16.mxu0 %vm254_vm2, %v1125_v27  ;;  %1097 = vmatprep.mubr.msk.bf16.mxu1 %vm254_vm2, %v1141_v33 }
  0x3a   :  { %1066 = vmatmul.mubr.msk.bf16.gmra.mrb[24].mxu0 %vm254_vm2, %v1126_v30  ;;  %1098 = vmatmul.mubr.msk.bf16.gmra.mrb[24].mxu1 %vm254_vm2, %v1142_v35 }
  0x3b   :  { %1069 = vmatprep.mubr.msk.bf16.mxu0 %vm254_vm2, %v1127_v31  ;;  %1101 = vmatprep.mubr.msk.bf16.mxu1 %vm254_vm2, %v1143_v36 }
  0x42   :  { %1070 = vmatmul.mubr.msk.bf16.gmra.mrb[28].mxu0 %vm254_vm2, %v1128_v34  ;;  %1102 = vmatmul.mubr.msk.bf16.gmra.mrb[28].mxu1 %vm254_vm2, %v1144_v37 }
  0xdd   :  { %v1043_v39 = vpop.f32.mrb[0].mxu0  ;;  %v1333_v59 = vpop.f32.mrb[0].mxu1 }
  0xde   :  { %649 = vst [vmem:[%s1712_s2 + $0x10] sm:$0xff] %v1043_v39  ;;  %v392_v40 = vpop.f32.mrb[1].mxu0  ;;  %v792_v46 = vmul.f32 %v1043_v39, %v1043_v39  ;;  %681 = vst [vmem:[%s1712_s2 + $0x110] sm:$0xff] %v1333_v59  ;;  %v1342_v63 = vpop.f32.mrb[1].mxu1 }
  0xdf   :  { %647 = vst [vmem:[%s1712_s2] sm:$0xff] %v392_v40  ;;  %v1044_v41 = vpop.f32.mrb[2].mxu0  ;;  %v790_v43 = vmul.f32 %v392_v40, %v392_v40  ;;  %679 = vst [vmem:[%s1712_s2 + $0x100] sm:$0xff] %v1342_v63  ;;  %v1348_v0 = vpop.f32.mrb[2].mxu1 }
  0xe0   :  { %650 = vst [vmem:[%s1712_s2 + $0x18] sm:$0xff] %v1044_v41  ;;  %v395_v42 = vpop.f32.mrb[3].mxu0  ;;  %v793_v49 = vmul.f32 %v1044_v41, %v1044_v41  ;;  %682 = vst [vmem:[%s1712_s2 + $0x118] sm:$0xff] %v1348_v0  ;;  %v1354_v4 = vpop.f32.mrb[3].mxu1 }
  0xe1   :  { %648 = vst [vmem:[%s1712_s2 + $0x8] sm:$0xff] %v395_v42  ;;  %v718_v44 = vadd.f32 %v395_v42, %v392_v40  ;;  %v791_v45 = vmul.f32 %v395_v42, %v395_v42  ;;  %680 = vst [vmem:[%s1712_s2 + $0x108] sm:$0xff] %v1354_v4 }
  0xe3   :  { %v719_v47 = vadd.f32 %v1043_v39, %v718_v44  ;;  %v854_v48 = vadd.f32 %v791_v45, %v790_v43 }
  0xe5   :  { %v855_v50 = vadd.f32 %v854_v48, %v792_v46  ;;  %v1047_v51 = vpop.f32.mrb[4].mxu0  ;;  %v720_v52 = vadd.f32 %v1044_v41, %v719_v47  ;;  %v1369_v15 = vpop.f32.mrb[4].mxu1 }
  0xe6   :  { %653 = vst [vmem:[%s1712_s2 + $0x30] sm:$0xff] %v1047_v51  ;;  %v408_v53 = vpop.f32.mrb[5].mxu0  ;;  %v796_v1 = vmul.f32 %v1047_v51, %v1047_v51  ;;  %685 = vst [vmem:[%s1712_s2 + $0x130] sm:$0xff] %v1369_v15  ;;  %v1378_v19 = vpop.f32.mrb[5].mxu1 }
  0xe7   :  { %651 = vst [vmem:[%s1712_s2 + $0x20] sm:$0xff] %v408_v53  ;;  %v721_v54 = vadd.f32 %v720_v52, %v408_v53  ;;  %v794_v55 = vmul.f32 %v408_v53, %v408_v53  ;;  %v856_v56 = vadd.f32 %v855_v50, %v793_v49  ;;  %v1048_v57 = vpop.f32.mrb[6].mxu0  ;;  %683 = vst [vmem:[%s1712_s2 + $0x120] sm:$0xff] %v1378_v19  ;;  %v1384_v20 = vpop.f32.mrb[6].mxu1 }
  0xe8   :  { %654 = vst [vmem:[%s1712_s2 + $0x38] sm:$0xff] %v1048_v57  ;;  %v411_v58 = vpop.f32.mrb[7].mxu0  ;;  %v797_v5 = vmul.f32 %v1048_v57, %v1048_v57  ;;  %686 = vst [vmem:[%s1712_s2 + $0x138] sm:$0xff] %v1384_v20  ;;  %v1390_v24 = vpop.f32.mrb[7].mxu1 }
  0xe9   :  { %v857_v60 = vadd.f32 %v856_v56, %v794_v55  ;;  %652 = vst [vmem:[%s1712_s2 + $0x28] sm:$0xff] %v411_v58  ;;  %v722_v61 = vadd.f32 %v721_v54, %v411_v58  ;;  %v795_v62 = vmul.f32 %v411_v58, %v411_v58  ;;  %684 = vst [vmem:[%s1712_s2 + $0x128] sm:$0xff] %v1390_v24 }
  0xeb   :  { %v723_v2 = vadd.f32 %v1047_v51, %v722_v61  ;;  %v858_v3 = vadd.f32 %v857_v60, %v795_v62 }
  0xed   :  { %v859_v6 = vadd.f32 %v858_v3, %v796_v1  ;;  %v1051_v7 = vpop.f32.mrb[8].mxu0  ;;  %v724_v8 = vadd.f32 %v1048_v57, %v723_v2  ;;  %v1405_v35 = vpop.f32.mrb[8].mxu1 }
  0xee   :  { %657 = vst [vmem:[%s1712_s2 + $0x50] sm:$0xff] %v1051_v7  ;;  %v424_v9 = vpop.f32.mrb[9].mxu0  ;;  %v800_v21 = vmul.f32 %v1051_v7, %v1051_v7  ;;  %689 = vst [vmem:[%s1712_s2 + $0x150] sm:$0xff] %v1405_v35  ;;  %v1414_v39 = vpop.f32.mrb[9].mxu1 }
  0xef   :  { %655 = vst [vmem:[%s1712_s2 + $0x40] sm:$0xff] %v424_v9  ;;  %v725_v10 = vadd.f32 %v724_v8, %v424_v9  ;;  %v798_v11 = vmul.f32 %v424_v9, %v424_v9  ;;  %v860_v12 = vadd.f32 %v859_v6, %v797_v5  ;;  %v1052_v13 = vpop.f32.mrb[10].mxu0  ;;  %687 = vst [vmem:[%s1712_s2 + $0x140] sm:$0xff] %v1414_v39  ;;  %v1420_v40 = vpop.f32.mrb[10].mxu1 }
  0xf0   :  { %658 = vst [vmem:[%s1712_s2 + $0x58] sm:$0xff] %v1052_v13  ;;  %v427_v14 = vpop.f32.mrb[11].mxu0  ;;  %v801_v25 = vmul.f32 %v1052_v13, %v1052_v13  ;;  %690 = vst [vmem:[%s1712_s2 + $0x158] sm:$0xff] %v1420_v40  ;;  %v1426_v44 = vpop.f32.mrb[11].mxu1 }
  0xf1   :  { %v861_v16 = vadd.f32 %v860_v12, %v798_v11  ;;  %656 = vst [vmem:[%s1712_s2 + $0x48] sm:$0xff] %v427_v14  ;;  %v726_v17 = vadd.f32 %v725_v10, %v427_v14  ;;  %v799_v18 = vmul.f32 %v427_v14, %v427_v14  ;;  %688 = vst [vmem:[%s1712_s2 + $0x148] sm:$0xff] %v1426_v44 }
  0xf3   :  { %v727_v22 = vadd.f32 %v1051_v7, %v726_v17  ;;  %v862_v23 = vadd.f32 %v861_v16, %v799_v18 }
  0xf5   :  { %v863_v26 = vadd.f32 %v862_v23, %v800_v21  ;;  %v1055_v27 = vpop.f32.mrb[12].mxu0  ;;  %v728_v28 = vadd.f32 %v1052_v13, %v727_v22  ;;  %v1441_v55 = vpop.f32.mrb[12].mxu1 }
  0xf6   :  { %661 = vst [vmem:[%s1712_s2 + $0x70] sm:$0xff] %v1055_v27  ;;  %v440_v29 = vpop.f32.mrb[13].mxu0  ;;  %v804_v41 = vmul.f32 %v1055_v27, %v1055_v27  ;;  %693 = vst [vmem:[%s1712_s2 + $0x170] sm:$0xff] %v1441_v55  ;;  %v1450_v60 = vpop.f32.mrb[13].mxu1 }
  0xf7   :  { %659 = vst [vmem:[%s1712_s2 + $0x60] sm:$0xff] %v440_v29  ;;  %v729_v30 = vadd.f32 %v728_v28, %v440_v29  ;;  %v802_v31 = vmul.f32 %v440_v29, %v440_v29  ;;  %v864_v32 = vadd.f32 %v863_v26, %v801_v25  ;;  %v1056_v33 = vpop.f32.mrb[14].mxu0  ;;  %691 = vst [vmem:[%s1712_s2 + $0x160] sm:$0xff] %v1450_v60  ;;  %v1456_v61 = vpop.f32.mrb[14].mxu1 }
  0xf8   :  { %662 = vst [vmem:[%s1712_s2 + $0x78] sm:$0xff] %v1056_v33  ;;  %v443_v34 = vpop.f32.mrb[15].mxu0  ;;  %v805_v45 = vmul.f32 %v1056_v33, %v1056_v33  ;;  %694 = vst [vmem:[%s1712_s2 + $0x178] sm:$0xff] %v1456_v61  ;;  %v1462_v3 = vpop.f32.mrb[15].mxu1 }
  0xf9   :  { %v865_v36 = vadd.f32 %v864_v32, %v802_v31  ;;  %660 = vst [vmem:[%s1712_s2 + $0x68] sm:$0xff] %v443_v34  ;;  %v730_v37 = vadd.f32 %v729_v30, %v443_v34  ;;  %v803_v38 = vmul.f32 %v443_v34, %v443_v34  ;;  %692 = vst [vmem:[%s1712_s2 + $0x168] sm:$0xff] %v1462_v3 }
  0xfb   :  { %v731_v42 = vadd.f32 %v1055_v27, %v730_v37  ;;  %v866_v43 = vadd.f32 %v865_v36, %v803_v38 }
  0xfd   :  { %v867_v46 = vadd.f32 %v866_v43, %v804_v41  ;;  %v1059_v47 = vpop.f32.mrb[16].mxu0  ;;  %v732_v48 = vadd.f32 %v1056_v33, %v731_v42  ;;  %v1477_v16 = vpop.f32.mrb[16].mxu1 }
  0xfe   :  { %665 = vst [vmem:[%s1712_s2 + $0x90] sm:$0xff] %v1059_v47  ;;  %v456_v49 = vpop.f32.mrb[17].mxu0  ;;  %v808_v62 = vmul.f32 %v1059_v47, %v1059_v47  ;;  %697 = vst [vmem:[%s1712_s2 + $0x190] sm:$0xff] %v1477_v16  ;;  %v1486_v22 = vpop.f32.mrb[17].mxu1 }
  0xff   :  { %663 = vst [vmem:[%s1712_s2 + $0x80] sm:$0xff] %v456_v49  ;;  %v733_v50 = vadd.f32 %v732_v48, %v456_v49  ;;  %v806_v51 = vmul.f32 %v456_v49, %v456_v49  ;;  %v868_v52 = vadd.f32 %v867_v46, %v805_v45  ;;  %v1060_v53 = vpop.f32.mrb[18].mxu0  ;;  %695 = vst [vmem:[%s1712_s2 + $0x180] sm:$0xff] %v1486_v22  ;;  %v1492_v23 = vpop.f32.mrb[18].mxu1 }
 0x100   :  { %666 = vst [vmem:[%s1712_s2 + $0x98] sm:$0xff] %v1060_v53  ;;  %v459_v54 = vpop.f32.mrb[19].mxu0  ;;  %v809_v5 = vmul.f32 %v1060_v53, %v1060_v53  ;;  %698 = vst [vmem:[%s1712_s2 + $0x198] sm:$0xff] %v1492_v23  ;;  %v1498_v28 = vpop.f32.mrb[19].mxu1 }
 0x101   :  { %v869_v56 = vadd.f32 %v868_v52, %v806_v51  ;;  %664 = vst [vmem:[%s1712_s2 + $0x88] sm:$0xff] %v459_v54  ;;  %v734_v57 = vadd.f32 %v733_v50, %v459_v54  ;;  %v807_v58 = vmul.f32 %v459_v54, %v459_v54  ;;  %696 = vst [vmem:[%s1712_s2 + $0x188] sm:$0xff] %v1498_v28 }
 0x103   :  { %v735_v1 = vadd.f32 %v1059_v47, %v734_v57  ;;  %v870_v2 = vadd.f32 %v869_v56, %v807_v58 }
 0x105   :  { %v871_v6 = vadd.f32 %v870_v2, %v808_v62  ;;  %v1063_v7 = vpop.f32.mrb[20].mxu0  ;;  %v736_v8 = vadd.f32 %v1060_v53, %v735_v1  ;;  %v1513_v42 = vpop.f32.mrb[20].mxu1 }
 0x106   :  { %669 = vst [vmem:[%s1712_s2 + $0xb0] sm:$0xff] %v1063_v7  ;;  %v472_v9 = vpop.f32.mrb[21].mxu0  ;;  %v812_v25 = vmul.f32 %v1063_v7, %v1063_v7  ;;  %701 = vst [vmem:[%s1712_s2 + $0x1b0] sm:$0xff] %v1513_v42  ;;  %v1522_v47 = vpop.f32.mrb[21].mxu1 }
 0x107   :  { %667 = vst [vmem:[%s1712_s2 + $0xa0] sm:$0xff] %v472_v9  ;;  %v737_v10 = vadd.f32 %v736_v8, %v472_v9  ;;  %v810_v11 = vmul.f32 %v472_v9, %v472_v9  ;;  %v872_v12 = vadd.f32 %v871_v6, %v809_v5  ;;  %v1064_v13 = vpop.f32.mrb[22].mxu0  ;;  %699 = vst [vmem:[%s1712_s2 + $0x1a0] sm:$0xff] %v1522_v47  ;;  %v1528_v48 = vpop.f32.mrb[22].mxu1 }
 0x108   :  { %670 = vst [vmem:[%s1712_s2 + $0xb8] sm:$0xff] %v1064_v13  ;;  %v475_v14 = vpop.f32.mrb[23].mxu0  ;;  %v813_v29 = vmul.f32 %v1064_v13, %v1064_v13  ;;  %702 = vst [vmem:[%s1712_s2 + $0x1b8] sm:$0xff] %v1528_v48  ;;  %v1534_v52 = vpop.f32.mrb[23].mxu1 }
 0x109   :  { %v873_v17 = vadd.f32 %v872_v12, %v810_v11  ;;  %668 = vst [vmem:[%s1712_s2 + $0xa8] sm:$0xff] %v475_v14  ;;  %v738_v18 = vadd.f32 %v737_v10, %v475_v14  ;;  %v811_v21 = vmul.f32 %v475_v14, %v475_v14  ;;  %700 = vst [vmem:[%s1712_s2 + $0x1a8] sm:$0xff] %v1534_v52 }
 0x10b   :  { %v739_v26 = vadd.f32 %v1063_v7, %v738_v18  ;;  %v874_v27 = vadd.f32 %v873_v17, %v811_v21 }
 0x10d   :  { %v875_v30 = vadd.f32 %v874_v27, %v812_v25  ;;  %v1067_v31 = vpop.f32.mrb[24].mxu0  ;;  %v740_v32 = vadd.f32 %v1064_v13, %v739_v26  ;;  %v1549_v7 = vpop.f32.mrb[24].mxu1  ;;  %v822_v27 = vmul.f32 %v1342_v63, %v1342_v63 }
 0x10e   :  { %673 = vst [vmem:[%s1712_s2 + $0xd0] sm:$0xff] %v1067_v31  ;;  %v488_v33 = vpop.f32.mrb[25].mxu0  ;;  %v816_v49 = vmul.f32 %v1067_v31, %v1067_v31  ;;  %705 = vst [vmem:[%s1712_s2 + $0x1d0] sm:$0xff] %v1549_v7  ;;  %v1558_v11 = vpop.f32.mrb[25].mxu1 }
 0x10f   :  { %671 = vst [vmem:[%s1712_s2 + $0xc0] sm:$0xff] %v488_v33  ;;  %v741_v34 = vadd.f32 %v740_v32, %v488_v33  ;;  %v814_v36 = vmul.f32 %v488_v33, %v488_v33  ;;  %v876_v37 = vadd.f32 %v875_v30, %v813_v29  ;;  %v1068_v38 = vpop.f32.mrb[26].mxu0  ;;  %703 = vst [vmem:[%s1712_s2 + $0x1c0] sm:$0xff] %v1558_v11  ;;  %v1564_v12 = vpop.f32.mrb[26].mxu1 }
 0x110   :  { %674 = vst [vmem:[%s1712_s2 + $0xd8] sm:$0xff] %v1068_v38  ;;  %v491_v41 = vpop.f32.mrb[27].mxu0  ;;  %v817_v53 = vmul.f32 %v1068_v38, %v1068_v38  ;;  %706 = vst [vmem:[%s1712_s2 + $0x1d8] sm:$0xff] %v1564_v12  ;;  %v1570_v18 = vpop.f32.mrb[27].mxu1 }
 0x111   :  { %v877_v43 = vadd.f32 %v876_v37, %v814_v36  ;;  %672 = vst [vmem:[%s1712_s2 + $0xc8] sm:$0xff] %v491_v41  ;;  %v742_v45 = vadd.f32 %v741_v34, %v491_v41  ;;  %v815_v46 = vmul.f32 %v491_v41, %v491_v41  ;;  %704 = vst [vmem:[%s1712_s2 + $0x1c8] sm:$0xff] %v1570_v18 }
 0x112   :  { %v823_v34 = vmul.f32 %v1354_v4, %v1354_v4  ;;  %v824_v37 = vmul.f32 %v1333_v59, %v1333_v59 }
 0x113   :  { %v743_v50 = vadd.f32 %v1067_v31, %v742_v45  ;;  %v878_v51 = vadd.f32 %v877_v43, %v815_v46  ;;  %v825_v43 = vmul.f32 %v1348_v0, %v1348_v0 }
 0x115   :  { %v879_v54 = vadd.f32 %v878_v51, %v816_v49  ;;  %v1071_v56 = vpop.f32.mrb[28].mxu0  ;;  %v744_v57 = vadd.f32 %v1068_v38, %v743_v50  ;;  %v1579_v31 = vpop.f32.mrb[28].mxu1 }
 0x116   :  { %677 = vst [vmem:[%s1712_s2 + $0xf0] sm:$0xff] %v1071_v56  ;;  %v504_v58 = vpop.f32.mrb[29].mxu0  ;;  %v820_v13 = vmul.f32 %v1071_v56, %v1071_v56  ;;  %709 = vst [vmem:[%s1712_s2 + $0x1f0] sm:$0xff] %v1579_v31  ;;  %v1588_v36 = vpop.f32.mrb[29].mxu1 }
 0x117   :  { %675 = vst [vmem:[%s1712_s2 + $0xe0] sm:$0xff] %v504_v58  ;;  %v745_v62 = vadd.f32 %v744_v57, %v504_v58  ;;  %v818_v1 = vmul.f32 %v504_v58, %v504_v58  ;;  %v880_v2 = vadd.f32 %v879_v54, %v817_v53  ;;  %v1072_v5 = vpop.f32.mrb[30].mxu0  ;;  %707 = vst [vmem:[%s1712_s2 + $0x1e0] sm:$0xff] %v1588_v36 }
 0x118   :  { %678 = vst [vmem:[%s1712_s2 + $0xf8] sm:$0xff] %v1072_v5  ;;  %v507_v6 = vpop.f32.mrb[31].mxu0  ;;  %v821_v21 = vmul.f32 %v1072_v5, %v1072_v5  ;;  %v827_v54 = vmul.f32 %v1390_v24, %v1390_v24 }
 0x119   :  { %v881_v8 = vadd.f32 %v880_v2, %v818_v1  ;;  %676 = vst [vmem:[%s1712_s2 + $0xe8] sm:$0xff] %v507_v6  ;;  %v746_v9 = vadd.f32 %v745_v62, %v507_v6  ;;  %v819_v10 = vmul.f32 %v507_v6, %v507_v6 }
 0x11b   :  { %v747_v14 = vadd.f32 %v1071_v56, %v746_v9  ;;  %v882_v17 = vadd.f32 %v881_v8, %v819_v10  ;;  %v828_v56 = vmul.f32 %v1369_v15, %v1369_v15  ;;  %v831_v8 = vmul.f32 %v1426_v44, %v1426_v44 }
 0x11d   :  { %v883_v25 = vadd.f32 %v882_v17, %v820_v13  ;;  %v748_v26 = vadd.f32 %v1072_v5, %v747_v14 }
 0x11f   :  { %v749_v29 = vadd.f32 %v748_v26, %v1342_v63  ;;  %v884_v30 = vadd.f32 %v883_v25, %v821_v21  ;;  %v1594_v63 = vpop.f32.mrb[30].mxu1  ;;  %v835_v26 = vmul.f32 %v1462_v3, %v1462_v3 }
 0x120   :  { %710 = vst [vmem:[%s1712_s2 + $0x1f8] sm:$0xff] %v1594_v63  ;;  %v1603_v41 = vpop.f32.mrb[31].mxu1 }
 0x121   :  { %v885_v32 = vadd.f32 %v884_v30, %v822_v27  ;;  %v750_v33 = vadd.f32 %v749_v29, %v1354_v4  ;;  %708 = vst [vmem:[%s1712_s2 + $0x1e8] sm:$0xff] %v1603_v41 }
 0x123   :  { %v751_v38 = vadd.f32 %v1333_v59, %v750_v33  ;;  %v886_v4 = vadd.f32 %v885_v32, %v823_v34  ;;  %v826_v59 = vmul.f32 %v1378_v19, %v1378_v19 }
 0x125   :  { %v887_v45 = vadd.f32 %v886_v4, %v824_v37  ;;  %v752_v46 = vadd.f32 %v1348_v0, %v751_v38  ;;  %v829_v0 = vmul.f32 %v1384_v20, %v1384_v20  ;;  %v839_v38 = vmul.f32 %v1498_v28, %v1498_v28 }
 0x127   :  { %v753_v49 = vadd.f32 %v752_v46, %v1378_v19  ;;  %v888_v50 = vadd.f32 %v887_v45, %v825_v43  ;;  %v830_v19 = vmul.f32 %v1414_v39, %v1414_v39 }
 0x129   :  { %v889_v51 = vadd.f32 %v888_v50, %v826_v59  ;;  %v754_v53 = vadd.f32 %v753_v49, %v1390_v24 }
 0x12b   :  { %v755_v57 = vadd.f32 %v1369_v15, %v754_v53  ;;  %v890_v58 = vadd.f32 %v889_v51, %v827_v54  ;;  %v832_v15 = vmul.f32 %v1405_v35, %v1405_v35  ;;  %v843_v51 = vmul.f32 %v1534_v52, %v1534_v52 }
 0x12d   :  { %v891_v62 = vadd.f32 %v890_v58, %v828_v56  ;;  %v756_v1 = vadd.f32 %v1384_v20, %v755_v57  ;;  %v833_v20 = vmul.f32 %v1420_v40, %v1420_v40 }
 0x12f   :  { %v757_v2 = vadd.f32 %v756_v1, %v1414_v39  ;;  %v892_v5 = vadd.f32 %v891_v62, %v829_v0  ;;  %v834_v39 = vmul.f32 %v1450_v60, %v1450_v60  ;;  %v847_v1 = vmul.f32 %v1570_v18, %v1570_v18 }
 0x131   :  { %v893_v6 = vadd.f32 %v892_v5, %v830_v19  ;;  %v758_v24 = vadd.f32 %v757_v2, %v1426_v44 }
 0x133   :  { %v759_v9 = vadd.f32 %v1405_v35, %v758_v24  ;;  %v894_v10 = vadd.f32 %v893_v6, %v831_v8  ;;  %v836_v35 = vmul.f32 %v1441_v55, %v1441_v55 }
 0x135   :  { %v895_v13 = vadd.f32 %v894_v10, %v832_v15  ;;  %v760_v14 = vadd.f32 %v1420_v40, %v759_v9  ;;  %v837_v40 = vmul.f32 %v1456_v61, %v1456_v61  ;;  %v851_v9 = vmul.f32 %v1603_v41, %v1603_v41 }
 0x137   :  { %v761_v17 = vadd.f32 %v760_v14, %v1450_v60  ;;  %v896_v21 = vadd.f32 %v895_v13, %v833_v20  ;;  %v838_v60 = vmul.f32 %v1486_v22, %v1486_v22 }
 0x139   :  { %v897_v25 = vadd.f32 %v896_v21, %v834_v39  ;;  %v762_v44 = vadd.f32 %v761_v17, %v1462_v3 }
 0x13b   :  { %v763_v27 = vadd.f32 %v1441_v55, %v762_v44  ;;  %v898_v29 = vadd.f32 %v897_v25, %v835_v26  ;;  %v840_v55 = vmul.f32 %v1477_v16, %v1477_v16 }
 0x13d   :  { %v899_v30 = vadd.f32 %v898_v29, %v836_v35  ;;  %v764_v32 = vadd.f32 %v1456_v61, %v763_v27  ;;  %v841_v61 = vmul.f32 %v1492_v23, %v1492_v23 }
 0x13f   :  { %v765_v33 = vadd.f32 %v764_v32, %v1486_v22  ;;  %v900_v34 = vadd.f32 %v899_v30, %v837_v40  ;;  %v842_v22 = vmul.f32 %v1522_v47, %v1522_v47 }
 0x141   :  { %v901_v37 = vadd.f32 %v900_v34, %v838_v60  ;;  %v766_v3 = vadd.f32 %v765_v33, %v1498_v28 }
 0x143   :  { %v767_v4 = vadd.f32 %v1477_v16, %v766_v3  ;;  %v902_v43 = vadd.f32 %v901_v37, %v839_v38  ;;  %v844_v16 = vmul.f32 %v1513_v42, %v1513_v42 }
 0x145   :  { %v903_v45 = vadd.f32 %v902_v43, %v840_v55  ;;  %v768_v46 = vadd.f32 %v1492_v23, %v767_v4  ;;  %v845_v23 = vmul.f32 %v1528_v48, %v1528_v48 }
 0x147   :  { %v769_v59 = vadd.f32 %v768_v46, %v1522_v47  ;;  %v904_v49 = vadd.f32 %v903_v45, %v841_v61  ;;  %v846_v47 = vmul.f32 %v1558_v11, %v1558_v11 }
 0x149   :  { %v905_v50 = vadd.f32 %v904_v49, %v842_v22  ;;  %v770_v28 = vadd.f32 %v769_v59, %v1534_v52 }
 0x14b   :  { %v771_v53 = vadd.f32 %v1513_v42, %v770_v28  ;;  %v906_v54 = vadd.f32 %v905_v50, %v843_v51  ;;  %v848_v42 = vmul.f32 %v1549_v7, %v1549_v7 }
 0x14d   :  { %v907_v56 = vadd.f32 %v906_v54, %v844_v16  ;;  %v772_v57 = vadd.f32 %v1528_v48, %v771_v53  ;;  %v849_v48 = vmul.f32 %v1564_v12, %v1564_v12 }
 0x14f   :  { %v773_v58 = vadd.f32 %v772_v57, %v1558_v11  ;;  %v908_v0 = vadd.f32 %v907_v56, %v845_v23  ;;  %v850_v11 = vmul.f32 %v1588_v36, %v1588_v36 }
 0x151   :  { %v909_v62 = vadd.f32 %v908_v0, %v846_v47  ;;  %v774_v52 = vadd.f32 %v773_v58, %v1570_v18 }
 0x153   :  { %v775_v19 = vadd.f32 %v1549_v7, %v774_v52  ;;  %v910_v2 = vadd.f32 %v909_v62, %v847_v1  ;;  %v852_v7 = vmul.f32 %v1579_v31, %v1579_v31 }
 0x155   :  { %v911_v5 = vadd.f32 %v910_v2, %v848_v42  ;;  %v776_v6 = vadd.f32 %v1564_v12, %v775_v19  ;;  %v853_v12 = vmul.f32 %v1594_v63, %v1594_v63 }
 0x157   :  { %v777_v24 = vadd.f32 %v776_v6, %v1588_v36  ;;  %v912_v8 = vadd.f32 %v911_v5, %v849_v48 }
 0x159   :  { %v913_v15 = vadd.f32 %v912_v8, %v850_v11  ;;  %v778_v18 = vadd.f32 %v777_v24, %v1603_v41 }
 0x15b   :  { %v779_v10 = vadd.f32 %v1579_v31, %v778_v18  ;;  %v914_v20 = vadd.f32 %v913_v15, %v851_v9  ;;  %v717_v31 = vld [vmem:[%s1710_s3] sm:$0x1] }
 0x15d   :  { %v780_v13 = vadd.f32 %v1594_v63, %v779_v10  ;;  %v915_v14 = vadd.f32 %v914_v20, %v852_v7  ;;  %v789_v63 = vld [vmem:[%s1711_s4] sm:$0x1] }
 0x15f   :  { %v781_v36 = vrot.slane %v780_v13, 4  ;;  %v916_v39 = vadd.f32 %v915_v14, %v853_v12 }
 0x161   :  { %v782_v17 = vadd.f32 %v781_v36, %v780_v13  ;;  %v917_v21 = vrot.slane %v916_v39, 4 }
 0x163   :  { %v783_v25 = vrot.slane %v782_v17, 2  ;;  %v918_v44 = vadd.f32 %v917_v21, %v916_v39 }
 0x165   :  { %v784_v26 = vadd.f32 %v783_v25, %v782_v17  ;;  %v919_v41 = vrot.slane %v918_v44, 2 }
 0x167   :  { %v785_v35 = vrot.slane %v784_v26, 1  ;;  %v920_v27 = vadd.f32 %v919_v41, %v918_v44 }
 0x169   :  { %v786_v29 = vadd.f32 %v785_v35, %v784_v26  ;;  %v921_v40 = vrot.slane %v920_v27, 1 }
 0x16b   :  { %v787_v30 = vadd.f32 %v786_v29, %v717_v31  ;;  %v922_v32 = vadd.f32 %v921_v40, %v920_v27 }
 0x16d   :  { %788 = vst [vmem:[%s1710_s3] sm:$0x1] %v787_v30  ;;  %v923_v60 = vadd.f32 %v922_v32, %v789_v63 }
 0x16f   :  { %924 = vst [vmem:[%s1711_s4] sm:$0x1] %v923_v60 }

// kernel: image_classify.14
= control target key start
LH: loop header
LB: loop body
LE: loop exit
PB: predicated region body
PF: predicated region fallthrough
CT: control target
= control target key end

     0   :  { %s254_s0 = inlined_call_operand.vmem [shape: f32[128,128], index: 0, kind: input, shape index: {}]   ;;  %s255_s1 = inlined_call_operand.vmem [shape: f32[1,128], index: 1, kind: input, shape index: {}]   ;;  %s256_s2 = inlined_call_operand.vmem [shape: f32[1,128], index: 2, kind: input, shape index: {}]   ;;  %s257_s3 = inlined_call_operand.vmem [shape: f32[128,128], index: 3, kind: output, shape index: {}]  }
   0x1   :  { %v14_v0 = vld [vmem:[%s254_s0] sm:$0xff]  ;;  %v15_v4 = vld [vmem:[%s254_s0 + $0x8] sm:$0xff]  ;;  %v16_v5 = vld [vmem:[%s254_s0 + $0x10] sm:$0xff] }
   0x2   :  { %v112_v1 = vld [vmem:[%s255_s1] ss:$0 sm:$0xff]  ;;  %v17_v6 = vld [vmem:[%s254_s0 + $0x18] sm:$0xff]  ;;  %v19_v11 = vld [vmem:[%s254_s0 + $0x28] sm:$0xff] }
   0x3   :  { %v143_v2 = vld [vmem:[%s256_s2] ss:$0 sm:$0xff]  ;;  %v37_v3 = vmul.f32 %v112_v1, %v14_v0  ;;  %v38_v7 = vmul.f32 %v112_v1, %v15_v4  ;;  %v39_v8 = vmul.f32 %v112_v1, %v16_v5  ;;  %v40_v9 = vmul.f32 %v112_v1, %v17_v6  ;;  %v20_v12 = vld [vmem:[%s254_s0 + $0x30] sm:$0xff]  ;;  %v21_v17 = vld [vmem:[%s254_s0 + $0x38] sm:$0xff] }
   0x4   :  { %v18_v10 = vld [vmem:[%s254_s0 + $0x20] sm:$0xff]  ;;  %v42_v15 = vmul.f32 %v112_v1, %v19_v11  ;;  %v43_v16 = vmul.f32 %v112_v1, %v20_v12  ;;  %v44_v21 = vmul.f32 %v112_v1, %v21_v17  ;;  %v23_v27 = vld [vmem:[%s254_s0 + $0x48] sm:$0xff]  ;;  %v24_v28 = vld [vmem:[%s254_s0 + $0x50] sm:$0xff] }
   0x5   :  { %v60_v13 = vadd.f32 %v143_v2, %v37_v3  ;;  %v41_v14 = vmul.f32 %v112_v1, %v18_v10  ;;  %v61_v18 = vadd.f32 %v143_v2, %v38_v7  ;;  %v62_v19 = vadd.f32 %v143_v2, %v39_v8  ;;  %v22_v22 = vld [vmem:[%s254_s0 + $0x40] sm:$0xff]  ;;  %v25_v29 = vld [vmem:[%s254_s0 + $0x58] sm:$0xff]  ;;  %v27_v35 = vld [vmem:[%s254_s0 + $0x68] sm:$0xff] }
   0x6   :  { %v63_v20 = vadd.f32 %v143_v2, %v40_v9  ;;  %v65_v25 = vadd.f32 %v143_v2, %v42_v15  ;;  %v66_v26 = vadd.f32 %v143_v2, %v43_v16  ;;  %v67_v33 = vadd.f32 %v143_v2, %v44_v21  ;;  %v26_v34 = vld [vmem:[%s254_s0 + $0x60] sm:$0xff]  ;;  %v28_v36 = vld [vmem:[%s254_s0 + $0x70] sm:$0xff]  ;;  %v29_v41 = vld [vmem:[%s254_s0 + $0x78] sm:$0xff] }
   0x7   :  { %v76_v23 = vmax.f32 %v60_v13, 0.0  ;;  %v64_v24 = vadd.f32 %v143_v2, %v41_v14  ;;  %v77_v30 = vmax.f32 %v61_v18, 0.0  ;;  %v78_v31 = vmax.f32 %v62_v19, 0.0 }
   0x8   :  { %v79_v32 = vmax.f32 %v63_v20, 0.0  ;;  %v81_v38 = vmax.f32 %v65_v25, 0.0  ;;  %v82_v39 = vmax.f32 %v66_v26, 0.0  ;;  %v45_v40 = vmul.f32 %v112_v1, %v22_v22 }
   0x9   :  { %92 = vst [vmem:[%s257_s3] sm:$0xff] %v76_v23  ;;  %v80_v37 = vmax.f32 %v64_v24, 0.0  ;;  %93 = vst [vmem:[%s257_s3 + $0x8] sm:$0xff] %v77_v30  ;;  %v83_v42 = vmax.f32 %v67_v33, 0.0  ;;  %v46_v43 = vmul.f32 %v112_v1, %v23_v27  ;;  %v47_v44 = vmul.f32 %v112_v1, %v24_v28 }
   0xa   :  { %94 = vst [vmem:[%s257_s3 + $0x10] sm:$0xff] %v78_v31  ;;  %95 = vst [vmem:[%s257_s3 + $0x18] sm:$0xff] %v79_v32  ;;  %v48_v45 = vmul.f32 %v112_v1, %v25_v29  ;;  %v68_v46 = vadd.f32 %v143_v2, %v45_v40  ;;  %v49_v47 = vmul.f32 %v112_v1, %v26_v34 }
   0xb   :  { %96 = vst [vmem:[%s257_s3 + $0x20] sm:$0xff] %v80_v37  ;;  %97 = vst [vmem:[%s257_s3 + $0x28] sm:$0xff] %v81_v38  ;;  %v50_v48 = vmul.f32 %v112_v1, %v27_v35  ;;  %v51_v49 = vmul.f32 %v112_v1, %v28_v36  ;;  %v69_v50 = vadd.f32 %v143_v2, %v46_v43 }
   0xc   :  { %98 = vst [vmem:[%s257_s3 + $0x30] sm:$0xff] %v82_v39  ;;  %99 = vst [vmem:[%s257_s3 + $0x38] sm:$0xff] %v83_v42  ;;  %v70_v51 = vadd.f32 %v143_v2, %v47_v44  ;;  %v71_v52 = vadd.f32 %v143_v2, %v48_v45  ;;  %v52_v53 = vmul.f32 %v112_v1, %v29_v41  ;;  %v84_v54 = vmax.f32 %v68_v46, 0.0 }
   0xd   :  { %v72_v55 = vadd.f32 %v143_v2, %v49_v47  ;;  %v73_v56 = vadd.f32 %v143_v2, %v50_v48  ;;  %v74_v57 = vadd.f32 %v143_v2, %v51_v49  ;;  %v85_v58 = vmax.f32 %v69_v50, 0.0 }
   0xe   :  { %v86_v59 = vmax.f32 %v70_v51, 0.0  ;;  %v87_v60 = vmax.f32 %v71_v52, 0.0  ;;  %v75_v61 = vadd.f32 %v143_v2, %v52_v53  ;;  %100 = vst [vmem:[%s257_s3 + $0x40] sm:$0xff] %v84_v54 }
   0xf   :  { %v88_v62 = vmax.f32 %v72_v55, 0.0  ;;  %v89_v63 = vmax.f32 %v73_v56, 0.0  ;;  %v90_v0 = vmax.f32 %v74_v57, 0.0  ;;  %101 = vst [vmem:[%s257_s3 + $0x48] sm:$0xff] %v85_v58 }
  0x10   :  { %102 = vst [vmem:[%s257_s3 + $0x50] sm:$0xff] %v86_v59  ;;  %103 = vst [vmem:[%s257_s3 + $0x58] sm:$0xff] %v87_v60  ;;  %v91_v1 = vmax.f32 %v75_v61, 0.0 }
  0x11   :  { %104 = vst [vmem:[%s257_s3 + $0x60] sm:$0xff] %v88_v62  ;;  %105 = vst [vmem:[%s257_s3 + $0x68] sm:$0xff] %v89_v63 }
  0x12   :  { %106 = vst [vmem:[%s257_s3 + $0x70] sm:$0xff] %v90_v0  ;;  %107 = vst [vmem:[%s257_s3 + $0x78] sm:$0xff] %v91_v1 }

// kernel: image_classify.13
= control target key start
LH: loop header
LB: loop body
LE: loop exit
PB: predicated region body
PF: predicated region fallthrough
CT: control target
= control target key end

     0   :  { %v481_v0 = vmov 0   ;;  %vm175_vm0 = vcmask 130048   ;;  %v482_v26 = vmov 0.0   ;;  %s669_s1 = inlined_call_operand.vmem [shape: bf16[144,128], index: 1, kind: input, shape index: {}]   ;;  %s670_s0 = inlined_call_operand.vmem [shape: bf16[128,144], index: 0, kind: input, shape index: {}]   ;;  %s671_s3 = inlined_call_operand.vmem [shape: f32[1,128], index: 3, kind: output, shape index: {1}]   ;;  %s672_s4 = inlined_call_operand.vmem [shape: f32[1,128], index: 4, kind: output, shape index: {2}]   ;;  %s673_s2 = inlined_call_operand.vmem [shape: f32[128,128], index: 2, kind: output, shape index: {0}]  }
   0x1   :  { %200 = vmatprep.subr.bf16.mxu0 %v481_v0  ;;  %v448_v1 = vld [vmem:[%s669_s1] sm:$0xff]   ;;  %428 = vmatprep.subr.bf16.mxu1 %v481_v0  ;;  %v449_v2 = vld [vmem:[%s669_s1 + $0x8] sm:$0xff]   ;;  %v450_v3 = vld [vmem:[%s669_s1 + $0x10] sm:$0xff]   ;;  %317 = vst [vmem:[%s671_s3] sm:$0x1] %v482_v26 }
   0x2   :  { %201 = vmatpush1.bf16.msra.mxu0 %v448_v1  ;;  %437 = vmatpush1.bf16.msra.mxu1 %v448_v1  ;;  %v451_v4 = vld [vmem:[%s669_s1 + $0x18] sm:$0xff]   ;;  %v459_v5 = vld [vmem:[%s670_s0 + $0x4] ss:$8 sps:$4 sm:$0xff]   ;;  %v454_v9 = vld [vmem:[%s669_s1 + $0x30] sm:$0xff]   ;;  %318 = vst [vmem:[%s672_s4] sm:$0x1] %v482_v26 }
   0x3   :  { %202 = vmatprep.subr.bf16.mxu0 %v481_v0  ;;  %429 = vmatprep.subr.bf16.mxu1 %v481_v0  ;;  %v465_v6 = vld [vmem:[%s670_s0 + $0x44] ss:$8 sps:$4 sm:$0xff]   ;;  %v455_v10 = vld [vmem:[%s669_s1 + $0x38] sm:$0xff]   ;;  %v457_v12 = vld [vmem:[%s670_s0] ss:$8 sps:$4 sm:$0xff]  }
   0x4   :  { %420 = vmatprep.mubr.msk.bf16.mxu0 %vm175_vm0, %v459_v5  ;;  %v452_v7 = vld [vmem:[%s669_s1 + $0x20] sm:$0xff]   ;;  %424 = vmatprep.mubr.msk.bf16.mxu1 %vm175_vm0, %v465_v6  ;;  %v453_v8 = vld [vmem:[%s669_s1 + $0x28] sm:$0xff]   ;;  %v460_v14 = vld [vmem:[%s670_s0 + $0x14] ss:$8 sps:$4 sm:$0xff]  }
   0x5   :  { %v456_v11 = vld [vmem:[%s669_s1 + $0x40] sm:$0xff]   ;;  %v469_v15 = vld [vmem:[%s670_s0 + $0x54] ss:$8 sps:$4 sm:$0xff]   ;;  %v462_v16 = vld [vmem:[%s670_s0 + $0x10] ss:$8 sps:$4 sm:$0xff]  }
   0x6   :  { %203 = vmatpush1.bf16.msra.mxu0 %v449_v2  ;;  %438 = vmatpush1.bf16.msra.mxu1 %v449_v2  ;;  %v463_v13 = vld [vmem:[%s670_s0 + $0x40] ss:$8 sps:$4 sm:$0xff]   ;;  %v471_v17 = vld [vmem:[%s670_s0 + $0x50] ss:$8 sps:$4 sm:$0xff]   ;;  %v466_v18 = vld [vmem:[%s670_s0 + $0x24] ss:$8 sps:$4 sm:$0xff]  }
   0x7   :  { %204 = vmatprep.subr.bf16.mxu0 %v481_v0  ;;  %430 = vmatprep.subr.bf16.mxu1 %v481_v0  ;;  %v475_v19 = vld [vmem:[%s670_s0 + $0x64] ss:$8 sps:$4 sm:$0xff]   ;;  %v468_v20 = vld [vmem:[%s670_s0 + $0x20] ss:$8 sps:$4 sm:$0xff]   ;;  %v472_v22 = vld [vmem:[%s670_s0 + $0x34] ss:$8 sps:$4 sm:$0xff]  }
   0x8   :  { %v477_v21 = vld [vmem:[%s670_s0 + $0x60] ss:$8 sps:$4 sm:$0xff]   ;;  %v478_v23 = vld [vmem:[%s670_s0 + $0x74] ss:$8 sps:$4 sm:$0xff]   ;;  %v474_v24 = vld [vmem:[%s670_s0 + $0x30] ss:$8 sps:$4 sm:$0xff]  }
   0x9   :  { %v480_v25 = vld [vmem:[%s670_s0 + $0x70] ss:$8 sps:$4 sm:$0xff]  }
   0xa   :  { %205 = vmatpush1.bf16.msra.mxu0 %v450_v3  ;;  %439 = vmatpush1.bf16.msra.mxu1 %v450_v3 }
   0xb   :  { %206 = vmatprep.subr.bf16.mxu0 %v481_v0  ;;  %431 = vmatprep.subr.bf16.mxu1 %v481_v0 }
   0xe   :  { %207 = vmatpush1.bf16.msra.mxu0 %v451_v4  ;;  %440 = vmatpush1.bf16.msra.mxu1 %v451_v4 }
   0xf   :  { %208 = vmatprep.subr.bf16.mxu0 %v481_v0  ;;  %432 = vmatprep.subr.bf16.mxu1 %v481_v0 }
  0x12   :  { %209 = vmatpush1.bf16.msra.mxu0 %v452_v7  ;;  %441 = vmatpush1.bf16.msra.mxu1 %v452_v7 }
  0x13   :  { %210 = vmatprep.subr.bf16.mxu0 %v481_v0  ;;  %433 = vmatprep.subr.bf16.mxu1 %v481_v0 }
  0x16   :  { %211 = vmatpush1.bf16.msra.mxu0 %v453_v8  ;;  %442 = vmatpush1.bf16.msra.mxu1 %v453_v8 }
  0x17   :  { %212 = vmatprep.subr.bf16.mxu0 %v481_v0  ;;  %434 = vmatprep.subr.bf16.mxu1 %v481_v0 }
  0x1a   :  { %213 = vmatpush1.bf16.msra.mxu0 %v454_v9  ;;  %443 = vmatpush1.bf16.msra.mxu1 %v454_v9 }
  0x1b   :  { %214 = vmatprep.subr.bf16.mxu0 %v481_v0  ;;  %435 = vmatprep.subr.bf16.mxu1 %v481_v0 }
  0x1e   :  { %215 = vmatpush1.bf16.msra.mxu0 %v455_v10  ;;  %444 = vmatpush1.bf16.msra.mxu1 %v455_v10 }
  0x1f   :  { %216 = vmatprep.subr.bf16.mxu0 %v481_v0  ;;  %436 = vmatprep.subr.bf16.mxu1 %v481_v0 }
  0x22   :  { %217 = vmatpush1.bf16.msra.mxu0 %v456_v11  ;;  %445 = vmatpush1.bf16.msra.mxu1 %v456_v11 }
  0x25   :  { %233 = vmatmul.mubr.bf16.vlgmr.msra.gmra.mrb[0].mxu0 %v457_v12  ;;  %265 = vmatmul.mubr.bf16.vlgmr.msra.gmra.mrb[0].mxu1 %v463_v13 }
  0x26   :  { %421 = vmatprep.mubr.msk.bf16.mxu0 %vm175_vm0, %v460_v14  ;;  %425 = vmatprep.mubr.msk.bf16.mxu1 %vm175_vm0, %v469_v15 }
  0x2d   :  { %241 = vmatmul.mubr.bf16.gmra.mrb[4].mxu0 %v462_v16  ;;  %273 = vmatmul.mubr.bf16.gmra.mrb[4].mxu1 %v471_v17 }
  0x2e   :  { %422 = vmatprep.mubr.msk.bf16.mxu0 %vm175_vm0, %v466_v18  ;;  %426 = vmatprep.mubr.msk.bf16.mxu1 %vm175_vm0, %v475_v19 }
  0x35   :  { %249 = vmatmul.mubr.bf16.gmra.mrb[8].mxu0 %v468_v20  ;;  %281 = vmatmul.mubr.bf16.gmra.mrb[8].mxu1 %v477_v21 }
  0x36   :  { %423 = vmatprep.mubr.msk.bf16.mxu0 %vm175_vm0, %v472_v22  ;;  %427 = vmatprep.mubr.msk.bf16.mxu1 %vm175_vm0, %v478_v23 }
  0x3d   :  { %257 = vmatmul.mubr.bf16.gmra.mrb[12].mxu0 %v474_v24  ;;  %289 = vmatmul.mubr.bf16.gmra.mrb[12].mxu1 %v480_v25 }
  0xf8   :  { %v234_v27 = vpop.f32.mrb[0].mxu0  ;;  %v597_v28 = vpop.f32.mrb[0].mxu1 }
  0xf9   :  { %297 = vst [vmem:[%s673_s2] sm:$0xff] %v234_v27  ;;  %v236_v29 = vpop.f32.mrb[1].mxu0  ;;  %305 = vst [vmem:[%s673_s2 + $0x40] sm:$0xff] %v597_v28  ;;  %v268_v30 = vpop.f32.mrb[1].mxu1  ;;  %v344_v33 = vmul.f32 %v234_v27, %v234_v27  ;;  %v352_v16 = vmul.f32 %v597_v28, %v597_v28 }
  0xfa   :  { %v237_v31 = vpop.f32.mrb[2].mxu0  ;;  %v606_v32 = vpop.f32.mrb[2].mxu1 }
  0xfb   :  { %298 = vst [vmem:[%s673_s2 + $0x8] sm:$0xff] %v237_v31  ;;  %v320_v34 = vadd.f32 %v237_v31, %v234_v27  ;;  %v345_v35 = vmul.f32 %v237_v31, %v237_v31  ;;  %v239_v36 = vpop.f32.mrb[3].mxu0  ;;  %306 = vst [vmem:[%s673_s2 + $0x48] sm:$0xff] %v606_v32  ;;  %v271_v37 = vpop.f32.mrb[3].mxu1  ;;  %v353_v19 = vmul.f32 %v606_v32, %v606_v32 }
  0xfd   :  { %v360_v38 = vadd.f32 %v345_v35, %v344_v33 }
 0x100   :  { %v242_v39 = vpop.f32.mrb[4].mxu0  ;;  %v274_v40 = vpop.f32.mrb[4].mxu1 }
 0x101   :  { %299 = vst [vmem:[%s673_s2 + $0x10] sm:$0xff] %v242_v39  ;;  %v321_v41 = vadd.f32 %v320_v34, %v242_v39  ;;  %v346_v42 = vmul.f32 %v242_v39, %v242_v39  ;;  %v244_v43 = vpop.f32.mrb[5].mxu0  ;;  %307 = vst [vmem:[%s673_s2 + $0x50] sm:$0xff] %v274_v40  ;;  %v276_v44 = vpop.f32.mrb[5].mxu1  ;;  %v354_v22 = vmul.f32 %v274_v40, %v274_v40 }
 0x102   :  { %v245_v45 = vpop.f32.mrb[6].mxu0  ;;  %v277_v46 = vpop.f32.mrb[6].mxu1 }
 0x103   :  { %v361_v47 = vadd.f32 %v360_v38, %v346_v42  ;;  %300 = vst [vmem:[%s673_s2 + $0x18] sm:$0xff] %v245_v45  ;;  %v322_v48 = vadd.f32 %v321_v41, %v245_v45  ;;  %v347_v49 = vmul.f32 %v245_v45, %v245_v45  ;;  %v247_v50 = vpop.f32.mrb[7].mxu0  ;;  %308 = vst [vmem:[%s673_s2 + $0x58] sm:$0xff] %v277_v46  ;;  %v279_v51 = vpop.f32.mrb[7].mxu1 }
 0x104   :  { %v355_v25 = vmul.f32 %v277_v46, %v277_v46  ;;  %v319_v50 = vld [vmem:[%s671_s3] sm:$0x1] }
 0x105   :  { %v362_v52 = vadd.f32 %v361_v47, %v347_v49 }
 0x108   :  { %v250_v53 = vpop.f32.mrb[8].mxu0  ;;  %v282_v54 = vpop.f32.mrb[8].mxu1 }
 0x109   :  { %301 = vst [vmem:[%s673_s2 + $0x20] sm:$0xff] %v250_v53  ;;  %v323_v55 = vadd.f32 %v322_v48, %v250_v53  ;;  %v348_v56 = vmul.f32 %v250_v53, %v250_v53  ;;  %v252_v57 = vpop.f32.mrb[9].mxu0  ;;  %309 = vst [vmem:[%s673_s2 + $0x60] sm:$0xff] %v282_v54  ;;  %v284_v58 = vpop.f32.mrb[9].mxu1  ;;  %v356_v30 = vmul.f32 %v282_v54, %v282_v54  ;;  %v343_v53 = vld [vmem:[%s672_s4] sm:$0x1] }
 0x10a   :  { %v253_v59 = vpop.f32.mrb[10].mxu0  ;;  %v285_v60 = vpop.f32.mrb[10].mxu1 }
 0x10b   :  { %v363_v61 = vadd.f32 %v362_v52, %v348_v56  ;;  %302 = vst [vmem:[%s673_s2 + $0x28] sm:$0xff] %v253_v59  ;;  %v324_v62 = vadd.f32 %v323_v55, %v253_v59  ;;  %v349_v63 = vmul.f32 %v253_v59, %v253_v59  ;;  %v255_v0 = vpop.f32.mrb[11].mxu0  ;;  %310 = vst [vmem:[%s673_s2 + $0x68] sm:$0xff] %v285_v60  ;;  %v287_v1 = vpop.f32.mrb[11].mxu1 }
 0x10c   :  { %v357_v35 = vmul.f32 %v285_v60, %v285_v60 }
 0x10d   :  { %v364_v2 = vadd.f32 %v363_v61, %v349_v63 }
 0x110   :  { %v258_v3 = vpop.f32.mrb[12].mxu0  ;;  %v290_v4 = vpop.f32.mrb[12].mxu1 }
 0x111   :  { %303 = vst [vmem:[%s673_s2 + $0x30] sm:$0xff] %v258_v3  ;;  %v325_v5 = vadd.f32 %v324_v62, %v258_v3  ;;  %v350_v6 = vmul.f32 %v258_v3, %v258_v3  ;;  %v260_v7 = vpop.f32.mrb[13].mxu0  ;;  %311 = vst [vmem:[%s673_s2 + $0x70] sm:$0xff] %v290_v4  ;;  %v292_v8 = vpop.f32.mrb[13].mxu1 }
 0x112   :  { %v261_v9 = vpop.f32.mrb[14].mxu0  ;;  %v293_v10 = vpop.f32.mrb[14].mxu1 }
 0x113   :  { %v365_v11 = vadd.f32 %v364_v2, %v350_v6  ;;  %304 = vst [vmem:[%s673_s2 + $0x38] sm:$0xff] %v261_v9  ;;  %v326_v12 = vadd.f32 %v325_v5, %v261_v9  ;;  %v351_v13 = vmul.f32 %v261_v9, %v261_v9  ;;  %v263_v14 = vpop.f32.mrb[15].mxu0  ;;  %312 = vst [vmem:[%s673_s2 + $0x78] sm:$0xff] %v293_v10  ;;  %v295_v15 = vpop.f32.mrb[15].mxu1 }
 0x114   :  { %v359_v41 = vmul.f32 %v293_v10, %v293_v10 }
 0x115   :  { %v327_v17 = vadd.f32 %v326_v12, %v597_v28  ;;  %v366_v18 = vadd.f32 %v365_v11, %v351_v13  ;;  %v358_v28 = vmul.f32 %v290_v4, %v290_v4 }
 0x117   :  { %v328_v20 = vadd.f32 %v327_v17, %v606_v32  ;;  %v367_v21 = vadd.f32 %v366_v18, %v352_v16 }
 0x119   :  { %v368_v23 = vadd.f32 %v367_v21, %v353_v19  ;;  %v329_v24 = vadd.f32 %v328_v20, %v274_v40 }
 0x11b   :  { %v330_v26 = vadd.f32 %v329_v24, %v277_v46  ;;  %v369_v27 = vadd.f32 %v368_v23, %v354_v22 }
 0x11d   :  { %v331_v29 = vadd.f32 %v330_v26, %v282_v54  ;;  %v370_v31 = vadd.f32 %v369_v27, %v355_v25 }
 0x11f   :  { %v371_v33 = vadd.f32 %v370_v31, %v356_v30  ;;  %v332_v34 = vadd.f32 %v331_v29, %v285_v60 }
 0x121   :  { %v372_v36 = vadd.f32 %v371_v33, %v357_v35  ;;  %v333_v37 = vadd.f32 %v332_v34, %v290_v4 }
 0x123   :  { %v373_v38 = vadd.f32 %v372_v36, %v358_v28  ;;  %v334_v39 = vadd.f32 %v333_v37, %v293_v10 }
 0x125   :  { %v335_v32 = vrot.slane %v334_v39, 4  ;;  %v374_v42 = vadd.f32 %v373_v38, %v359_v41 }
 0x127   :  { %v336_v43 = vadd.f32 %v335_v32, %v334_v39  ;;  %v375_v44 = vrot.slane %v374_v42, 4 }
 0x129   :  { %v337_v40 = vrot.slane %v336_v43, 2  ;;  %v376_v45 = vadd.f32 %v375_v44, %v374_v42 }
 0x12b   :  { %v338_v46 = vadd.f32 %v337_v40, %v336_v43  ;;  %v377_v47 = vrot.slane %v376_v45, 2 }
 0x12d   :  { %v339_v48 = vrot.slane %v338_v46, 1  ;;  %v378_v49 = vadd.f32 %v377_v47, %v376_v45 }
 0x12f   :  { %v340_v51 = vadd.f32 %v339_v48, %v338_v46  ;;  %v379_v52 = vrot.slane %v378_v49, 1 }
 0x131   :  { %v341_v54 = vadd.f32 %v340_v51, %v319_v50  ;;  %v380_v55 = vadd.f32 %v379_v52, %v378_v49 }
 0x133   :  { %342 = vst [vmem:[%s671_s3] sm:$0x1] %v341_v54  ;;  %v381_v56 = vadd.f32 %v380_v55, %v343_v53 }
 0x135   :  { %382 = vst [vmem:[%s672_s4] sm:$0x1] %v381_v56 }

// kernel: image_classify.15
= control target key start
LH: loop header
LB: loop body
LE: loop exit
PB: predicated region body
PF: predicated region fallthrough
CT: control target
= control target key end

     0   :  { %vm197_vm0 = vcmask 261120   ;;  %v445_v24 = vmov 0.0   ;;  %s573_s1 = inlined_call_operand.vmem [shape: bf16[288,128], index: 1, kind: input, shape index: {}]   ;;  %s574_s0 = inlined_call_operand.vmem [shape: bf16[32,288], index: 0, kind: input, shape index: {}]   ;;  %s575_s3 = inlined_call_operand.vmem [shape: f32[1,128], index: 3, kind: output, shape index: {1}]   ;;  %s576_s4 = inlined_call_operand.vmem [shape: f32[1,128], index: 4, kind: output, shape index: {2}]   ;;  %s577_s2 = inlined_call_operand.vmem [shape: f32[32,128], index: 2, kind: output, shape index: {0}]  }
   0x1   :  { %v419_v0 = vld [vmem:[%s573_s1 + $0x40] sm:$0xff]   ;;  %v421_v2 = vld [vmem:[%s573_s1 + $0x48] sm:$0xff]   ;;  %v423_v4 = vld [vmem:[%s573_s1 + $0x50] sm:$0xff]   ;;  %310 = vst [vmem:[%s575_s3] sm:$0x1] %v445_v24 }
   0x2   :  { %v420_v1 = vld [vmem:[%s573_s1] sm:$0xff]   ;;  %378 = vmatprep.subr.bf16.mxu0 %v419_v0  ;;  %v422_v3 = vld [vmem:[%s573_s1 + $0x8] sm:$0xff]   ;;  %v424_v5 = vld [vmem:[%s573_s1 + $0x10] sm:$0xff]   ;;  %311 = vst [vmem:[%s576_s4] sm:$0x1] %v445_v24 }
   0x3   :  { %379 = vmatpush3.bf16.msra.mxu0 %v420_v1  ;;  %v425_v6 = vld [vmem:[%s573_s1 + $0x58] sm:$0xff]   ;;  %v427_v8 = vld [vmem:[%s573_s1 + $0x60] sm:$0xff]   ;;  %v429_v11 = vld [vmem:[%s573_s1 + $0x68] sm:$0xff]  }
   0x4   :  { %380 = vmatprep.subr.bf16.mxu0 %v421_v2  ;;  %v426_v7 = vld [vmem:[%s573_s1 + $0x18] sm:$0xff]   ;;  %v433_v9 = vld [vmem:[%s573_s1 + $0x80] sm:$0xff]   ;;  %v430_v12 = vld [vmem:[%s573_s1 + $0x28] sm:$0xff]  }
   0x5   :  { %v428_v10 = vld [vmem:[%s573_s1 + $0x20] sm:$0xff]   ;;  %410 = vmatprep.subr.bf16.mxu1 %v433_v9  ;;  %v436_v13 = vld [vmem:[%s573_s1 + $0x88] sm:$0xff]   ;;  %v431_v14 = vld [vmem:[%s573_s1 + $0x70] sm:$0xff]  }
   0x6   :  { %411 = vmatpush3.bf16.msra.mxu1 %v433_v9  ;;  %v439_v15 = vld [vmem:[%s574_s0 + $0x4] ss:$12 sps:$4 sm:$0xff]   ;;  %v440_v16 = vld [vmem:[%s574_s0 + $0x8] ss:$12 sps:$4 sm:$0xff]   ;;  %v441_v17 = vld [vmem:[%s574_s0 + $0x20] ss:$12 sps:$4 sm:$0xff]  }
   0x7   :  { %381 = vmatpush3.bf16.msra.mxu0 %v422_v3  ;;  %412 = vmatprep.subr.bf16.mxu1 %v436_v13  ;;  %v432_v18 = vld [vmem:[%s573_s1 + $0x30] sm:$0xff]   ;;  %v434_v19 = vld [vmem:[%s573_s1 + $0x78] sm:$0xff]   ;;  %v437_v21 = vld [vmem:[%s574_s0] ss:$12 sps:$4 sm:$0xff]  }
   0x8   :  { %382 = vmatprep.subr.bf16.mxu0 %v423_v4  ;;  %236 = vmatprep.mubr.bf16.mxu0 %v439_v15  ;;  %v435_v20 = vld [vmem:[%s573_s1 + $0x38] sm:$0xff]   ;;  %v312_v0 = vld [vmem:[%s575_s3] sm:$0x1] }
   0x9   :  { %414 = vmatprep.mubr.msk.bf16.mxu1 %vm197_vm0, %v440_v16  ;;  %v442_v22 = vld [vmem:[%s574_s0 + $0x1c] ss:$12 sps:$4 sm:$0xff]   ;;  %v444_v23 = vld [vmem:[%s574_s0 + $0x18] ss:$12 sps:$4 sm:$0xff]   ;;  %v324_v3 = vld [vmem:[%s576_s4] sm:$0x1] }
   0xa   :  { %413 = vmatpush3.bf16.msra.mxu1 %v436_v13 }
   0xb   :  { %383 = vmatpush3.bf16.msra.mxu0 %v424_v5 }
   0xc   :  { %384 = vmatprep.subr.bf16.mxu0 %v425_v6 }
   0xd   :  { %415 = vmatmul.mubr.msk.bf16.vlgmr.msra.gmra.mrb[0].mxu1 %vm197_vm0, %v441_v17 }
   0xf   :  { %385 = vmatpush3.bf16.msra.mxu0 %v426_v7 }
  0x10   :  { %386 = vmatprep.subr.bf16.mxu0 %v427_v8 }
  0x13   :  { %387 = vmatpush3.bf16.msra.mxu0 %v428_v10 }
  0x14   :  { %388 = vmatprep.subr.bf16.mxu0 %v429_v11 }
  0x17   :  { %389 = vmatpush3.bf16.msra.mxu0 %v430_v12 }
  0x18   :  { %390 = vmatprep.subr.bf16.mxu0 %v431_v14 }
  0x1b   :  { %391 = vmatpush3.bf16.msra.mxu0 %v432_v18 }
  0x1c   :  { %392 = vmatprep.subr.bf16.mxu0 %v434_v19 }
  0x1f   :  { %393 = vmatpush3.bf16.msra.mxu0 %v435_v20 }
  0x22   :  { %237 = vmatmul.mubr.bf16.vlgmr.msra.gmra.mrb[0].mxu0 %v437_v21 }
  0x23   :  { %244 = vmatprep.mubr.bf16.mxu0 %v442_v22 }
  0x2a   :  { %245 = vmatmul.mubr.bf16.gmra.mrb[4].mxu0 %v444_v23 }
  0xe0   :  { %v416_v25 = vpop.f32.mrb[0].mxu1 }
  0xe1   :  { %v287_v26 = vpop.f32.mrb[1].mxu1 }
  0xe2   :  { %v417_v27 = vpop.f32.mrb[2].mxu1 }
  0xe3   :  { %v290_v28 = vpop.f32.mrb[3].mxu1 }
  0xf5   :  { %v394_v29 = vpop.f32.mrb[0].mxu0 }
  0xf6   :  { %v395_v30 = vpop.f32.mrb[1].mxu0 }
  0xf7   :  { %v396_v31 = vadd.f32 %v395_v30, %v394_v29  ;;  %v397_v32 = vpop.f32.mrb[2].mxu0 }
  0xf8   :  { %v398_v33 = vpop.f32.mrb[3].mxu0 }
  0xf9   :  { %v399_v34 = vadd.f32 %v398_v33, %v397_v32  ;;  %v288_v35 = vadd.f32 %v396_v31, %v287_v26 }
  0xfb   :  { %302 = vst [vmem:[%s577_s2] sm:$0xff] %v288_v35  ;;  %v291_v36 = vadd.f32 %v399_v34, %v290_v28  ;;  %v325_v37 = vmul.f32 %v288_v35, %v288_v35 }
  0xfd   :  { %303 = vst [vmem:[%s577_s2 + $0x8] sm:$0xff] %v291_v36  ;;  %v313_v38 = vadd.f32 %v291_v36, %v288_v35  ;;  %v326_v39 = vmul.f32 %v291_v36, %v291_v36  ;;  %v400_v40 = vpop.f32.mrb[4].mxu0 }
  0xfe   :  { %v401_v41 = vpop.f32.mrb[5].mxu0 }
  0xff   :  { %v329_v42 = vadd.f32 %v326_v39, %v325_v37  ;;  %v402_v43 = vadd.f32 %v401_v41, %v400_v40  ;;  %v403_v44 = vpop.f32.mrb[6].mxu0 }
 0x100   :  { %v404_v45 = vpop.f32.mrb[7].mxu0 }
 0x101   :  { %v296_v46 = vadd.f32 %v416_v25, %v402_v43  ;;  %v405_v47 = vadd.f32 %v404_v45, %v403_v44 }
 0x103   :  { %304 = vst [vmem:[%s577_s2 + $0x10] sm:$0xff] %v296_v46  ;;  %v314_v48 = vadd.f32 %v313_v38, %v296_v46  ;;  %v327_v49 = vmul.f32 %v296_v46, %v296_v46  ;;  %v299_v50 = vadd.f32 %v417_v27, %v405_v47 }
 0x105   :  { %v330_v51 = vadd.f32 %v329_v42, %v327_v49  ;;  %305 = vst [vmem:[%s577_s2 + $0x18] sm:$0xff] %v299_v50  ;;  %v315_v52 = vadd.f32 %v314_v48, %v299_v50  ;;  %v328_v53 = vmul.f32 %v299_v50, %v299_v50 }
 0x107   :  { %v316_v54 = vrot.slane %v315_v52, 4  ;;  %v331_v55 = vadd.f32 %v330_v51, %v328_v53 }
 0x109   :  { %v317_v56 = vadd.f32 %v316_v54, %v315_v52  ;;  %v332_v57 = vrot.slane %v331_v55, 4 }
 0x10b   :  { %v318_v58 = vrot.slane %v317_v56, 2  ;;  %v333_v59 = vadd.f32 %v332_v57, %v331_v55 }
 0x10d   :  { %v319_v60 = vadd.f32 %v318_v58, %v317_v56  ;;  %v334_v61 = vrot.slane %v333_v59, 2 }
 0x10f   :  { %v320_v62 = vrot.slane %v319_v60, 1  ;;  %v335_v63 = vadd.f32 %v334_v61, %v333_v59 }
 0x111   :  { %v321_v1 = vadd.f32 %v320_v62, %v319_v60  ;;  %v336_v2 = vrot.slane %v335_v63, 1 }
 0x113   :  { %v322_v4 = vadd.f32 %v321_v1, %v312_v0  ;;  %v337_v5 = vadd.f32 %v336_v2, %v335_v63 }
 0x115   :  { %323 = vst [vmem:[%s575_s3] sm:$0x1] %v322_v4  ;;  %v338_v6 = vadd.f32 %v337_v5, %v324_v3 }
 0x117   :  { %339 = vst [vmem:[%s576_s4] sm:$0x1] %v338_v6 }

// kernel: image_classify.16
= control target key start
LH: loop header
LB: loop body
LE: loop exit
PB: predicated region body
PF: predicated region fallthrough
CT: control target
= control target key end

     0   :  { %s104_s0 = inlined_call_operand.vmem [shape: f32[32,128], index: 0, kind: input, shape index: {}]   ;;  %s105_s1 = inlined_call_operand.vmem [shape: f32[1,128], index: 1, kind: input, shape index: {}]   ;;  %s106_s2 = inlined_call_operand.vmem [shape: f32[1,128], index: 2, kind: input, shape index: {}]   ;;  %s107_s3 = inlined_call_operand.vmem [shape: f32[32,128], index: 3, kind: output, shape index: {}]  }
   0x1   :  { %v14_v0 = vld [vmem:[%s104_s0] sm:$0xff]  ;;  %v15_v4 = vld [vmem:[%s104_s0 + $0x8] sm:$0xff]  ;;  %v16_v5 = vld [vmem:[%s104_s0 + $0x10] sm:$0xff] }
   0x2   :  { %v52_v1 = vld [vmem:[%s105_s1] ss:$0 sm:$0xff]  ;;  %v17_v6 = vld [vmem:[%s104_s0 + $0x18] sm:$0xff] }
   0x3   :  { %v53_v2 = vld [vmem:[%s106_s2] ss:$0 sm:$0xff]  ;;  %v25_v3 = vmul.f32 %v52_v1, %v14_v0  ;;  %v26_v7 = vmul.f32 %v52_v1, %v15_v4  ;;  %v27_v8 = vmul.f32 %v52_v1, %v16_v5  ;;  %v28_v9 = vmul.f32 %v52_v1, %v17_v6 }
   0x5   :  { %v36_v10 = vadd.f32 %v53_v2, %v25_v3  ;;  %v37_v11 = vadd.f32 %v53_v2, %v26_v7  ;;  %v38_v12 = vadd.f32 %v53_v2, %v27_v8  ;;  %v39_v13 = vadd.f32 %v53_v2, %v28_v9 }
   0x7   :  { %v40_v14 = vmax.f32 %v36_v10, 0.0  ;;  %v41_v15 = vmax.f32 %v37_v11, 0.0  ;;  %v42_v16 = vmax.f32 %v38_v12, 0.0  ;;  %v43_v17 = vmax.f32 %v39_v13, 0.0 }
   0x9   :  { %44 = vst [vmem:[%s107_s3] sm:$0xff] %v40_v14  ;;  %45 = vst [vmem:[%s107_s3 + $0x8] sm:$0xff] %v41_v15 }
   0xa   :  { %46 = vst [vmem:[%s107_s3 + $0x10] sm:$0xff] %v42_v16  ;;  %47 = vst [vmem:[%s107_s3 + $0x18] sm:$0xff] %v43_v17 }

// kernel: image_classify.18
= control target key start
LH: loop header
LB: loop body
LE: loop exit
PB: predicated region body
PF: predicated region fallthrough
CT: control target
= control target key end

     0   :  { %s71_s0 = inlined_call_operand.vmem [shape: f32[8,128], index: 0, kind: input, shape index: {}]   ;;  %s72_s1 = inlined_call_operand.vmem [shape: f32[1,128], index: 1, kind: input, shape index: {}]   ;;  %s73_s2 = inlined_call_operand.vmem [shape: f32[1,128], index: 2, kind: input, shape index: {}]   ;;  %s74_s3 = inlined_call_operand.vmem [shape: f32[8,128], index: 3, kind: output, shape index: {}]  }
   0x1   :  { %v14_v0 = vld [vmem:[%s71_s0] sm:$0xff] }
   0x2   :  { %v37_v1 = vld [vmem:[%s72_s1] ss:$0 sm:$0xff] }
   0x3   :  { %v38_v2 = vld [vmem:[%s73_s2] ss:$0 sm:$0xff]  ;;  %v22_v3 = vmul.f32 %v37_v1, %v14_v0 }
   0x5   :  { %v30_v4 = vadd.f32 %v38_v2, %v22_v3 }
   0x7   :  { %v31_v5 = vmax.f32 %v30_v4, 0.0 }
   0x9   :  { %32 = vst [vmem:[%s74_s3] sm:$0xff] %v31_v5 }

// kernel: image_classify.17
= control target key start
LH: loop header
LB: loop body
LE: loop exit
PB: predicated region body
PF: predicated region fallthrough
CT: control target
= control target key end

     0   :  { %v631_v36 = vmov 0.0   ;;  %vm632_vm0 = vmmov 0   ;;  %vm323_vm1 = vcmask 523264   ;;  %s796_s1 = inlined_call_operand.vmem [shape: bf16[576,128], index: 1, kind: input, shape index: {}]   ;;  %s797_s0 = inlined_call_operand.vmem [shape: bf16[8,576], index: 0, kind: input, shape index: {}]   ;;  %s798_s3 = inlined_call_operand.vmem [shape: f32[1,128], index: 3, kind: output, shape index: {1}]   ;;  %s799_s4 = inlined_call_operand.vmem [shape: f32[1,128], index: 4, kind: output, shape index: {2}]   ;;  %s800_s2 = inlined_call_operand.vmem [shape: f32[8,128], index: 2, kind: output, shape index: {0}]  }
   0x1   :  { %v590_v0 = vld [vmem:[%s796_s1 + $0x40] sm:$0xff]   ;;  %v594_v4 = vld [vmem:[%s796_s1 + $0x48] sm:$0xff]   ;;  %v598_v8 = vld [vmem:[%s796_s1 + $0x50] sm:$0xff]   ;;  %452 = vst [vmem:[%s798_s3] sm:$0x1] %v631_v36 }
   0x2   :  { %v591_v1 = vld [vmem:[%s796_s1 + $0xc0] sm:$0xff]   ;;  %527 = vmatprep.subr.bf16.mxu0 %v590_v0  ;;  %v595_v5 = vld [vmem:[%s796_s1 + $0xc8] sm:$0xff]   ;;  %v599_v9 = vld [vmem:[%s796_s1 + $0xd0] sm:$0xff]   ;;  %453 = vst [vmem:[%s799_s4] sm:$0x1] %v631_v36 }
   0x3   :  { %v592_v2 = vld [vmem:[%s796_s1] sm:$0xff]   ;;  %549 = vmatprep.subr.bf16.mxu1 %v591_v1  ;;  %v596_v6 = vld [vmem:[%s796_s1 + $0x8] sm:$0xff]   ;;  %v600_v10 = vld [vmem:[%s796_s1 + $0x10] sm:$0xff]  }
   0x4   :  { %v593_v3 = vld [vmem:[%s796_s1 + $0x80] sm:$0xff]   ;;  %528 = vmatpush3.bf16.msra.mxu0 %v592_v2  ;;  %v597_v7 = vld [vmem:[%s796_s1 + $0x88] sm:$0xff]   ;;  %v601_v11 = vld [vmem:[%s796_s1 + $0x90] sm:$0xff]  }
   0x5   :  { %550 = vmatpush3.bf16.msra.mxu1 %v593_v3  ;;  %529 = vmatprep.subr.bf16.mxu0 %v594_v4  ;;  %v602_v12 = vld [vmem:[%s796_s1 + $0x58] sm:$0xff]   ;;  %v606_v16 = vld [vmem:[%s796_s1 + $0x60] sm:$0xff]   ;;  %v610_v20 = vld [vmem:[%s796_s1 + $0x68] sm:$0xff]  }
   0x6   :  { %551 = vmatprep.subr.bf16.mxu1 %v595_v5  ;;  %v603_v13 = vld [vmem:[%s796_s1 + $0xd8] sm:$0xff]   ;;  %v607_v17 = vld [vmem:[%s796_s1 + $0xe0] sm:$0xff]   ;;  %v611_v21 = vld [vmem:[%s796_s1 + $0xe8] sm:$0xff]  }
   0x7   :  { %v604_v14 = vld [vmem:[%s796_s1 + $0x18] sm:$0xff]   ;;  %v608_v18 = vld [vmem:[%s796_s1 + $0x20] sm:$0xff]   ;;  %v612_v22 = vld [vmem:[%s796_s1 + $0x28] sm:$0xff]  }
   0x8   :  { %530 = vmatpush3.bf16.msra.mxu0 %v596_v6  ;;  %v605_v15 = vld [vmem:[%s796_s1 + $0x98] sm:$0xff]   ;;  %v609_v19 = vld [vmem:[%s796_s1 + $0xa0] sm:$0xff]   ;;  %v613_v23 = vld [vmem:[%s796_s1 + $0xa8] sm:$0xff]  }
   0x9   :  { %552 = vmatpush3.bf16.msra.mxu1 %v597_v7  ;;  %531 = vmatprep.subr.bf16.mxu0 %v598_v8  ;;  %v614_v24 = vld [vmem:[%s796_s1 + $0x70] sm:$0xff]   ;;  %v618_v28 = vld [vmem:[%s796_s1 + $0x78] sm:$0xff]   ;;  %v15_v32 = vld [vmem:[%s797_s0] sm:$0xff] }
   0xa   :  { %553 = vmatprep.subr.bf16.mxu1 %v599_v9  ;;  %v615_v25 = vld [vmem:[%s796_s1 + $0xf0] sm:$0xff]   ;;  %v619_v29 = vld [vmem:[%s796_s1 + $0xf8] sm:$0xff]   ;;  %v485_v33 = vcombine.low %v15_v32, %v15_v32  ;;  %v486_v34 = vcombine.high %v15_v32, %v15_v32  ;;  %v16_v35 = vld [vmem:[%s797_s0 + $0x8] sm:$0xff] }
   0xb   :  { %v616_v26 = vld [vmem:[%s796_s1 + $0x30] sm:$0xff]   ;;  %v620_v30 = vld [vmem:[%s796_s1 + $0x38] sm:$0xff]   ;;  %v487_v37 = vcombine.low %v16_v35, %v16_v35  ;;  %v488_v38 = vcombine.high %v16_v35, %v16_v35  ;;  %v627_v39 = vld [vmem:[%s796_s1 + $0x100] sm:$0xff]  }
   0xc   :  { %532 = vmatpush3.bf16.msra.mxu0 %v600_v10  ;;  %v617_v27 = vld [vmem:[%s796_s1 + $0xb0] sm:$0xff]   ;;  %v621_v31 = vld [vmem:[%s796_s1 + $0xb8] sm:$0xff]   ;;  %359 = vmatprep.mubr.bf16.mxu0 %v486_v34  ;;  %v628_v40 = vld [vmem:[%s796_s1 + $0x108] sm:$0xff]  }
   0xd   :  { %554 = vmatpush3.bf16.msra.mxu1 %v601_v11  ;;  %533 = vmatprep.subr.bf16.mxu0 %v602_v12  ;;  %v629_v41 = vld [vmem:[%s796_s1 + $0x110] sm:$0xff]   ;;  %v630_v42 = vld [vmem:[%s796_s1 + $0x118] sm:$0xff]   ;;  %v454_v6 = vld [vmem:[%s798_s3] sm:$0x1] }
   0xe   :  { %555 = vmatprep.subr.bf16.mxu1 %v603_v13  ;;  %399 = vmatprep.mubr.bf16.mxu1 %v488_v38  ;;  %v624_v43 = vld [vmem:[%s797_s0 + $0x10] ss:$0 sps:$4 sm:$0xff]   ;;  %v463_v9 = vld [vmem:[%s799_s4] sm:$0x1] }
  0x10   :  { %534 = vmatpush3.bf16.msra.mxu0 %v604_v14 }
  0x11   :  { %556 = vmatpush3.bf16.msra.mxu1 %v605_v15  ;;  %535 = vmatprep.subr.bf16.mxu0 %v606_v16 }
  0x12   :  { %557 = vmatprep.subr.bf16.mxu1 %v607_v17 }
  0x14   :  { %536 = vmatpush3.bf16.msra.mxu0 %v608_v18 }
  0x15   :  { %558 = vmatpush3.bf16.msra.mxu1 %v609_v19  ;;  %537 = vmatprep.subr.bf16.mxu0 %v610_v20 }
  0x16   :  { %559 = vmatprep.subr.bf16.mxu1 %v611_v21 }
  0x18   :  { %538 = vmatpush3.bf16.msra.mxu0 %v612_v22 }
  0x19   :  { %560 = vmatpush3.bf16.msra.mxu1 %v613_v23  ;;  %539 = vmatprep.subr.bf16.mxu0 %v614_v24 }
  0x1a   :  { %561 = vmatprep.subr.bf16.mxu1 %v615_v25 }
  0x1c   :  { %540 = vmatpush3.bf16.msra.mxu0 %v616_v26 }
  0x1d   :  { %562 = vmatpush3.bf16.msra.mxu1 %v617_v27  ;;  %541 = vmatprep.subr.bf16.mxu0 %v618_v28 }
  0x1e   :  { %563 = vmatprep.subr.bf16.mxu1 %v619_v29 }
  0x20   :  { %542 = vmatpush3.bf16.msra.mxu0 %v620_v30 }
  0x21   :  { %564 = vmatpush3.bf16.msra.mxu1 %v621_v31  ;;  %576 = vmatprep.subr.bf16.mxu0 %v631_v36 }
  0x23   :  { %360 = vmatmul.mubr.bf16.vlgmr.msra.gmra.mrb[0].mxu0 %v485_v33 }
  0x24   :  { %400 = vmatmul.mubr.bf16.vlgmr.msra.gmra.mrb[0].mxu1 %v487_v37  ;;  %577 = vmatpush3.bf16.msra.mxu0 %v627_v39 }
  0x25   :  { %578 = vmatprep.subr.bf16.mxu0 %v631_v36  ;;  %584 = vmatprep.mubr.msk.bf16.mxu0 %vm632_vm0, %v631_v36 }
  0x28   :  { %579 = vmatpush3.bf16.msra.mxu0 %v628_v40 }
  0x29   :  { %580 = vmatprep.subr.bf16.mxu0 %v631_v36 }
  0x2c   :  { %581 = vmatpush3.bf16.msra.mxu0 %v629_v41 }
  0x2d   :  { %582 = vmatprep.subr.bf16.mxu0 %v631_v36 }
  0x30   :  { %583 = vmatpush3.bf16.msra.mxu0 %v630_v42 }
  0x33   :  { %585 = vmatmul.mubr.msk.bf16.vlgmr.msra.gmra.mrb[4].mxu0 %vm323_vm1, %v624_v43 }
  0xf6   :  { %v543_v44 = vpop.f32.mrb[0].mxu0 }
  0xf7   :  { %v565_v45 = vpop.f32.mrb[0].mxu1  ;;  %v544_v46 = vpop.f32.mrb[1].mxu0 }
  0xf8   :  { %v545_v47 = vadd.f32 %v544_v46, %v543_v44  ;;  %v566_v48 = vpop.f32.mrb[1].mxu1  ;;  %v546_v49 = vpop.f32.mrb[2].mxu0 }
  0xf9   :  { %v567_v50 = vadd.f32 %v566_v48, %v565_v45  ;;  %v547_v51 = vpop.f32.mrb[3].mxu0  ;;  %v568_v52 = vpop.f32.mrb[2].mxu1 }
  0xfa   :  { %v569_v53 = vpop.f32.mrb[3].mxu1 }
  0xfb   :  { %v402_v54 = vadd.f32 %v567_v50, %v545_v47 }
 0x106   :  { %v441_v55 = vpop.f32.mrb[4].mxu0 }
 0x107   :  { %v442_v56 = vadd.f32 %v441_v55, %v402_v54  ;;  %v586_v57 = vpop.f32.mrb[5].mxu0 }
 0x108   :  { %v444_v58 = vpop.f32.mrb[6].mxu0 }
 0x109   :  { %447 = vst [vmem:[%s800_s2] sm:$0xff] %v442_v56  ;;  %v455_v59 = vrot.slane %v442_v56, 4  ;;  %v464_v60 = vmul.f32 %v442_v56, %v442_v56  ;;  %v587_v61 = vpop.f32.mrb[7].mxu0 }
 0x10b   :  { %v456_v62 = vadd.f32 %v455_v59, %v442_v56  ;;  %v465_v63 = vrot.slane %v464_v60, 4 }
 0x10d   :  { %v457_v0 = vrot.slane %v456_v62, 2  ;;  %v466_v1 = vadd.f32 %v465_v63, %v464_v60 }
 0x10f   :  { %v458_v2 = vadd.f32 %v457_v0, %v456_v62  ;;  %v467_v3 = vrot.slane %v466_v1, 2 }
 0x111   :  { %v459_v4 = vrot.slane %v458_v2, 1  ;;  %v468_v5 = vadd.f32 %v467_v3, %v466_v1 }
 0x113   :  { %v460_v7 = vadd.f32 %v459_v4, %v458_v2  ;;  %v469_v8 = vrot.slane %v468_v5, 1 }
 0x115   :  { %v461_v10 = vadd.f32 %v460_v7, %v454_v6  ;;  %v470_v11 = vadd.f32 %v469_v8, %v468_v5 }
 0x117   :  { %462 = vst [vmem:[%s798_s3] sm:$0x1] %v461_v10  ;;  %v471_v12 = vadd.f32 %v470_v11, %v463_v9 }
 0x119   :  { %472 = vst [vmem:[%s799_s4] sm:$0x1] %v471_v12 }

// kernel: image_classify.20
= control target key start
LH: loop header
LB: loop body
LE: loop exit
PB: predicated region body
PF: predicated region fallthrough
CT: control target
= control target key end

     0   :  { %s429_s12 = smov 0   ;;  %s431_s13 = smov 0   ;;  %s456_s0 = inlined_call_operand.vmem [shape: f32[8,256], index: 0, kind: input, shape index: {}]   ;;  %s457_s1 = inlined_call_operand.vmem [shape: f32[1,256], index: 1, kind: input, shape index: {}]   ;;  %s458_s2 = inlined_call_operand.vmem [shape: f32[1,256], index: 2, kind: input, shape index: {}]   ;;  %s459_s3 = inlined_call_operand.vmem [shape: f32[8,256], index: 3, kind: output, shape index: {}]  }
   0x1   :  { %s433_s14 = smov 0  }
   0x2 LB: > { %s25_s15 = sadd.s32 1, %s403_s13  ;;  %p354_p0 = scmp.ge.s32.totalorder %s407_s14, 1  ;;  %s407_s14 = sphi %s433_s14, %s13_s14   ;;  %s403_s13 = sphi %s431_s13, %s461_s13   ;;  %s399_s12 = sphi %s429_s12, %s460_s12  }
   0x3   : > { %p27_p1 = scmp.ge.s32.totalorder %s25_s15, 2  ;;  %p172_p2 = scmp.lt.s32.totalorder %s407_s14, 3 }
   0x5   : > { %s463_s15 = smov (%p27_p1, %s25_s15), 0  ;;  %p173_p3 = pnand %p354_p0, %p172_p2 }
   0x6   : > { %p210_p4 = scmp.lt.s32.totalorder (!%p173_p3), %s399_s12, 1 }
   0x7   : > { %176 = sbr.rel (%p173_p3) target bundleno = 25 (0x19), region = 32 }
   0xe   : > { %s465_s12 = smov (!%p210_p4, %s399_s12), 1 }
   0xf   : > { %s355_s16 = sshll.u32 %s465_s12, 3  ;;  %s218_s19 = scalar_lea.vmem %s457_s1, %s465_s12 }
  0x10   : > { %s215_s22 = scalar_lea.vmem %s456_s0, %s355_s16  ;;  %s221_s25 = scalar_lea.vmem %s458_s2, %s465_s12  ;;  %v357_v0 = vld [vmem:[%s218_s19] ss:$0 sm:$0xff] }
  0x11   : > { %v230_v1 = vld [vmem:[%s215_s22] sm:$0xff]  ;;  %s229_s28 = scalar_lea.vmem %s459_s3, %s355_s16 }
  0x12   : > { %v358_v2 = vld [vmem:[%s221_s25] ss:$0 sm:$0xff]  ;;  %v238_v3 = vmul.f32 %v357_v0, %v230_v1 }
  0x14   : > { %v246_v4 = vadd.f32 %v358_v2, %v238_v3 }
  0x16   : > { %v247_v5 = vmax.f32 %v246_v4, 0.0 }
  0x18   : > { %248 = vst [vmem:[%s229_s28] sm:$0xff] %v247_v5 }
  0x19 PF: > { %s13_s14 = sadd.s32 1, %s407_s14   ;;  %s460_s12 = smov %s403_s13 }
  0x1a   : > { %p10_p5 = scmp.ge.s32.totalorder %s13_s14, 4   ;;  %s461_s13 = smov %s463_s15 }
  0x1c   :  { %12 = sbr.rel (!%p10_p5) target bundleno = 2 (0x2), region = 68 }

// kernel: image_classify.19
= control target key start
LH: loop header
LB: loop body
LE: loop exit
PB: predicated region body
PF: predicated region fallthrough
CT: control target
= control target key end

     0   :  { %s2257_s15 = smov 0   ;;  %s2259_s16 = smov 0   ;;  %s2749_s0 = inlined_call_operand.vmem [shape: bf16[8,1152], index: 0, kind: input, shape index: {}]   ;;  %s2750_s1 = inlined_call_operand.vmem [shape: bf16[1152,256], index: 1, kind: input, shape index: {}]   ;;  %s2751_s2 = inlined_call_operand.vmem [shape: f32[8,256], index: 2, kind: output, shape index: {0}]   ;;  %s2752_s3 = inlined_call_operand.vmem [shape: f32[1,256], index: 3, kind: output, shape index: {1}]   ;;  %s2753_s4 = inlined_call_operand.vmem [shape: f32[1,256], index: 4, kind: output, shape index: {2}]  }
   0x1   :  { %s2261_s17 = smov 0   ;;  %s2263_s18 = smov 0  }
   0x2   :  { %s2265_s19 = smov 0  }
   0x3 LB: > { %s27_s20 = sadd.s32 1, %s2224_s18  ;;  %p67_p1 = scmp.ne.s32.totalorder %s2216_s16, %s2212_s15  ;;  %s2228_s19 = sphi %s2265_s19, %s15_s19   ;;  %s2224_s18 = sphi %s2263_s18, %s2757_s18   ;;  %s2220_s17 = sphi %s2261_s17, %s2756_s17   ;;  %s2216_s16 = sphi %s2259_s16, %s2755_s16   ;;  %s2212_s15 = sphi %s2257_s15, %s2754_s15  }
   0x4   : > { %p29_p0 = scmp.ge.s32.totalorder %s27_s20, 2  ;;  %p68_p2 = scmp.eq.s32.totalorder %s2228_s19, 0 }
   0x5   : > { %s60_s22 = sadd.s32 1, %s2216_s16  ;;  %p1861_p5 = scmp.ge.s32.totalorder %s2228_s19, 2 }
   0x6   : > { %s2759_s20 = smov (%p29_p0, %s27_s20), 0  ;;  %p69_p3 = por %p68_p2, %p67_p1 }
   0x7   : > { %s57_s21 = ssub.s32 %s2224_s18, %s2759_s20  ;;  %181 = sbr.rel (%p1861_p5) target bundleno = 114 (0x72), region = 20 }
   0x8   : > { %p58_p4 = scmp.eq.s32.totalorder %s57_s21, 0 }
   0xa   : > { %s2292_s23 = scalar_select %p58_p4, %s2216_s16, %s60_s22  }
   0xe   : > { %184 = sbr.rel (!%p69_p3) target bundleno = 114 (0x72), region = 24  ;;  %s186_s24 = sand.u32 (%p69_p3), 1, %s2216_s16  }
   0xf   : > { %s1862_s25 = sshll.u32 (%p69_p3), %s2224_s18, 2  ;;  %s2065_s26 = smul.u32 (%p69_p3), 576, %s186_s24 }
  0x10   : > { %s2300_s29 = scalar_lea.vmem (%p69_p3), %s2750_s1, %s1862_s25 }
  0x11   : > { %v206_v0 = vld [vmem:[%s2300_s29] sm:$0xf] (%p69_p3)  ;;  %v208_v1 = vld [vmem:[%s2300_s29 + $0x8] sm:$0xf] (%p69_p3)  ;;  %v210_v2 = vld [vmem:[%s2300_s29 + $0x10] sm:$0xf] (%p69_p3) }
  0x12   : > { %v212_v3 = vld [vmem:[%s2300_s29 + $0x18] sm:$0xf] (%p69_p3)  ;;  %v214_v4 = vld [vmem:[%s2300_s29 + $0x20] sm:$0xf] (%p69_p3)  ;;  %s2307_s30 = scalar_lea.vmem (%p69_p3), [#allocation2], %s2065_s26 }
  0x13   : > { %207 = vst [vmem:[%s2307_s30] sm:$0xf] (%p69_p3), %v206_v0  ;;  %209 = vst [vmem:[%s2307_s30 + $0x4] sm:$0xf] (%p69_p3), %v208_v1  ;;  %v216_v5 = vld [vmem:[%s2300_s29 + $0x28] sm:$0xf] (%p69_p3) }
  0x14   : > { %211 = vst [vmem:[%s2307_s30 + $0x8] sm:$0xf] (%p69_p3), %v210_v2  ;;  %213 = vst [vmem:[%s2307_s30 + $0xc] sm:$0xf] (%p69_p3), %v212_v3  ;;  %v218_v6 = vld [vmem:[%s2300_s29 + $0x30] sm:$0xf] (%p69_p3) }
  0x15   : > { %215 = vst [vmem:[%s2307_s30 + $0x10] sm:$0xf] %v214_v4  ;;  %v220_v7 = vld [vmem:[%s2300_s29 + $0x38] sm:$0xf]  ;;  %217 = vst [vmem:[%s2307_s30 + $0x14] sm:$0xf] %v216_v5 }
  0x16   : > { %219 = vst [vmem:[%s2307_s30 + $0x18] sm:$0xf] %v218_v6  ;;  %221 = vst [vmem:[%s2307_s30 + $0x1c] sm:$0xf] %v220_v7  ;;  %v222_v8 = vld [vmem:[%s2300_s29 + $0x40] sm:$0xf] }
  0x17   : > { %v224_v9 = vld [vmem:[%s2300_s29 + $0x48] sm:$0xf]  ;;  %v226_v10 = vld [vmem:[%s2300_s29 + $0x50] sm:$0xf]  ;;  %223 = vst [vmem:[%s2307_s30 + $0x20] sm:$0xf] %v222_v8 }
  0x18   : > { %225 = vst [vmem:[%s2307_s30 + $0x24] sm:$0xf] %v224_v9  ;;  %227 = vst [vmem:[%s2307_s30 + $0x28] sm:$0xf] %v226_v10  ;;  %v228_v11 = vld [vmem:[%s2300_s29 + $0x58] sm:$0xf] }
  0x19   : > { %v230_v12 = vld [vmem:[%s2300_s29 + $0x60] sm:$0xf]  ;;  %v232_v13 = vld [vmem:[%s2300_s29 + $0x68] sm:$0xf]  ;;  %229 = vst [vmem:[%s2307_s30 + $0x2c] sm:$0xf] %v228_v11 }
  0x1a   : > { %231 = vst [vmem:[%s2307_s30 + $0x30] sm:$0xf] %v230_v12  ;;  %233 = vst [vmem:[%s2307_s30 + $0x34] sm:$0xf] %v232_v13  ;;  %v234_v14 = vld [vmem:[%s2300_s29 + $0x70] sm:$0xf] }
  0x1b   : > { %v236_v15 = vld [vmem:[%s2300_s29 + $0x78] sm:$0xf]  ;;  %v238_v16 = vld [vmem:[%s2300_s29 + $0x80] sm:$0xf]  ;;  %235 = vst [vmem:[%s2307_s30 + $0x38] sm:$0xf] %v234_v14 }
  0x1c   : > { %237 = vst [vmem:[%s2307_s30 + $0x3c] sm:$0xf] %v236_v15  ;;  %239 = vst [vmem:[%s2307_s30 + $0x40] sm:$0xf] %v238_v16  ;;  %v240_v17 = vld [vmem:[%s2300_s29 + $0x88] sm:$0xf] }
  0x1d   : > { %v242_v18 = vld [vmem:[%s2300_s29 + $0x90] sm:$0xf]  ;;  %v244_v19 = vld [vmem:[%s2300_s29 + $0x98] sm:$0xf]  ;;  %241 = vst [vmem:[%s2307_s30 + $0x44] sm:$0xf] %v240_v17 }
  0x1e   : > { %243 = vst [vmem:[%s2307_s30 + $0x48] sm:$0xf] %v242_v18  ;;  %245 = vst [vmem:[%s2307_s30 + $0x4c] sm:$0xf] %v244_v19  ;;  %v246_v20 = vld [vmem:[%s2300_s29 + $0xa0] sm:$0xf] }
  0x1f   : > { %v248_v21 = vld [vmem:[%s2300_s29 + $0xa8] sm:$0xf]  ;;  %v250_v22 = vld [vmem:[%s2300_s29 + $0xb0] sm:$0xf]  ;;  %247 = vst [vmem:[%s2307_s30 + $0x50] sm:$0xf] %v246_v20 }
  0x20   : > { %249 = vst [vmem:[%s2307_s30 + $0x54] sm:$0xf] %v248_v21  ;;  %251 = vst [vmem:[%s2307_s30 + $0x58] sm:$0xf] %v250_v22  ;;  %v252_v23 = vld [vmem:[%s2300_s29 + $0xb8] sm:$0xf] }
  0x21   : > { %v254_v24 = vld [vmem:[%s2300_s29 + $0xc0] sm:$0xf]  ;;  %v256_v25 = vld [vmem:[%s2300_s29 + $0xc8] sm:$0xf]  ;;  %253 = vst [vmem:[%s2307_s30 + $0x5c] sm:$0xf] %v252_v23 }
  0x22   : > { %255 = vst [vmem:[%s2307_s30 + $0x60] sm:$0xf] %v254_v24  ;;  %257 = vst [vmem:[%s2307_s30 + $0x64] sm:$0xf] %v256_v25  ;;  %v258_v26 = vld [vmem:[%s2300_s29 + $0xd0] sm:$0xf] }
  0x23   : > { %v260_v27 = vld [vmem:[%s2300_s29 + $0xd8] sm:$0xf]  ;;  %v262_v28 = vld [vmem:[%s2300_s29 + $0xe0] sm:$0xf]  ;;  %259 = vst [vmem:[%s2307_s30 + $0x68] sm:$0xf] %v258_v26 }
  0x24   : > { %261 = vst [vmem:[%s2307_s30 + $0x6c] sm:$0xf] %v260_v27  ;;  %263 = vst [vmem:[%s2307_s30 + $0x70] sm:$0xf] %v262_v28  ;;  %v264_v29 = vld [vmem:[%s2300_s29 + $0xe8] sm:$0xf] }
  0x25   : > { %v266_v30 = vld [vmem:[%s2300_s29 + $0xf0] sm:$0xf]  ;;  %v268_v31 = vld [vmem:[%s2300_s29 + $0xf8] sm:$0xf]  ;;  %265 = vst [vmem:[%s2307_s30 + $0x74] sm:$0xf] %v264_v29 }
  0x26   : > { %267 = vst [vmem:[%s2307_s30 + $0x78] sm:$0xf] %v266_v30  ;;  %269 = vst [vmem:[%s2307_s30 + $0x7c] sm:$0xf] %v268_v31  ;;  %v270_v32 = vld [vmem:[%s2300_s29 + $0x100] sm:$0xf] }
  0x27   : > { %v272_v33 = vld [vmem:[%s2300_s29 + $0x108] sm:$0xf]  ;;  %v274_v34 = vld [vmem:[%s2300_s29 + $0x110] sm:$0xf]  ;;  %271 = vst [vmem:[%s2307_s30 + $0x80] sm:$0xf] %v270_v32 }
  0x28   : > { %273 = vst [vmem:[%s2307_s30 + $0x84] sm:$0xf] %v272_v33  ;;  %275 = vst [vmem:[%s2307_s30 + $0x88] sm:$0xf] %v274_v34  ;;  %v276_v35 = vld [vmem:[%s2300_s29 + $0x118] sm:$0xf] }
  0x29   : > { %v278_v36 = vld [vmem:[%s2300_s29 + $0x120] sm:$0xf]  ;;  %v280_v37 = vld [vmem:[%s2300_s29 + $0x128] sm:$0xf]  ;;  %277 = vst [vmem:[%s2307_s30 + $0x8c] sm:$0xf] %v276_v35 }
  0x2a   : > { %279 = vst [vmem:[%s2307_s30 + $0x90] sm:$0xf] %v278_v36  ;;  %281 = vst [vmem:[%s2307_s30 + $0x94] sm:$0xf] %v280_v37  ;;  %v282_v38 = vld [vmem:[%s2300_s29 + $0x130] sm:$0xf] }
  0x2b   : > { %v284_v39 = vld [vmem:[%s2300_s29 + $0x138] sm:$0xf]  ;;  %v286_v40 = vld [vmem:[%s2300_s29 + $0x140] sm:$0xf]  ;;  %283 = vst [vmem:[%s2307_s30 + $0x98] sm:$0xf] %v282_v38 }
  0x2c   : > { %285 = vst [vmem:[%s2307_s30 + $0x9c] sm:$0xf] %v284_v39  ;;  %287 = vst [vmem:[%s2307_s30 + $0xa0] sm:$0xf] %v286_v40  ;;  %v288_v41 = vld [vmem:[%s2300_s29 + $0x148] sm:$0xf] }
  0x2d   : > { %v290_v42 = vld [vmem:[%s2300_s29 + $0x150] sm:$0xf]  ;;  %v292_v43 = vld [vmem:[%s2300_s29 + $0x158] sm:$0xf]  ;;  %289 = vst [vmem:[%s2307_s30 + $0xa4] sm:$0xf] %v288_v41 }
  0x2e   : > { %291 = vst [vmem:[%s2307_s30 + $0xa8] sm:$0xf] %v290_v42  ;;  %293 = vst [vmem:[%s2307_s30 + $0xac] sm:$0xf] %v292_v43  ;;  %v294_v44 = vld [vmem:[%s2300_s29 + $0x160] sm:$0xf] }
  0x2f   : > { %v296_v45 = vld [vmem:[%s2300_s29 + $0x168] sm:$0xf]  ;;  %v298_v46 = vld [vmem:[%s2300_s29 + $0x170] sm:$0xf]  ;;  %295 = vst [vmem:[%s2307_s30 + $0xb0] sm:$0xf] %v294_v44 }
  0x30   : > { %297 = vst [vmem:[%s2307_s30 + $0xb4] sm:$0xf] %v296_v45  ;;  %299 = vst [vmem:[%s2307_s30 + $0xb8] sm:$0xf] %v298_v46  ;;  %v300_v47 = vld [vmem:[%s2300_s29 + $0x178] sm:$0xf] }
  0x31   : > { %v302_v48 = vld [vmem:[%s2300_s29 + $0x180] sm:$0xf]  ;;  %v304_v49 = vld [vmem:[%s2300_s29 + $0x188] sm:$0xf]  ;;  %301 = vst [vmem:[%s2307_s30 + $0xbc] sm:$0xf] %v300_v47 }
  0x32   : > { %303 = vst [vmem:[%s2307_s30 + $0xc0] sm:$0xf] %v302_v48  ;;  %305 = vst [vmem:[%s2307_s30 + $0xc4] sm:$0xf] %v304_v49  ;;  %v306_v50 = vld [vmem:[%s2300_s29 + $0x190] sm:$0xf] }
  0x33   : > { %v308_v51 = vld [vmem:[%s2300_s29 + $0x198] sm:$0xf]  ;;  %v310_v52 = vld [vmem:[%s2300_s29 + $0x1a0] sm:$0xf]  ;;  %307 = vst [vmem:[%s2307_s30 + $0xc8] sm:$0xf] %v306_v50 }
  0x34   : > { %309 = vst [vmem:[%s2307_s30 + $0xcc] sm:$0xf] %v308_v51  ;;  %311 = vst [vmem:[%s2307_s30 + $0xd0] sm:$0xf] %v310_v52  ;;  %v312_v53 = vld [vmem:[%s2300_s29 + $0x1a8] sm:$0xf] }
  0x35   : > { %v314_v54 = vld [vmem:[%s2300_s29 + $0x1b0] sm:$0xf]  ;;  %v316_v55 = vld [vmem:[%s2300_s29 + $0x1b8] sm:$0xf]  ;;  %313 = vst [vmem:[%s2307_s30 + $0xd4] sm:$0xf] %v312_v53 }
  0x36   : > { %315 = vst [vmem:[%s2307_s30 + $0xd8] sm:$0xf] %v314_v54  ;;  %317 = vst [vmem:[%s2307_s30 + $0xdc] sm:$0xf] %v316_v55  ;;  %v318_v56 = vld [vmem:[%s2300_s29 + $0x1c0] sm:$0xf] }
  0x37   : > { %v320_v57 = vld [vmem:[%s2300_s29 + $0x1c8] sm:$0xf]  ;;  %v322_v58 = vld [vmem:[%s2300_s29 + $0x1d0] sm:$0xf]  ;;  %319 = vst [vmem:[%s2307_s30 + $0xe0] sm:$0xf] %v318_v56 }
  0x38   : > { %321 = vst [vmem:[%s2307_s30 + $0xe4] sm:$0xf] %v320_v57  ;;  %323 = vst [vmem:[%s2307_s30 + $0xe8] sm:$0xf] %v322_v58  ;;  %v324_v59 = vld [vmem:[%s2300_s29 + $0x1d8] sm:$0xf] }
  0x39   : > { %v326_v60 = vld [vmem:[%s2300_s29 + $0x1e0] sm:$0xf]  ;;  %v328_v61 = vld [vmem:[%s2300_s29 + $0x1e8] sm:$0xf]  ;;  %325 = vst [vmem:[%s2307_s30 + $0xec] sm:$0xf] %v324_v59 }
  0x3a   : > { %327 = vst [vmem:[%s2307_s30 + $0xf0] sm:$0xf] %v326_v60  ;;  %329 = vst [vmem:[%s2307_s30 + $0xf4] sm:$0xf] %v328_v61  ;;  %v330_v62 = vld [vmem:[%s2300_s29 + $0x1f0] sm:$0xf] }
  0x3b   : > { %v332_v63 = vld [vmem:[%s2300_s29 + $0x1f8] sm:$0xf]  ;;  %v334_v0 = vld [vmem:[%s2300_s29 + $0x200] sm:$0xf]  ;;  %331 = vst [vmem:[%s2307_s30 + $0xf8] sm:$0xf] %v330_v62 }
  0x3c   : > { %333 = vst [vmem:[%s2307_s30 + $0xfc] sm:$0xf] %v332_v63  ;;  %335 = vst [vmem:[%s2307_s30 + $0x100] sm:$0xf] %v334_v0  ;;  %v336_v1 = vld [vmem:[%s2300_s29 + $0x208] sm:$0xf] }
  0x3d   : > { %v338_v2 = vld [vmem:[%s2300_s29 + $0x210] sm:$0xf]  ;;  %v340_v3 = vld [vmem:[%s2300_s29 + $0x218] sm:$0xf]  ;;  %337 = vst [vmem:[%s2307_s30 + $0x104] sm:$0xf] %v336_v1 }
  0x3e   : > { %339 = vst [vmem:[%s2307_s30 + $0x108] sm:$0xf] %v338_v2  ;;  %341 = vst [vmem:[%s2307_s30 + $0x10c] sm:$0xf] %v340_v3  ;;  %v342_v4 = vld [vmem:[%s2300_s29 + $0x220] sm:$0xf] }
  0x3f   : > { %v344_v5 = vld [vmem:[%s2300_s29 + $0x228] sm:$0xf]  ;;  %v346_v6 = vld [vmem:[%s2300_s29 + $0x230] sm:$0xf]  ;;  %343 = vst [vmem:[%s2307_s30 + $0x110] sm:$0xf] %v342_v4 }
  0x40   : > { %345 = vst [vmem:[%s2307_s30 + $0x114] sm:$0xf] %v344_v5  ;;  %347 = vst [vmem:[%s2307_s30 + $0x118] sm:$0xf] %v346_v6  ;;  %v348_v7 = vld [vmem:[%s2300_s29 + $0x238] sm:$0xf] }
  0x41   : > { %v350_v8 = vld [vmem:[%s2300_s29 + $0x240] sm:$0xf]  ;;  %v352_v9 = vld [vmem:[%s2300_s29 + $0x248] sm:$0xf]  ;;  %349 = vst [vmem:[%s2307_s30 + $0x11c] sm:$0xf] %v348_v7 }
  0x42   : > { %351 = vst [vmem:[%s2307_s30 + $0x120] sm:$0xf] %v350_v8  ;;  %353 = vst [vmem:[%s2307_s30 + $0x124] sm:$0xf] %v352_v9  ;;  %v354_v10 = vld [vmem:[%s2300_s29 + $0x250] sm:$0xf] }
  0x43   : > { %v356_v11 = vld [vmem:[%s2300_s29 + $0x258] sm:$0xf]  ;;  %v358_v12 = vld [vmem:[%s2300_s29 + $0x260] sm:$0xf]  ;;  %355 = vst [vmem:[%s2307_s30 + $0x128] sm:$0xf] %v354_v10 }
  0x44   : > { %357 = vst [vmem:[%s2307_s30 + $0x12c] sm:$0xf] %v356_v11  ;;  %359 = vst [vmem:[%s2307_s30 + $0x130] sm:$0xf] %v358_v12  ;;  %v360_v13 = vld [vmem:[%s2300_s29 + $0x268] sm:$0xf] }
  0x45   : > { %v362_v14 = vld [vmem:[%s2300_s29 + $0x270] sm:$0xf]  ;;  %v364_v15 = vld [vmem:[%s2300_s29 + $0x278] sm:$0xf]  ;;  %361 = vst [vmem:[%s2307_s30 + $0x134] sm:$0xf] %v360_v13 }
  0x46   : > { %363 = vst [vmem:[%s2307_s30 + $0x138] sm:$0xf] %v362_v14  ;;  %365 = vst [vmem:[%s2307_s30 + $0x13c] sm:$0xf] %v364_v15  ;;  %v366_v16 = vld [vmem:[%s2300_s29 + $0x280] sm:$0xf] }
  0x47   : > { %v368_v17 = vld [vmem:[%s2300_s29 + $0x288] sm:$0xf]  ;;  %v370_v18 = vld [vmem:[%s2300_s29 + $0x290] sm:$0xf]  ;;  %367 = vst [vmem:[%s2307_s30 + $0x140] sm:$0xf] %v366_v16 }
  0x48   : > { %369 = vst [vmem:[%s2307_s30 + $0x144] sm:$0xf] %v368_v17  ;;  %371 = vst [vmem:[%s2307_s30 + $0x148] sm:$0xf] %v370_v18  ;;  %v372_v19 = vld [vmem:[%s2300_s29 + $0x298] sm:$0xf] }
  0x49   : > { %v374_v20 = vld [vmem:[%s2300_s29 + $0x2a0] sm:$0xf]  ;;  %v376_v21 = vld [vmem:[%s2300_s29 + $0x2a8] sm:$0xf]  ;;  %373 = vst [vmem:[%s2307_s30 + $0x14c] sm:$0xf] %v372_v19 }
  0x4a   : > { %375 = vst [vmem:[%s2307_s30 + $0x150] sm:$0xf] %v374_v20  ;;  %377 = vst [vmem:[%s2307_s30 + $0x154] sm:$0xf] %v376_v21  ;;  %v378_v22 = vld [vmem:[%s2300_s29 + $0x2b0] sm:$0xf] }
  0x4b   : > { %v380_v23 = vld [vmem:[%s2300_s29 + $0x2b8] sm:$0xf]  ;;  %v382_v24 = vld [vmem:[%s2300_s29 + $0x2c0] sm:$0xf]  ;;  %379 = vst [vmem:[%s2307_s30 + $0x158] sm:$0xf] %v378_v22 }
  0x4c   : > { %381 = vst [vmem:[%s2307_s30 + $0x15c] sm:$0xf] %v380_v23  ;;  %383 = vst [vmem:[%s2307_s30 + $0x160] sm:$0xf] %v382_v24  ;;  %v384_v25 = vld [vmem:[%s2300_s29 + $0x2c8] sm:$0xf] }
  0x4d   : > { %v386_v26 = vld [vmem:[%s2300_s29 + $0x2d0] sm:$0xf]  ;;  %v388_v27 = vld [vmem:[%s2300_s29 + $0x2d8] sm:$0xf]  ;;  %385 = vst [vmem:[%s2307_s30 + $0x164] sm:$0xf] %v384_v25 }
  0x4e   : > { %387 = vst [vmem:[%s2307_s30 + $0x168] sm:$0xf] %v386_v26  ;;  %389 = vst [vmem:[%s2307_s30 + $0x16c] sm:$0xf] %v388_v27  ;;  %v390_v28 = vld [vmem:[%s2300_s29 + $0x2e0] sm:$0xf] }
  0x4f   : > { %v392_v29 = vld [vmem:[%s2300_s29 + $0x2e8] sm:$0xf]  ;;  %v394_v30 = vld [vmem:[%s2300_s29 + $0x2f0] sm:$0xf]  ;;  %391 = vst [vmem:[%s2307_s30 + $0x170] sm:$0xf] %v390_v28 }
  0x50   : > { %393 = vst [vmem:[%s2307_s30 + $0x174] sm:$0xf] %v392_v29  ;;  %395 = vst [vmem:[%s2307_s30 + $0x178] sm:$0xf] %v394_v30  ;;  %v396_v31 = vld [vmem:[%s2300_s29 + $0x2f8] sm:$0xf] }
  0x51   : > { %v398_v32 = vld [vmem:[%s2300_s29 + $0x300] sm:$0xf]  ;;  %v400_v33 = vld [vmem:[%s2300_s29 + $0x308] sm:$0xf]  ;;  %397 = vst [vmem:[%s2307_s30 + $0x17c] sm:$0xf] %v396_v31 }
  0x52   : > { %399 = vst [vmem:[%s2307_s30 + $0x180] sm:$0xf] %v398_v32  ;;  %401 = vst [vmem:[%s2307_s30 + $0x184] sm:$0xf] %v400_v33  ;;  %v402_v34 = vld [vmem:[%s2300_s29 + $0x310] sm:$0xf] }
  0x53   : > { %v404_v35 = vld [vmem:[%s2300_s29 + $0x318] sm:$0xf]  ;;  %v406_v36 = vld [vmem:[%s2300_s29 + $0x320] sm:$0xf]  ;;  %403 = vst [vmem:[%s2307_s30 + $0x188] sm:$0xf] %v402_v34 }
  0x54   : > { %405 = vst [vmem:[%s2307_s30 + $0x18c] sm:$0xf] %v404_v35  ;;  %407 = vst [vmem:[%s2307_s30 + $0x190] sm:$0xf] %v406_v36  ;;  %v408_v37 = vld [vmem:[%s2300_s29 + $0x328] sm:$0xf] }
  0x55   : > { %v410_v38 = vld [vmem:[%s2300_s29 + $0x330] sm:$0xf]  ;;  %v412_v39 = vld [vmem:[%s2300_s29 + $0x338] sm:$0xf]  ;;  %409 = vst [vmem:[%s2307_s30 + $0x194] sm:$0xf] %v408_v37 }
  0x56   : > { %411 = vst [vmem:[%s2307_s30 + $0x198] sm:$0xf] %v410_v38  ;;  %413 = vst [vmem:[%s2307_s30 + $0x19c] sm:$0xf] %v412_v39  ;;  %v414_v40 = vld [vmem:[%s2300_s29 + $0x340] sm:$0xf] }
  0x57   : > { %v416_v41 = vld [vmem:[%s2300_s29 + $0x348] sm:$0xf]  ;;  %v418_v42 = vld [vmem:[%s2300_s29 + $0x350] sm:$0xf]  ;;  %415 = vst [vmem:[%s2307_s30 + $0x1a0] sm:$0xf] %v414_v40 }
  0x58   : > { %417 = vst [vmem:[%s2307_s30 + $0x1a4] sm:$0xf] %v416_v41  ;;  %419 = vst [vmem:[%s2307_s30 + $0x1a8] sm:$0xf] %v418_v42  ;;  %v420_v43 = vld [vmem:[%s2300_s29 + $0x358] sm:$0xf] }
  0x59   : > { %v422_v44 = vld [vmem:[%s2300_s29 + $0x360] sm:$0xf]  ;;  %v424_v45 = vld [vmem:[%s2300_s29 + $0x368] sm:$0xf]  ;;  %421 = vst [vmem:[%s2307_s30 + $0x1ac] sm:$0xf] %v420_v43 }
  0x5a   : > { %423 = vst [vmem:[%s2307_s30 + $0x1b0] sm:$0xf] %v422_v44  ;;  %425 = vst [vmem:[%s2307_s30 + $0x1b4] sm:$0xf] %v424_v45  ;;  %v426_v46 = vld [vmem:[%s2300_s29 + $0x370] sm:$0xf] }
  0x5b   : > { %v428_v47 = vld [vmem:[%s2300_s29 + $0x378] sm:$0xf]  ;;  %v430_v48 = vld [vmem:[%s2300_s29 + $0x380] sm:$0xf]  ;;  %427 = vst [vmem:[%s2307_s30 + $0x1b8] sm:$0xf] %v426_v46 }
  0x5c   : > { %429 = vst [vmem:[%s2307_s30 + $0x1bc] sm:$0xf] %v428_v47  ;;  %431 = vst [vmem:[%s2307_s30 + $0x1c0] sm:$0xf] %v430_v48  ;;  %v432_v49 = vld [vmem:[%s2300_s29 + $0x388] sm:$0xf] }
  0x5d   : > { %v434_v50 = vld [vmem:[%s2300_s29 + $0x390] sm:$0xf]  ;;  %v436_v51 = vld [vmem:[%s2300_s29 + $0x398] sm:$0xf]  ;;  %433 = vst [vmem:[%s2307_s30 + $0x1c4] sm:$0xf] %v432_v49 }
  0x5e   : > { %435 = vst [vmem:[%s2307_s30 + $0x1c8] sm:$0xf] %v434_v50  ;;  %437 = vst [vmem:[%s2307_s30 + $0x1cc] sm:$0xf] %v436_v51  ;;  %v438_v52 = vld [vmem:[%s2300_s29 + $0x3a0] sm:$0xf] }
  0x5f   : > { %v440_v53 = vld [vmem:[%s2300_s29 + $0x3a8] sm:$0xf]  ;;  %v442_v54 = vld [vmem:[%s2300_s29 + $0x3b0] sm:$0xf]  ;;  %439 = vst [vmem:[%s2307_s30 + $0x1d0] sm:$0xf] %v438_v52 }
  0x60   : > { %441 = vst [vmem:[%s2307_s30 + $0x1d4] sm:$0xf] %v440_v53  ;;  %443 = vst [vmem:[%s2307_s30 + $0x1d8] sm:$0xf] %v442_v54  ;;  %v444_v55 = vld [vmem:[%s2300_s29 + $0x3b8] sm:$0xf] }
  0x61   : > { %v446_v56 = vld [vmem:[%s2300_s29 + $0x3c0] sm:$0xf]  ;;  %v448_v57 = vld [vmem:[%s2300_s29 + $0x3c8] sm:$0xf]  ;;  %445 = vst [vmem:[%s2307_s30 + $0x1dc] sm:$0xf] %v444_v55 }
  0x62   : > { %447 = vst [vmem:[%s2307_s30 + $0x1e0] sm:$0xf] %v446_v56  ;;  %449 = vst [vmem:[%s2307_s30 + $0x1e4] sm:$0xf] %v448_v57  ;;  %v450_v58 = vld [vmem:[%s2300_s29 + $0x3d0] sm:$0xf] }
  0x63   : > { %v452_v59 = vld [vmem:[%s2300_s29 + $0x3d8] sm:$0xf]  ;;  %v454_v60 = vld [vmem:[%s2300_s29 + $0x3e0] sm:$0xf]  ;;  %451 = vst [vmem:[%s2307_s30 + $0x1e8] sm:$0xf] %v450_v58 }
  0x64   : > { %453 = vst [vmem:[%s2307_s30 + $0x1ec] sm:$0xf] %v452_v59  ;;  %455 = vst [vmem:[%s2307_s30 + $0x1f0] sm:$0xf] %v454_v60  ;;  %v456_v61 = vld [vmem:[%s2300_s29 + $0x3e8] sm:$0xf] }
  0x65   : > { %v458_v62 = vld [vmem:[%s2300_s29 + $0x3f0] sm:$0xf]  ;;  %v460_v63 = vld [vmem:[%s2300_s29 + $0x3f8] sm:$0xf]  ;;  %457 = vst [vmem:[%s2307_s30 + $0x1f4] sm:$0xf] %v456_v61 }
  0x66   : > { %459 = vst [vmem:[%s2307_s30 + $0x1f8] sm:$0xf] %v458_v62  ;;  %461 = vst [vmem:[%s2307_s30 + $0x1fc] sm:$0xf] %v460_v63  ;;  %v462_v0 = vld [vmem:[%s2300_s29 + $0x400] sm:$0xf] }
  0x67   : > { %v464_v1 = vld [vmem:[%s2300_s29 + $0x408] sm:$0xf]  ;;  %v466_v2 = vld [vmem:[%s2300_s29 + $0x410] sm:$0xf]  ;;  %463 = vst [vmem:[%s2307_s30 + $0x200] sm:$0xf] %v462_v0 }
  0x68   : > { %465 = vst [vmem:[%s2307_s30 + $0x204] sm:$0xf] %v464_v1  ;;  %467 = vst [vmem:[%s2307_s30 + $0x208] sm:$0xf] %v466_v2  ;;  %v468_v3 = vld [vmem:[%s2300_s29 + $0x418] sm:$0xf] }
  0x69   : > { %v470_v4 = vld [vmem:[%s2300_s29 + $0x420] sm:$0xf]  ;;  %v472_v5 = vld [vmem:[%s2300_s29 + $0x428] sm:$0xf]  ;;  %469 = vst [vmem:[%s2307_s30 + $0x20c] sm:$0xf] %v468_v3 }
  0x6a   : > { %471 = vst [vmem:[%s2307_s30 + $0x210] sm:$0xf] %v470_v4  ;;  %473 = vst [vmem:[%s2307_s30 + $0x214] sm:$0xf] %v472_v5  ;;  %v474_v6 = vld [vmem:[%s2300_s29 + $0x430] sm:$0xf] }
  0x6b   : > { %v476_v7 = vld [vmem:[%s2300_s29 + $0x438] sm:$0xf]  ;;  %v478_v8 = vld [vmem:[%s2300_s29 + $0x440] sm:$0xf]  ;;  %475 = vst [vmem:[%s2307_s30 + $0x218] sm:$0xf] %v474_v6 }
  0x6c   : > { %477 = vst [vmem:[%s2307_s30 + $0x21c] sm:$0xf] %v476_v7  ;;  %479 = vst [vmem:[%s2307_s30 + $0x220] sm:$0xf] %v478_v8  ;;  %v480_v9 = vld [vmem:[%s2300_s29 + $0x448] sm:$0xf] }
  0x6d   : > { %v482_v10 = vld [vmem:[%s2300_s29 + $0x450] sm:$0xf]  ;;  %v484_v11 = vld [vmem:[%s2300_s29 + $0x458] sm:$0xf]  ;;  %481 = vst [vmem:[%s2307_s30 + $0x224] sm:$0xf] %v480_v9 }
  0x6e   : > { %483 = vst [vmem:[%s2307_s30 + $0x228] sm:$0xf] %v482_v10  ;;  %485 = vst [vmem:[%s2307_s30 + $0x22c] sm:$0xf] %v484_v11  ;;  %v486_v12 = vld [vmem:[%s2300_s29 + $0x460] sm:$0xf] }
  0x6f   : > { %v488_v13 = vld [vmem:[%s2300_s29 + $0x468] sm:$0xf]  ;;  %v490_v14 = vld [vmem:[%s2300_s29 + $0x470] sm:$0xf]  ;;  %487 = vst [vmem:[%s2307_s30 + $0x230] sm:$0xf] %v486_v12 }
  0x70   : > { %489 = vst [vmem:[%s2307_s30 + $0x234] sm:$0xf] %v488_v13  ;;  %491 = vst [vmem:[%s2307_s30 + $0x238] sm:$0xf] %v490_v14  ;;  %v492_v15 = vld [vmem:[%s2300_s29 + $0x478] sm:$0xf] }
  0x71   : > { %493 = vst [vmem:[%s2307_s30 + $0x23c] sm:$0xf] %v492_v15 }
  0x72 PF: > { %p1863_p6 = scmp.ge.s32.totalorder %s2228_s19, 1  ;;  %p803_p7 = scmp.lt.s32.totalorder %s2228_s19, 3 }
  0x74   : > { %p804_p8 = pnand %p1863_p6, %p803_p7 }
  0x75   : > { %s810_s5 = sand.u32 (!%p804_p8), 1, %s2212_s15   ;;  %v2598_v16 = vld [vmem:[%s2749_s0] sm:$0xff] (!%p804_p8)  ;;  %v2603_v17 = vld [vmem:[%s2749_s0 + $0x8] sm:$0xff] (!%p804_p8)  ;;  %v2643_v49 = vld [vmem:[%s2749_s0 + $0x10] sm:$0xff] (!%p804_p8)  ;;  %vm2231_vm0 = vmmov (!%p804_p8), 0   ;;  %p856_p9 = scmp.lt.s32.totalorder (!%p804_p8), %s2220_s17, 1 }
  0x76   : > { %807 = sbr.rel (%p804_p8) target bundleno = 451 (0x1c3), region = 65  ;;  %v1866_v18 = vcombine.high (!%p804_p8), %v2598_v16, %v2598_v16  ;;  %v1868_v19 = vcombine.high (!%p804_p8), %v2603_v17, %v2603_v17  ;;  %v2650_v52 = vld [vmem:[%s2749_s0 + $0x18] sm:$0xff] (!%p804_p8)  ;;  %v1865_v54 = vcombine.low (!%p804_p8), %v2598_v16, %v2598_v16  ;;  %v1867_v55 = vcombine.low (!%p804_p8), %v2603_v17, %v2603_v17 }
  0x77   : > { %s2066_s10 = smul.u32 (!%p804_p8), 576, %s810_s5  ;;  %v1870_v58 = vcombine.high (!%p804_p8), %v2643_v49, %v2643_v49  ;;  %v1872_v61 = vcombine.high (!%p804_p8), %v2650_v52, %v2650_v52 }
  0x78   : > { %1514 = vmatprep.mubr.bf16.mxu0 (!%p804_p8), %v1866_v18  ;;  %1554 = vmatprep.mubr.bf16.mxu1 (!%p804_p8), %v1868_v19 }
  0x79   : > { %s2609_s11 = scalar_lea.vmem (!%p804_p8), [#allocation2], %s2066_s10 }
  0x7a   : > { %v2109_v20 = vld [vmem:[%s2609_s11 + $0x40] sm:$0xff] (!%p804_p8)   ;;  %v2113_v24 = vld [vmem:[%s2609_s11 + $0x48] sm:$0xff] (!%p804_p8)   ;;  %v2117_v28 = vld [vmem:[%s2609_s11 + $0x50] sm:$0xff] (!%p804_p8)  }
  0x7b   : > { %v2110_v21 = vld [vmem:[%s2609_s11 + $0xc0] sm:$0xff] (!%p804_p8)   ;;  %1948 = vmatprep.subr.bf16.mxu0 (!%p804_p8), %v2109_v20  ;;  %v2114_v25 = vld [vmem:[%s2609_s11 + $0xc8] sm:$0xff] (!%p804_p8)   ;;  %v2118_v29 = vld [vmem:[%s2609_s11 + $0xd0] sm:$0xff] (!%p804_p8)  }
  0x7c   : > { %v2111_v22 = vld [vmem:[%s2609_s11] sm:$0xff] (!%p804_p8)   ;;  %1970 = vmatprep.subr.bf16.mxu1 (!%p804_p8), %v2110_v21  ;;  %v2115_v26 = vld [vmem:[%s2609_s11 + $0x8] sm:$0xff] (!%p804_p8)   ;;  %v2119_v30 = vld [vmem:[%s2609_s11 + $0x10] sm:$0xff] (!%p804_p8)  }
  0x7d   : > { %v2112_v23 = vld [vmem:[%s2609_s11 + $0x80] sm:$0xff]   ;;  %1949 = vmatpush3.bf16.msra.mxu0 %v2111_v22  ;;  %v2116_v27 = vld [vmem:[%s2609_s11 + $0x88] sm:$0xff]   ;;  %v2120_v31 = vld [vmem:[%s2609_s11 + $0x90] sm:$0xff]   ;;  %s2761_s17 = smov (!%p856_p9, %s2220_s17), 1 }
  0x7e   : > { %1971 = vmatpush3.bf16.msra.mxu1 %v2112_v23  ;;  %1950 = vmatprep.subr.bf16.mxu0 %v2113_v24  ;;  %v2121_v32 = vld [vmem:[%s2609_s11 + $0x58] sm:$0xff]   ;;  %v2125_v36 = vld [vmem:[%s2609_s11 + $0x60] sm:$0xff]   ;;  %v2129_v40 = vld [vmem:[%s2609_s11 + $0x68] sm:$0xff]   ;;  %s2716_s26 = scalar_lea.vmem %s2752_s3, %s2761_s17  ;;  %s2722_s29 = scalar_lea.vmem %s2753_s4, %s2761_s17 }
  0x7f   : > { %1972 = vmatprep.subr.bf16.mxu1 %v2114_v25  ;;  %v2122_v33 = vld [vmem:[%s2609_s11 + $0xd8] sm:$0xff]   ;;  %v2126_v37 = vld [vmem:[%s2609_s11 + $0xe0] sm:$0xff]   ;;  %v2130_v41 = vld [vmem:[%s2609_s11 + $0xe8] sm:$0xff]   ;;  %v1869_v25 = vcombine.low %v2643_v49, %v2643_v49  ;;  %s1864_s30 = sshll.u32 %s2761_s17, 3 }
  0x80   : > { %v2123_v34 = vld [vmem:[%s2609_s11 + $0x18] sm:$0xff]   ;;  %v2127_v38 = vld [vmem:[%s2609_s11 + $0x20] sm:$0xff]   ;;  %v2131_v42 = vld [vmem:[%s2609_s11 + $0x28] sm:$0xff]   ;;  %s861_s7 = scalar_lea.vmem %s2751_s2, %s1864_s30 }
  0x81   : > { %1951 = vmatpush3.bf16.msra.mxu0 %v2115_v26  ;;  %v2124_v35 = vld [vmem:[%s2609_s11 + $0x98] sm:$0xff]   ;;  %v2128_v39 = vld [vmem:[%s2609_s11 + $0xa0] sm:$0xff]   ;;  %v2132_v43 = vld [vmem:[%s2609_s11 + $0xa8] sm:$0xff]  }
  0x82   : > { %1973 = vmatpush3.bf16.msra.mxu1 %v2116_v27  ;;  %1952 = vmatprep.subr.bf16.mxu0 %v2117_v28  ;;  %v2133_v44 = vld [vmem:[%s2609_s11 + $0x70] sm:$0xff]   ;;  %v2137_v48 = vld [vmem:[%s2609_s11 + $0x78] sm:$0xff]   ;;  %v2145_v56 = vld [vmem:[%s2609_s11 + $0x140] sm:$0xff]   ;;  %v2230_v28 = vmov 0.0  }
  0x83   : > { %1974 = vmatprep.subr.bf16.mxu1 %v2118_v29  ;;  %v2134_v45 = vld [vmem:[%s2609_s11 + $0xf0] sm:$0xff]   ;;  %v2138_v50 = vld [vmem:[%s2609_s11 + $0xf8] sm:$0xff]   ;;  %v2146_v57 = vld [vmem:[%s2609_s11 + $0x100] sm:$0xff]   ;;  %v1871_v29 = vcombine.low %v2650_v52, %v2650_v52  ;;  %1687 = vst [vmem:[%s2716_s26] sm:$0x1] %v2230_v28 }
  0x84   : > { %v2135_v46 = vld [vmem:[%s2609_s11 + $0x30] sm:$0xff]   ;;  %v2139_v51 = vld [vmem:[%s2609_s11 + $0x38] sm:$0xff]   ;;  %v2147_v59 = vld [vmem:[%s2609_s11 + $0x1c0] sm:$0xff]   ;;  %1688 = vst [vmem:[%s2722_s29] sm:$0x1] %v2230_v28 }
  0x85   : > { %1953 = vmatpush3.bf16.msra.mxu0 %v2119_v30  ;;  %v2136_v47 = vld [vmem:[%s2609_s11 + $0xb0] sm:$0xff]   ;;  %v2140_v53 = vld [vmem:[%s2609_s11 + $0xb8] sm:$0xff]   ;;  %v2148_v60 = vld [vmem:[%s2609_s11 + $0x180] sm:$0xff]  }
  0x86   : > { %1975 = vmatpush3.bf16.msra.mxu1 %v2120_v31  ;;  %1954 = vmatprep.subr.bf16.mxu0 %v2121_v32  ;;  %v2149_v62 = vld [vmem:[%s2609_s11 + $0x148] sm:$0xff]   ;;  %v2153_v2 = vld [vmem:[%s2609_s11 + $0x150] sm:$0xff]   ;;  %v2157_v6 = vld [vmem:[%s2609_s11 + $0x158] sm:$0xff]  }
  0x87   : > { %1976 = vmatprep.subr.bf16.mxu1 %v2122_v33  ;;  %v2150_v63 = vld [vmem:[%s2609_s11 + $0x108] sm:$0xff]   ;;  %v2154_v3 = vld [vmem:[%s2609_s11 + $0x110] sm:$0xff]   ;;  %v2158_v7 = vld [vmem:[%s2609_s11 + $0x118] sm:$0xff]  }
  0x88   : > { %v2151_v0 = vld [vmem:[%s2609_s11 + $0x1c8] sm:$0xff]   ;;  %v2155_v4 = vld [vmem:[%s2609_s11 + $0x1d0] sm:$0xff]   ;;  %v2159_v8 = vld [vmem:[%s2609_s11 + $0x1d8] sm:$0xff]  }
  0x89   : > { %1955 = vmatpush3.bf16.msra.mxu0 %v2123_v34  ;;  %v2152_v1 = vld [vmem:[%s2609_s11 + $0x188] sm:$0xff]   ;;  %v2156_v5 = vld [vmem:[%s2609_s11 + $0x190] sm:$0xff]   ;;  %v2160_v9 = vld [vmem:[%s2609_s11 + $0x198] sm:$0xff]  }
  0x8a   : > { %1977 = vmatpush3.bf16.msra.mxu1 %v2124_v35  ;;  %1956 = vmatprep.subr.bf16.mxu0 %v2125_v36  ;;  %v2161_v10 = vld [vmem:[%s2609_s11 + $0x160] sm:$0xff]   ;;  %v2165_v14 = vld [vmem:[%s2609_s11 + $0x168] sm:$0xff]   ;;  %v2169_v18 = vld [vmem:[%s2609_s11 + $0x170] sm:$0xff]  }
  0x8b   : > { %1978 = vmatprep.subr.bf16.mxu1 %v2126_v37  ;;  %v2162_v11 = vld [vmem:[%s2609_s11 + $0x120] sm:$0xff]   ;;  %v2166_v15 = vld [vmem:[%s2609_s11 + $0x128] sm:$0xff]   ;;  %v2170_v19 = vld [vmem:[%s2609_s11 + $0x130] sm:$0xff]  }
  0x8c   : > { %v2163_v12 = vld [vmem:[%s2609_s11 + $0x1e0] sm:$0xff]   ;;  %v2167_v16 = vld [vmem:[%s2609_s11 + $0x1e8] sm:$0xff]   ;;  %v2171_v20 = vld [vmem:[%s2609_s11 + $0x1f0] sm:$0xff]  }
  0x8d   : > { %1957 = vmatpush3.bf16.msra.mxu0 %v2127_v38  ;;  %v2164_v13 = vld [vmem:[%s2609_s11 + $0x1a0] sm:$0xff]   ;;  %v2168_v17 = vld [vmem:[%s2609_s11 + $0x1a8] sm:$0xff]   ;;  %v2172_v21 = vld [vmem:[%s2609_s11 + $0x1b0] sm:$0xff]  }
  0x8e   : > { %1979 = vmatpush3.bf16.msra.mxu1 %v2128_v39  ;;  %1958 = vmatprep.subr.bf16.mxu0 %v2129_v40  ;;  %v2173_v22 = vld [vmem:[%s2609_s11 + $0x178] sm:$0xff]   ;;  %v2181_v27 = vld [vmem:[%s2609_s11 + $0x200] sm:$0xff]   ;;  %v2182_v30 = vld [vmem:[%s2609_s11 + $0x208] sm:$0xff]  }
  0x8f   : > { %1980 = vmatprep.subr.bf16.mxu1 %v2130_v41  ;;  %v2174_v23 = vld [vmem:[%s2609_s11 + $0x138] sm:$0xff]   ;;  %v2183_v31 = vld [vmem:[%s2609_s11 + $0x210] sm:$0xff]   ;;  %v2185_v33 = vld [vmem:[%s2609_s11 + $0x220] sm:$0xff]  }
  0x90   : > { %v2175_v24 = vld [vmem:[%s2609_s11 + $0x1f8] sm:$0xff]   ;;  %v2186_v34 = vld [vmem:[%s2609_s11 + $0x228] sm:$0xff]   ;;  %v2187_v35 = vld [vmem:[%s2609_s11 + $0x230] sm:$0xff]  }
  0x91   : > { %1959 = vmatpush3.bf16.msra.mxu0 %v2131_v42  ;;  %v2178_v26 = vld [vmem:[%s2609_s11 + $0x1b8] sm:$0xff]   ;;  %v2189_v37 = vld [vmem:[%s2749_s0 + $0x20] ss:$0 sps:$4 sm:$0xff]  }
  0x92   : > { %1981 = vmatpush3.bf16.msra.mxu1 %v2132_v43  ;;  %1960 = vmatprep.subr.bf16.mxu0 %v2133_v44  ;;  %v2184_v32 = vld [vmem:[%s2609_s11 + $0x218] sm:$0xff]  }
  0x93   : > { %1982 = vmatprep.subr.bf16.mxu1 %v2134_v45  ;;  %v2188_v36 = vld [vmem:[%s2609_s11 + $0x238] sm:$0xff]  }
  0x95   : > { %1961 = vmatpush3.bf16.msra.mxu0 %v2135_v46 }
  0x96   : > { %1983 = vmatpush3.bf16.msra.mxu1 %v2136_v47  ;;  %1962 = vmatprep.subr.bf16.mxu0 %v2137_v48 }
  0x97   : > { %1984 = vmatprep.subr.bf16.mxu1 %v2138_v50 }
  0x99   : > { %1963 = vmatpush3.bf16.msra.mxu0 %v2139_v51 }
  0x9a   : > { %1985 = vmatpush3.bf16.msra.mxu1 %v2140_v53  ;;  %1992 = vmatprep.subr.bf16.mxu0 %v2145_v56 }
  0x9b   : > { %2014 = vmatprep.subr.bf16.mxu1 %v2147_v59 }
  0x9c   : > { %1515 = vmatmul.mubr.bf16.vlgmr.msra.gmra.mrb[0].mxu0 %v1865_v54 }
  0x9d   : > { %1555 = vmatmul.mubr.bf16.vlgmr.msra.gmra.mrb[0].mxu1 %v1867_v55  ;;  %1993 = vmatpush3.bf16.msra.mxu0 %v2146_v57 }
  0x9e   : > { %1594 = vmatprep.mubr.bf16.mxu0 %v1870_v58  ;;  %2015 = vmatpush3.bf16.msra.mxu1 %v2148_v60 }
  0x9f   : > { %1994 = vmatprep.subr.bf16.mxu0 %v2149_v62  ;;  %1634 = vmatprep.mubr.bf16.mxu1 %v1872_v61 }
  0xa0   : > { %2016 = vmatprep.subr.bf16.mxu1 %v2151_v0 }
  0xa1   : > { %1995 = vmatpush3.bf16.msra.mxu0 %v2150_v63 }
  0xa2   : > { %2017 = vmatpush3.bf16.msra.mxu1 %v2152_v1  ;;  %1996 = vmatprep.subr.bf16.mxu0 %v2153_v2 }
  0xa3   : > { %2018 = vmatprep.subr.bf16.mxu1 %v2155_v4 }
  0xa5   : > { %1997 = vmatpush3.bf16.msra.mxu0 %v2154_v3 }
  0xa6   : > { %2019 = vmatpush3.bf16.msra.mxu1 %v2156_v5  ;;  %1998 = vmatprep.subr.bf16.mxu0 %v2157_v6 }
  0xa7   : > { %2020 = vmatprep.subr.bf16.mxu1 %v2159_v8 }
  0xa9   : > { %1999 = vmatpush3.bf16.msra.mxu0 %v2158_v7 }
  0xaa   : > { %2021 = vmatpush3.bf16.msra.mxu1 %v2160_v9  ;;  %2000 = vmatprep.subr.bf16.mxu0 %v2161_v10 }
  0xab   : > { %2022 = vmatprep.subr.bf16.mxu1 %v2163_v12  ;;  %v1689_v12 = vld [vmem:[%s2716_s26] sm:$0x1] }
  0xad   : > { %2001 = vmatpush3.bf16.msra.mxu0 %v2162_v11 }
  0xae   : > { %2023 = vmatpush3.bf16.msra.mxu1 %v2164_v13  ;;  %2002 = vmatprep.subr.bf16.mxu0 %v2165_v14 }
  0xaf   : > { %2024 = vmatprep.subr.bf16.mxu1 %v2167_v16 }
  0xb1   : > { %2003 = vmatpush3.bf16.msra.mxu0 %v2166_v15  ;;  %v1698_v15 = vld [vmem:[%s2722_s29] sm:$0x1] }
  0xb2   : > { %2025 = vmatpush3.bf16.msra.mxu1 %v2168_v17  ;;  %2004 = vmatprep.subr.bf16.mxu0 %v2169_v18 }
  0xb3   : > { %2026 = vmatprep.subr.bf16.mxu1 %v2171_v20 }
  0xb5   : > { %2005 = vmatpush3.bf16.msra.mxu0 %v2170_v19 }
  0xb6   : > { %2027 = vmatpush3.bf16.msra.mxu1 %v2172_v21  ;;  %2006 = vmatprep.subr.bf16.mxu0 %v2173_v22 }
  0xb7   : > { %2028 = vmatprep.subr.bf16.mxu1 %v2175_v24 }
  0xb9   : > { %2007 = vmatpush3.bf16.msra.mxu0 %v2174_v23 }
  0xba   : > { %2045 = vmatprep.subr.bf16.mxu0 %v2230_v28  ;;  %2029 = vmatpush3.bf16.msra.mxu1 %v2178_v26 }
  0xbc   : > { %1595 = vmatmul.mubr.bf16.vlgmr.msra.gmra.mrb[4].mxu0 %v1869_v25 }
  0xbd   : > { %2046 = vmatpush3.bf16.msra.mxu0 %v2181_v27  ;;  %2061 = vmatprep.mubr.msk.bf16.mxu0 %vm2231_vm0, %v2230_v28 }
  0xbe   : > { %1635 = vmatmul.mubr.bf16.vlgmr.msra.gmra.mrb[4].mxu1 %v1871_v29  ;;  %2047 = vmatprep.subr.bf16.mxu0 %v2230_v28 }
  0xc1   : > { %2048 = vmatpush3.bf16.msra.mxu0 %v2182_v30 }
  0xc2   : > { %2049 = vmatprep.subr.bf16.mxu0 %v2230_v28 }
  0xc5   : > { %2050 = vmatpush3.bf16.msra.mxu0 %v2183_v31 }
  0xc6   : > { %2051 = vmatprep.subr.bf16.mxu0 %v2230_v28 }
  0xc9   : > { %2052 = vmatpush3.bf16.msra.mxu0 %v2184_v32 }
  0xca   : > { %2053 = vmatprep.subr.bf16.mxu0 %v2230_v28 }
  0xcd   : > { %2054 = vmatpush3.bf16.msra.mxu0 %v2185_v33 }
  0xce   : > { %2055 = vmatprep.subr.bf16.mxu0 %v2230_v28 }
  0xd1   : > { %2056 = vmatpush3.bf16.msra.mxu0 %v2186_v34 }
  0xd2   : > { %2057 = vmatprep.subr.bf16.mxu0 %v2230_v28 }
  0xd5   : > { %2058 = vmatpush3.bf16.msra.mxu0 %v2187_v35 }
  0xd6   : > { %2059 = vmatprep.subr.bf16.mxu0 %v2230_v28 }
  0xd9   : > { %2060 = vmatpush3.bf16.msra.mxu0 %v2188_v36 }
  0xdc   : > { %2062 = vmatmul.mubr.bf16.vlgmr.msra.gmra.mrb[8].mxu0 %v2189_v37 }
 0x16f   : > { %v1964_v38 = vpop.f32.mrb[0].mxu0 }
 0x170   : > { %v1986_v39 = vpop.f32.mrb[0].mxu1  ;;  %v1965_v40 = vpop.f32.mrb[1].mxu0 }
 0x171   : > { %v1966_v41 = vadd.f32 %v1965_v40, %v1964_v38  ;;  %v1987_v42 = vpop.f32.mrb[1].mxu1  ;;  %v1967_v43 = vpop.f32.mrb[2].mxu0 }
 0x172   : > { %v1988_v44 = vadd.f32 %v1987_v42, %v1986_v39  ;;  %v1968_v45 = vpop.f32.mrb[3].mxu0  ;;  %v1989_v46 = vpop.f32.mrb[2].mxu1 }
 0x173   : > { %v1990_v47 = vpop.f32.mrb[3].mxu1 }
 0x174   : > { %v1557_v48 = vadd.f32 %v1988_v44, %v1966_v41 }
 0x18f   : > { %v2008_v49 = vpop.f32.mrb[4].mxu0 }
 0x190   : > { %v2009_v50 = vpop.f32.mrb[5].mxu0 }
 0x191   : > { %v2010_v51 = vadd.f32 %v2009_v50, %v2008_v49  ;;  %v2011_v52 = vpop.f32.mrb[6].mxu0  ;;  %v2030_v53 = vpop.f32.mrb[4].mxu1 }
 0x192   : > { %v2012_v54 = vpop.f32.mrb[7].mxu0  ;;  %v2031_v55 = vpop.f32.mrb[5].mxu1 }
 0x193   : > { %v1597_v56 = vadd.f32 %v2010_v51, %v1557_v48  ;;  %v2032_v57 = vadd.f32 %v2031_v55, %v2030_v53  ;;  %v2033_v58 = vpop.f32.mrb[6].mxu1 }
 0x194   : > { %v2034_v59 = vpop.f32.mrb[7].mxu1 }
 0x195   : > { %v1637_v60 = vadd.f32 %v2032_v57, %v1597_v56 }
 0x1af   : > { %v1676_v61 = vpop.f32.mrb[8].mxu0 }
 0x1b0   : > { %v1677_v62 = vadd.f32 %v1676_v61, %v1637_v60  ;;  %v2063_v63 = vpop.f32.mrb[9].mxu0 }
 0x1b1   : > { %v1679_v0 = vpop.f32.mrb[10].mxu0 }
 0x1b2   : > { %1682 = vst [vmem:[%s861_s7] sm:$0xff] %v1677_v62  ;;  %v1690_v1 = vrot.slane %v1677_v62, 4  ;;  %v1699_v2 = vmul.f32 %v1677_v62, %v1677_v62  ;;  %v2064_v3 = vpop.f32.mrb[11].mxu0 }
 0x1b4   : > { %v1691_v4 = vadd.f32 %v1690_v1, %v1677_v62  ;;  %v1700_v5 = vrot.slane %v1699_v2, 4 }
 0x1b6   : > { %v1692_v6 = vrot.slane %v1691_v4, 2  ;;  %v1701_v7 = vadd.f32 %v1700_v5, %v1699_v2 }
 0x1b8   : > { %v1693_v8 = vadd.f32 %v1692_v6, %v1691_v4  ;;  %v1702_v9 = vrot.slane %v1701_v7, 2 }
 0x1ba   : > { %v1694_v10 = vrot.slane %v1693_v8, 1  ;;  %v1703_v11 = vadd.f32 %v1702_v9, %v1701_v7 }
 0x1bc   : > { %v1695_v13 = vadd.f32 %v1694_v10, %v1693_v8  ;;  %v1704_v14 = vrot.slane %v1703_v11, 1 }
 0x1be   : > { %v1696_v16 = vadd.f32 %v1695_v13, %v1689_v12  ;;  %v1705_v17 = vadd.f32 %v1704_v14, %v1703_v11 }
 0x1c0   : > { %1697 = vst [vmem:[%s2716_s26] sm:$0x1] %v1696_v16  ;;  %v1706_v18 = vadd.f32 %v1705_v17, %v1698_v15 }
 0x1c2   : > { %1707 = vst [vmem:[%s2722_s29] sm:$0x1] %v1706_v18 }
 0x1c3 PF: > { %s15_s19 = sadd.s32 1, %s2228_s19   ;;  %s2754_s15 = smov %s2216_s16 }
 0x1c4   : > { %p12_p10 = scmp.ge.s32.totalorder %s15_s19, 4   ;;  %s2755_s16 = smov %s2292_s23 }
 0x1c5   : > { %s2756_s17 = smov %s2224_s18  ;;  %s2757_s18 = smov %s2759_s20 }
 0x1c6   :  { %14 = sbr.rel (!%p12_p10) target bundleno = 3 (0x3), region = 135 }

// kernel: image_classify.21
= control target key start
LH: loop header
LB: loop body
LE: loop exit
PB: predicated region body
PF: predicated region fallthrough
CT: control target
= control target key end

     0   :  { %v384_v3 = vmov 0.0|0.0   ;;  %vm385_vm0 = vmmov 0   ;;  %s592_s1 = inlined_call_operand.vmem [shape: f32[256,128], index: 1, kind: input, shape index: {}]   ;;  %s593_s0 = inlined_call_operand.vmem [shape: f32[8,256], index: 0, kind: input, shape index: {}]   ;;  %s594_s3 = inlined_call_operand.vmem [shape: f32[128,128], index: 3, kind: input, shape index: {}]   ;;  %s595_s2 = inlined_call_operand.vmem [shape: f32[1,128], index: 2, kind: input, shape index: {}]   ;;  %s596_s5 = inlined_call_operand.vmem [shape: f32[8,128], index: 5, kind: output, shape index: {0}]   ;;  %s597_s4 = inlined_call_operand.vmem [shape: f32[1,128], index: 4, kind: input, shape index: {}]   ;;  %s598_s6 = inlined_call_operand.vmem [shape: f32[8,128], index: 6, kind: output, shape index: {1}]  }
   0x1   :  { %v40_v0 = vld [vmem:[%s592_s1 + $0x80] sm:$0xff]  ;;  %v41_v1 = vld [vmem:[%s592_s1 + $0x88] sm:$0xff]  ;;  %357 = vmatprep.subr.bf16.mxu1 %v384_v3  ;;  %v42_v6 = vld [vmem:[%s592_s1 + $0x90] sm:$0xff] }
   0x2   :  { %v24_v2 = vld [vmem:[%s592_s1] sm:$0xff]  ;;  %v325_v4 = vpack.c.bf16 %v41_v1, %v40_v0  ;;  %v25_v5 = vld [vmem:[%s592_s1 + $0x8] sm:$0xff]  ;;  %v43_v7 = vld [vmem:[%s592_s1 + $0x98] sm:$0xff] }
   0x3   :  { %v327_v8 = vpack.c.bf16 %v25_v5, %v24_v2  ;;  %v329_v9 = vpack.c.bf16 %v43_v7, %v42_v6  ;;  %v26_v10 = vld [vmem:[%s592_s1 + $0x10] sm:$0xff]  ;;  %v27_v11 = vld [vmem:[%s592_s1 + $0x18] sm:$0xff]  ;;  %v44_v12 = vld [vmem:[%s592_s1 + $0xa0] sm:$0xff] }
   0x4   :  { %326 = vmatprep.subr.bf16.mxu0 %v325_v4  ;;  %v45_v13 = vld [vmem:[%s592_s1 + $0xa8] sm:$0xff]  ;;  %v331_v14 = vpack.c.bf16 %v27_v11, %v26_v10  ;;  %v28_v16 = vld [vmem:[%s592_s1 + $0x20] sm:$0xff]  ;;  %v46_v18 = vld [vmem:[%s592_s1 + $0xb0] sm:$0xff] }
   0x5   :  { %328 = vmatpush3.bf16.msra.mxu0 %v327_v8  ;;  %v333_v15 = vpack.c.bf16 %v45_v13, %v44_v12  ;;  %v29_v17 = vld [vmem:[%s592_s1 + $0x28] sm:$0xff]  ;;  %v47_v19 = vld [vmem:[%s592_s1 + $0xb8] sm:$0xff]  ;;  %v30_v22 = vld [vmem:[%s592_s1 + $0x30] sm:$0xff]  ;;  %v386_v12 = vmov 0.0  }
   0x6   :  { %330 = vmatprep.subr.bf16.mxu0 %v329_v9  ;;  %v335_v20 = vpack.c.bf16 %v29_v17, %v28_v16  ;;  %v337_v21 = vpack.c.bf16 %v47_v19, %v46_v18  ;;  %v31_v23 = vld [vmem:[%s592_s1 + $0x38] sm:$0xff]  ;;  %v48_v24 = vld [vmem:[%s592_s1 + $0xc0] sm:$0xff]  ;;  %v49_v25 = vld [vmem:[%s592_s1 + $0xc8] sm:$0xff]  ;;  %322 = vmatprep.mubr.msk.f32.mxu1 %vm385_vm0, %v386_v12 }
   0x7   :  { %v23_v26 = vld [vmem:[%s593_s0 + $0x8] sm:$0xff]  ;;  %v134_v27 = vld [vmem:[%s594_s3] sm:$0xff]  ;;  %v339_v29 = vpack.c.bf16 %v31_v23, %v30_v22  ;;  %v136_v31 = vld [vmem:[%s594_s3 + $0x10] sm:$0xff]  ;;  %v341_v33 = vpack.c.bf16 %v49_v25, %v48_v24 }
   0x8   :  { %127 = vmatprep.mubr.f32.mxu0 %v23_v26  ;;  %v135_v28 = vld [vmem:[%s594_s3 + $0x8] sm:$0xff]  ;;  %v137_v32 = vld [vmem:[%s594_s3 + $0x18] sm:$0xff]  ;;  %v32_v34 = vld [vmem:[%s592_s1 + $0x40] sm:$0xff] }
   0x9   :  { %332 = vmatpush3.bf16.msra.mxu0 %v331_v14  ;;  %v358_v30 = vpack.c.bf16 %v135_v28, %v134_v27  ;;  %v33_v35 = vld [vmem:[%s592_s1 + $0x48] sm:$0xff]  ;;  %v50_v36 = vld [vmem:[%s592_s1 + $0xd0] sm:$0xff]  ;;  %v51_v37 = vld [vmem:[%s592_s1 + $0xd8] sm:$0xff]  ;;  %v361_v38 = vpack.c.bf16 %v137_v32, %v136_v31 }
   0xa   :  { %334 = vmatprep.subr.bf16.mxu0 %v333_v15  ;;  %v138_v39 = vld [vmem:[%s594_s3 + $0x20] sm:$0xff]  ;;  %v139_v40 = vld [vmem:[%s594_s3 + $0x28] sm:$0xff]  ;;  %v343_v41 = vpack.c.bf16 %v33_v35, %v32_v34  ;;  %v345_v42 = vpack.c.bf16 %v51_v37, %v50_v36  ;;  %v34_v43 = vld [vmem:[%s592_s1 + $0x50] sm:$0xff] }
   0xb   :  { %359 = vmatpush3.bf16.msra.mxu1 %v358_v30  ;;  %v35_v44 = vld [vmem:[%s592_s1 + $0x58] sm:$0xff]  ;;  %v52_v45 = vld [vmem:[%s592_s1 + $0xe0] sm:$0xff]  ;;  %v53_v46 = vld [vmem:[%s592_s1 + $0xe8] sm:$0xff]  ;;  %v364_v47 = vpack.c.bf16 %v139_v40, %v138_v39 }
   0xc   :  { %360 = vmatprep.subr.bf16.mxu1 %v384_v3  ;;  %v140_v48 = vld [vmem:[%s594_s3 + $0x30] sm:$0xff]  ;;  %v141_v49 = vld [vmem:[%s594_s3 + $0x38] sm:$0xff]  ;;  %v347_v50 = vpack.c.bf16 %v35_v44, %v34_v43  ;;  %v349_v51 = vpack.c.bf16 %v53_v46, %v52_v45  ;;  %v36_v52 = vld [vmem:[%s592_s1 + $0x60] sm:$0xff] }
   0xd   :  { %336 = vmatpush3.bf16.msra.mxu0 %v335_v20  ;;  %v37_v53 = vld [vmem:[%s592_s1 + $0x68] sm:$0xff]  ;;  %v54_v54 = vld [vmem:[%s592_s1 + $0xf0] sm:$0xff]  ;;  %v55_v55 = vld [vmem:[%s592_s1 + $0xf8] sm:$0xff]  ;;  %v367_v56 = vpack.c.bf16 %v141_v49, %v140_v48 }
   0xe   :  { %338 = vmatprep.subr.bf16.mxu0 %v337_v21  ;;  %v142_v57 = vld [vmem:[%s594_s3 + $0x40] sm:$0xff]  ;;  %v143_v58 = vld [vmem:[%s594_s3 + $0x48] sm:$0xff]  ;;  %v351_v59 = vpack.c.bf16 %v37_v53, %v36_v52  ;;  %v353_v60 = vpack.c.bf16 %v55_v55, %v54_v54  ;;  %v38_v61 = vld [vmem:[%s592_s1 + $0x70] sm:$0xff] }
   0xf   :  { %362 = vmatpush3.bf16.msra.mxu1 %v361_v38  ;;  %v39_v62 = vld [vmem:[%s592_s1 + $0x78] sm:$0xff]  ;;  %v370_v63 = vpack.c.bf16 %v143_v58, %v142_v57  ;;  %v144_v0 = vld [vmem:[%s594_s3 + $0x50] sm:$0xff]  ;;  %v146_v5 = vld [vmem:[%s594_s3 + $0x60] sm:$0xff] }
  0x10   :  { %363 = vmatprep.subr.bf16.mxu1 %v384_v3  ;;  %v145_v1 = vld [vmem:[%s594_s3 + $0x58] sm:$0xff]  ;;  %v355_v2 = vpack.c.bf16 %v39_v62, %v38_v61  ;;  %v147_v6 = vld [vmem:[%s594_s3 + $0x68] sm:$0xff]  ;;  %v22_v7 = vld [vmem:[%s593_s0] sm:$0xff] }
  0x11   :  { %340 = vmatpush3.bf16.msra.mxu0 %v339_v29  ;;  %v373_v4 = vpack.c.bf16 %v145_v1, %v144_v0  ;;  %v376_v8 = vpack.c.bf16 %v147_v6, %v146_v5  ;;  %v148_v9 = vld [vmem:[%s594_s3 + $0x70] sm:$0xff]  ;;  %v149_v10 = vld [vmem:[%s594_s3 + $0x78] sm:$0xff]  ;;  %v236_v14 = vld [vmem:[%s595_s2] ss:$0 sm:$0xff] }
  0x12   :  { %342 = vmatprep.subr.bf16.mxu0 %v341_v33  ;;  %v379_v11 = vpack.c.bf16 %v149_v10, %v148_v9  ;;  %v237_v17 = vld [vmem:[%s597_s4] ss:$0 sm:$0xff] }
  0x13   :  { %365 = vmatpush3.bf16.msra.mxu1 %v364_v47 }
  0x14   :  { %366 = vmatprep.subr.bf16.mxu1 %v384_v3 }
  0x15   :  { %344 = vmatpush3.bf16.msra.mxu0 %v343_v41 }
  0x16   :  { %346 = vmatprep.subr.bf16.mxu0 %v345_v42 }
  0x17   :  { %368 = vmatpush3.bf16.msra.mxu1 %v367_v56 }
  0x18   :  { %369 = vmatprep.subr.bf16.mxu1 %v384_v3 }
  0x19   :  { %348 = vmatpush3.bf16.msra.mxu0 %v347_v50 }
  0x1a   :  { %350 = vmatprep.subr.bf16.mxu0 %v349_v51 }
  0x1b   :  { %371 = vmatpush3.bf16.msra.mxu1 %v370_v63 }
  0x1c   :  { %372 = vmatprep.subr.bf16.mxu1 %v384_v3 }
  0x1d   :  { %352 = vmatpush3.bf16.msra.mxu0 %v351_v59 }
  0x1e   :  { %354 = vmatprep.subr.bf16.mxu0 %v353_v60 }
  0x1f   :  { %374 = vmatpush3.bf16.msra.mxu1 %v373_v4 }
  0x20   :  { %375 = vmatprep.subr.bf16.mxu1 %v384_v3 }
  0x21   :  { %356 = vmatpush3.bf16.msra.mxu0 %v355_v2 }
  0x23   :  { %377 = vmatpush3.bf16.msra.mxu1 %v376_v8 }
  0x24   :  { %128 = vmatmul.mubr.f32.vlgmr.msra.gmra.mrb[0].mxu0 %v22_v7  ;;  %378 = vmatprep.subr.bf16.mxu1 %v384_v3 }
  0x27   :  { %380 = vmatpush3.bf16.msra.mxu1 %v379_v11 }
  0xf7   :  { %v270_v13 = vpop.f32.mrb[0].mxu0 }
  0xf8   :  { %v271_v15 = vpop.f32.mrb[1].mxu0 }
  0xf9   :  { %v272_v3 = vadd.f32 %v271_v15, %v270_v13 }
  0xfb   :  { %v130_v16 = vadd.f32 %v272_v3, %v236_v14 }
  0xfd   :  { %133 = vst [vmem:[%s596_s5] sm:$0xff] %v130_v16  ;;  %323 = vmatmul.mubr.f32.vlgmr.msra.gmra.mrb[0].mxu1 %v130_v16 }
 0x1d0   :  { %v223_v18 = vpop.f32.mrb[0].mxu1 }
 0x1d1   :  { %v224_v19 = vadd.f32 %v237_v17, %v223_v18  ;;  %v324_v20 = vpop.f32.mrb[1].mxu1 }
 0x1d3   :  { %227 = vst [vmem:[%s598_s6] sm:$0xff] %v224_v19 }

</bundles_post_ra>
